<compile_context>
chip_gen: v7x
topology: tpu7x:2x2x1
jax: 0.10.0
libtpu: 0.0.40
codegen_flags: <defaults>
</compile_context>

<pallas_src>
import functools

import jax
import jax.numpy as jnp
from jax.experimental import pallas as pl
from jax.experimental.pallas import tpu as pltpu


# ----------------------------- Pallas kernels -----------------------------

def _conv_relu_pool(x, cw_ref, s, cb, *, h, w, cout):
    """Fused Conv2d(3x3, pad=1) + bias + ReLU + global average pool for one stream.

    x      : (bt, h+2, w+2, cin) f32 value -- 1-px padded NHWC image tile
    cw_ref : (2, 9, cin, cout) bf16 ref    -- conv weight slabs, tap index = 3*dy+dx
    cb     : (1, cout) f32                 -- conv bias
    returns: (bt, cout) f32 pooled features
    """
    bt, cin = x.shape[0], x.shape[3]
    hw = h * w
    # In-kernel im2col: 9 shifted-slice matmuls accumulated in f32.  No (M, K) patch
    # tensor ever exists in HBM and no K zero-padding is DMA'd.
    acc = jnp.zeros((bt * hw, cout), jnp.float32)
    for dy in range(3):
        for dx in range(3):
            tap = x[:, dy:dy + h, dx:dx + w, :]                    # (bt, h, w, cin)
            patches = tap.reshape(bt * hw, cin).astype(jnp.bfloat16)
            acc = acc + jnp.dot(patches, cw_ref[s, 3 * dy + dx],
                                preferred_element_type=jnp.float32)
    acts = jnp.maximum(acc + cb, 0.0)                              # bias + ReLU in f32
    # Global average pool = reshape + per-image sublane reduce (no pooling matrix).
    return jnp.sum(acts.reshape(bt, hw, cout), axis=1) * (1.0 / hw)


def _two_ss_kernel(xp1_ref, xp2_ref, cw_ref, nw1_ref, nw2_ref, b_ref, out_ref,
                   *, h, w, cout, hidden, proj):
    """One grid step: backbone+neck for BOTH streams over a tile of flattened
    (view, batch) pairs plus the cosine head; writes this tile's partial cosine sum."""

    def stream(xp_ref, s):
        x = xp_ref[...].astype(jnp.float32)                        # bf16 in HBM, f32 in-kernel
        cb = b_ref[3 * s:3 * s + 1, 0:cout]                        # (1, cout) f32
        b1 = b_ref[3 * s + 1:3 * s + 2, 0:hidden]
        b2 = b_ref[3 * s + 2:3 * s + 3, 0:proj]
        pooled = _conv_relu_pool(x, cw_ref, s, cb, h=h, w=w, cout=cout)   # (bt, cout)
        hid = jnp.dot(pooled.astype(nw1_ref.dtype), nw1_ref[s],
                      preferred_element_type=jnp.float32) + b1
        hid = jnp.maximum(hid, 0.0)
        return jnp.dot(hid.astype(nw2_ref.dtype), nw2_ref[s],
                       preferred_element_type=jnp.float32) + b2    # (bt, proj) f32

    p1 = stream(xp1_ref, 0)
    p2 = stream(xp2_ref, 1)

    # negative-cosine-similarity head (f32, all shapes kept 2-D)
    eps = 1e-12
    n1 = p1 * jax.lax.rsqrt(jnp.sum(p1 * p1, axis=-1, keepdims=True) + eps)
    n2 = p2 * jax.lax.rsqrt(jnp.sum(p2 * p2, axis=-1, keepdims=True) + eps)
    cos = jnp.sum(n1 * n2, axis=-1, keepdims=True)                 # (bt, 1)
    partial = jnp.sum(cos, axis=0, keepdims=True)                  # (1, 1)
    # Independent per-step partial -> grid axis stays fully "parallel"; the wrapper
    # reads [g, 0, 0] and does the tiny G-element reduction + scaling.
    out_ref[...] = jnp.broadcast_to(partial, (8, 128))


def _backbone_kernel(xp_ref, cw_ref, b_ref, out_ref, *, h, w, cout):
    # forward_knn path: conv + bias + ReLU + global average pool, fused & tiled.
    x = xp_ref[...].astype(jnp.float32)
    cb = b_ref[0:1, 0:cout]
    out_ref[...] = _conv_relu_pool(x, cw_ref, 0, cb, h=h, w=w, cout=cout)


# ----------------------------- JAX glue -----------------------------

def _pad_nhwc_bf16(x):
    # NCHW f32 -> 1-px zero-padded NHWC bf16 (the only conv input that touches HBM).
    xt = jnp.transpose(x, (0, 2, 3, 1))
    xt = jnp.pad(xt, ((0, 0), (1, 1), (1, 1), (0, 0)))
    return xt.astype(jnp.bfloat16)


def _resident_spec(shape):
    nd = len(shape)
    return pl.BlockSpec(shape, lambda g, _n=nd: (0,) * _n)         # VMEM-resident across grid


def _tile_rows(n, out_tile_constrained=False):
    # Images per grid step.  Small n -> one step (no per-step overhead); larger n ->
    # tile.  When the tile is also an output block (forward_knn) keep it 8-aligned.
    if n <= 8:
        return n
    if out_tile_constrained:
        return 8 if n % 8 == 0 else n
    for d in (8, 4, 2):
        if n % d == 0:
            return d
    return 1


# ----------------------------- TwoSSModel -----------------------------

class TwoSSModelPallas:
    """Two-stream SSL model: backbone/neck (stream 1), backbone2/neck2 (stream 2),
    negative-mean-cosine head.  The forward pass runs as a single fused Pallas kernel."""

    def __init__(self, key, cin=4, cout=32, hidden=64, proj=32, swap_transform=False):
        self.swap_transform = swap_transform
        self.cin, self.cout, self.hidden, self.proj = cin, cout, hidden, proj

        def stream_params(k):
            kc, kcb, k1, kb1, k2, kb2 = jax.random.split(k, 6)
            wconv = jax.random.normal(kc, (cout, cin, 3, 3), jnp.float32) * 0.05
            cb = jax.random.normal(kcb, (cout,), jnp.float32) * 0.01
            w1 = jax.random.normal(k1, (cout, hidden), jnp.float32) * 0.05
            b1 = jax.random.normal(kb1, (hidden,), jnp.float32) * 0.01
            w2 = jax.random.normal(k2, (hidden, proj), jnp.float32) * 0.05
            b2 = jax.random.normal(kb2, (proj,), jnp.float32) * 0.01
            # (9, cin, cout) slabs: slab[3*dy+dx][ci, co] == wconv[co, ci, dy, dx]
            slabs = jnp.transpose(wconv, (2, 3, 1, 0)).reshape(9, cin, cout)
            return slabs, cb, w1, b1, w2, b2

        k1, k2 = jax.random.split(key)
        s1, s2 = stream_params(k1), stream_params(k2)

        # Packed, VMEM-resident parameter slabs (bf16 MXU operands, f32 biases).
        self.cw = jnp.stack([s1[0], s2[0]]).astype(jnp.bfloat16)     # (2, 9, cin, cout)
        self.nw1 = jnp.stack([s1[2], s2[2]]).astype(jnp.bfloat16)    # (2, cout, hidden)
        self.nw2 = jnp.stack([s1[4], s2[4]]).astype(jnp.bfloat16)    # (2, hidden, proj)
        bl = max(128, -(-max(cout, hidden, proj) // 128) * 128)
        rows = [s1[1], s1[3], s1[5], s2[1], s2[3], s2[5]]            # 6 bias vectors
        self.biases = jnp.stack(
            [jnp.pad(r, (0, bl - r.shape[0])) for r in rows]).astype(jnp.float32)  # (6, bl)

    # ----------------------- Pallas forward paths -----------------------

    def forward_knn(self, x):
        # TODO(synk): the PyTorch backbone returns spatial feature maps; pooling is
        # fused into the kernel, so the pooled (B, Cout) feature vector is returned.
        B, _, H, W = x.shape
        xp = _pad_nhwc_bf16(x)
        bt = _tile_rows(B, out_tile_constrained=True)
        grid = B // bt
        kernel = functools.partial(_backbone_kernel, h=H, w=W, cout=self.cout)
        return pl.pallas_call(
            kernel,
            out_shape=jax.ShapeDtypeStruct((B, self.cout), jnp.float32),
            grid_spec=pltpu.PrefetchScalarGridSpec(
                num_scalar_prefetch=0,
                grid=(grid,),
                in_specs=[pl.BlockSpec((bt, H + 2, W + 2, self.cin),
                                       lambda g: (g, 0, 0, 0)),
                          _resident_spec(self.cw.shape),
                          _resident_spec(self.biases.shape)],
                out_specs=pl.BlockSpec((bt, self.cout), lambda g: (g, 0)),
            ),
            compiler_params=pltpu.CompilerParams(
                dimension_semantics=("parallel",),
                vmem_limit_bytes=32 * 1024 * 1024,
            ),
        )(xp, self.cw, self.biases)

    def __call__(self, x1, x2=None, forward_knn=False):
        if forward_knn:
            return self.forward_knn(x1)
        if not isinstance(x1, list):
            x1, x2 = [x1], [x2]
        if self.swap_transform:
            # Mirrors the PyTorch reference exactly: both lists become the old x1
            # views followed by the old x2 views (so every pair is (view_i, view_i)).
            x1 = x1 + x2
            x2 = x1

        V = len(x1)
        B, _, H, W = x1[0].shape
        N = V * B                                                   # views flattened into batch
        xp1 = jnp.concatenate([_pad_nhwc_bf16(xi) for xi in x1], axis=0)  # (N, H+2, W+2, Cin)
        xp2 = jnp.concatenate([_pad_nhwc_bf16(xi) for xi in x2], axis=0)

        bt = _tile_rows(N)                                          # demo sizes -> one grid step
        grid = N // bt

        kernel = functools.partial(_two_ss_kernel, h=H, w=W, cout=self.cout,
                                   hidden=self.hidden, proj=self.proj)
        x_spec = pl.BlockSpec((bt, H + 2, W + 2, self.cin), lambda g: (g, 0, 0, 0))

        partials = pl.pallas_call(
            kernel,
            out_shape=jax.ShapeDtypeStruct((grid, 8, 128), jnp.float32),
            grid_spec=pltpu.PrefetchScalarGridSpec(
                num_scalar_prefetch=0,
                grid=(grid,),
                in_specs=[x_spec, x_spec,
                          _resident_spec(self.cw.shape),
                          _resident_spec(self.nw1.shape),
                          _resident_spec(self.nw2.shape),
                          _resident_spec(self.biases.shape)],
                out_specs=pl.BlockSpec((None, 8, 128), lambda g: (g, 0, 0)),
            ),
            compiler_params=pltpu.CompilerParams(
                # Independent per-step partials -> fully parallel grid (v7x megacore).
                dimension_semantics=("parallel",),
                vmem_limit_bytes=32 * 1024 * 1024,
            ),
        )(xp1, xp2, self.cw, self.nw1, self.nw2, self.biases)

        return -(jnp.sum(partials[:, 0, 0]) / N)                    # -mean cosine similarity

    # ------------------ pure-JAX reference (validation only) ------------------

    def _ref_backbone(self, x, s):
        B, _, H, W = x.shape
        xp = jnp.pad(jnp.transpose(x, (0, 2, 3, 1)),
                     ((0, 0), (1, 1), (1, 1), (0, 0)))
        xp = xp.astype(jnp.bfloat16).astype(jnp.float32)
        cw = self.cw[s].astype(jnp.float32)                         # (9, cin, cout)
        acc = jnp.zeros((B, H, W, self.cout), jnp.float32)
        for dy in range(3):
            for dx in range(3):
                acc = acc + jnp.einsum('bhwc,co->bhwo',
                                       xp[:, dy:dy + H, dx:dx + W, :], cw[3 * dy + dx])
        acc = jnp.maximum(acc + self.biases[3 * s, :self.cout], 0.0)
        return jnp.mean(acc, axis=(1, 2))                           # (B, cout)

    def _ref_neck(self, f, s):
        f = f.astype(jnp.bfloat16).astype(jnp.float32)
        h = f @ self.nw1[s].astype(jnp.float32) + self.biases[3 * s + 1, :self.hidden]
        h = jnp.maximum(h, 0.0).astype(jnp.bfloat16).astype(jnp.float32)
        return h @ self.nw2[s].astype(jnp.float32) + self.biases[3 * s + 2, :self.proj]

    def reference_loss(self, x1, x2=None):
        if not isinstance(x1, list):
            x1, x2 = [x1], [x2]
        if self.swap_transform:
            x1 = x1 + x2
            x2 = x1
        eps = 1e-12

        def norm(p):
            return p * jax.lax.rsqrt(jnp.sum(p * p, axis=-1, keepdims=True) + eps)

        cos = []
        for a, b in zip(x1, x2):
            p1 = self._ref_neck(self._ref_backbone(a, 0), 0)
            p2 = self._ref_neck(self._ref_backbone(b, 1), 1)
            cos.append(jnp.sum(norm(p1) * norm(p2), axis=-1))
        return -jnp.mean(jnp.concatenate(cos))


# ----------------------------- main -----------------------------

if __name__ == "__main__":
    key = jax.random.PRNGKey(0)
    k_model, k_a, k_b, k_c, k_d = jax.random.split(key, 5)

    B, Cin, H, W = 2, 4, 16, 16
    x1 = jax.random.normal(k_a, (B, Cin, H, W), jnp.float32)
    x2 = jax.random.normal(k_b, (B, Cin, H, W), jnp.float32)

    model = TwoSSModelPallas(k_model, cin=Cin, cout=32, hidden=64, proj=32,
                             swap_transform=False)

    # single view pair: whole forward in one grid step
    loss = jax.block_until_ready(model(x1, x2))
    assert loss.shape == () and bool(jnp.isfinite(loss))
    assert jnp.allclose(loss, model.reference_loss(x1, x2), atol=1e-2, rtol=1e-2)

    # multi-view list input: views flattened into the batch/M dimension
    x3 = jax.random.normal(k_c, (B, Cin, H, W), jnp.float32)
    x4 = jax.random.normal(k_d, (B, Cin, H, W), jnp.float32)
    loss_mv = jax.block_until_ready(model([x1, x3], [x2, x4]))
    assert loss_mv.shape == () and bool(jnp.isfinite(loss_mv))
    assert jnp.allclose(loss_mv, model.reference_loss([x1, x3], [x2, x4]),
                        atol=1e-2, rtol=1e-2)

    # backbone-only (forward_knn) path
    feats = jax.block_until_ready(model(x1, forward_knn=True))
    assert feats.shape == (B, 32) and bool(jnp.all(jnp.isfinite(feats)))
    assert jnp.allclose(feats, model._ref_backbone(x1, 0), atol=1e-2, rtol=1e-2)

    print("KERNEL_OK")
</pallas_src>

<mosaic_0001>
module attributes {stable_mosaic.version = 11 : i64} {
  func.func @_two_ss_kernel(%arg0: i32, %arg1: memref<2x18x18x4xbf16, #tpu.memory_space<vmem>>, %arg2: memref<2x18x18x4xbf16, #tpu.memory_space<vmem>>, %arg3: memref<2x9x4x32xbf16, #tpu.memory_space<vmem>>, %arg4: memref<2x32x64xbf16, #tpu.memory_space<vmem>>, %arg5: memref<2x64x32xbf16, #tpu.memory_space<vmem>>, %arg6: memref<6x128xf32, #tpu.memory_space<vmem>>, %arg7: memref<1x8x128xf32, #tpu.memory_space<vmem>>) attributes {dimension_semantics = [#tpu.dimension_semantics<parallel>], iteration_bounds = array<i64: 1>, scalar_prefetch = 0 : i64, scratch_operands = 0 : i64, tpu.core_type = #tpu.core_type<tc>, window_params = [{transform_indices = @transform_0, window_bounds = array<i64: 2, 18, 18, 4>}, {transform_indices = @transform_1, window_bounds = array<i64: 2, 18, 18, 4>}, {pipeline_mode = #tpu.pipeline_mode<synchronous>, transform_indices = @transform_2, window_bounds = array<i64: 2, 9, 4, 32>}, {pipeline_mode = #tpu.pipeline_mode<synchronous>, transform_indices = @transform_3, window_bounds = array<i64: 2, 32, 64>}, {pipeline_mode = #tpu.pipeline_mode<synchronous>, transform_indices = @transform_4, window_bounds = array<i64: 2, 64, 32>}, {pipeline_mode = #tpu.pipeline_mode<synchronous>, transform_indices = @transform_5, window_bounds = array<i64: 6, 128>}, {transform_indices = @transform_6, window_bounds = array<i64: 1, 8, 128>}]} {
    %c0 = arith.constant 0 : index
    %c0_0 = arith.constant 0 : index
    %c0_1 = arith.constant 0 : index
    %c0_2 = arith.constant 0 : index
    %0 = vector.load %arg1[%c0, %c0_0, %c0_1, %c0_2] : memref<2x18x18x4xbf16, #tpu.memory_space<vmem>>, vector<2x18x18x4xbf16>
    %1 = arith.extf %0 : vector<2x18x18x4xbf16> to vector<2x18x18x4xf32>
    %c0_3 = arith.constant 0 : index
    %c0_4 = arith.constant 0 : index
    %2 = vector.load %arg6[%c0_3, %c0_4] : memref<6x128xf32, #tpu.memory_space<vmem>>, vector<1x32xf32>
    %c1 = arith.constant 1 : index
    %c0_5 = arith.constant 0 : index
    %3 = vector.load %arg6[%c1, %c0_5] : memref<6x128xf32, #tpu.memory_space<vmem>>, vector<1x64xf32>
    %c2 = arith.constant 2 : index
    %c0_6 = arith.constant 0 : index
    %4 = vector.load %arg6[%c2, %c0_6] : memref<6x128xf32, #tpu.memory_space<vmem>>, vector<1x32xf32>
    %cst = arith.constant 0.000000e+00 : f32
    %5 = vector.broadcast %cst : f32 to vector<512x32xf32>
    %6 = vector.extract_strided_slice %1 {offsets = [0, 0, 0, 0], sizes = [2, 16, 16, 4], strides = [1, 1, 1, 1]} : vector<2x18x18x4xf32> to vector<2x16x16x4xf32>
    %7 = vector.shape_cast %6 : vector<2x16x16x4xf32> to vector<512x4xf32>
    %8 = arith.truncf %7 : vector<512x4xf32> to vector<512x4xbf16>
    %c0_7 = arith.constant 0 : index
    %c0_8 = arith.constant 0 : index
    %c0_9 = arith.constant 0 : index
    %c0_10 = arith.constant 0 : index
    %9 = vector.load %arg3[%c0_7, %c0_8, %c0_9, %c0_10] : memref<2x9x4x32xbf16, #tpu.memory_space<vmem>>, vector<1x1x4x32xbf16>
    %10 = vector.shape_cast %9 : vector<1x1x4x32xbf16> to vector<4x32xbf16>
    %cst_11 = arith.constant dense<0.000000e+00> : vector<512x32xf32>
    %11 = tpu.matmul %8, %10, %cst_11 {dimension_numbers = #tpu.dot_dimension_numbers<[1], [0], [0], [1], [0, 0, 1, 1], [], []>} : vector<512x4xbf16>, vector<4x32xbf16>, vector<512x32xf32> -> vector<512x32xf32>
    %12 = arith.addf %5, %11 : vector<512x32xf32>
    %13 = vector.extract_strided_slice %1 {offsets = [0, 0, 1, 0], sizes = [2, 16, 16, 4], strides = [1, 1, 1, 1]} : vector<2x18x18x4xf32> to vector<2x16x16x4xf32>
    %14 = vector.shape_cast %13 : vector<2x16x16x4xf32> to vector<512x4xf32>
    %15 = arith.truncf %14 : vector<512x4xf32> to vector<512x4xbf16>
    %c0_12 = arith.constant 0 : index
    %c1_13 = arith.constant 1 : index
    %c0_14 = arith.constant 0 : index
    %c0_15 = arith.constant 0 : index
    %16 = vector.load %arg3[%c0_12, %c1_13, %c0_14, %c0_15] : memref<2x9x4x32xbf16, #tpu.memory_space<vmem>>, vector<1x1x4x32xbf16>
    %17 = vector.shape_cast %16 : vector<1x1x4x32xbf16> to vector<4x32xbf16>
    %cst_16 = arith.constant dense<0.000000e+00> : vector<512x32xf32>
    %18 = tpu.matmul %15, %17, %cst_16 {dimension_numbers = #tpu.dot_dimension_numbers<[1], [0], [0], [1], [0, 0, 1, 1], [], []>} : vector<512x4xbf16>, vector<4x32xbf16>, vector<512x32xf32> -> vector<512x32xf32>
    %19 = arith.addf %12, %18 : vector<512x32xf32>
    %20 = vector.extract_strided_slice %1 {offsets = [0, 0, 2, 0], sizes = [2, 16, 16, 4], strides = [1, 1, 1, 1]} : vector<2x18x18x4xf32> to vector<2x16x16x4xf32>
    %21 = vector.shape_cast %20 : vector<2x16x16x4xf32> to vector<512x4xf32>
    %22 = arith.truncf %21 : vector<512x4xf32> to vector<512x4xbf16>
    %c0_17 = arith.constant 0 : index
    %c2_18 = arith.constant 2 : index
    %c0_19 = arith.constant 0 : index
    %c0_20 = arith.constant 0 : index
    %23 = vector.load %arg3[%c0_17, %c2_18, %c0_19, %c0_20] : memref<2x9x4x32xbf16, #tpu.memory_space<vmem>>, vector<1x1x4x32xbf16>
    %24 = vector.shape_cast %23 : vector<1x1x4x32xbf16> to vector<4x32xbf16>
    %cst_21 = arith.constant dense<0.000000e+00> : vector<512x32xf32>
    %25 = tpu.matmul %22, %24, %cst_21 {dimension_numbers = #tpu.dot_dimension_numbers<[1], [0], [0], [1], [0, 0, 1, 1], [], []>} : vector<512x4xbf16>, vector<4x32xbf16>, vector<512x32xf32> -> vector<512x32xf32>
    %26 = arith.addf %19, %25 : vector<512x32xf32>
    %27 = vector.extract_strided_slice %1 {offsets = [0, 1, 0, 0], sizes = [2, 16, 16, 4], strides = [1, 1, 1, 1]} : vector<2x18x18x4xf32> to vector<2x16x16x4xf32>
    %28 = vector.shape_cast %27 : vector<2x16x16x4xf32> to vector<512x4xf32>
    %29 = arith.truncf %28 : vector<512x4xf32> to vector<512x4xbf16>
    %c0_22 = arith.constant 0 : index
    %c3 = arith.constant 3 : index
    %c0_23 = arith.constant 0 : index
    %c0_24 = arith.constant 0 : index
    %30 = vector.load %arg3[%c0_22, %c3, %c0_23, %c0_24] : memref<2x9x4x32xbf16, #tpu.memory_space<vmem>>, vector<1x1x4x32xbf16>
    %31 = vector.shape_cast %30 : vector<1x1x4x32xbf16> to vector<4x32xbf16>
    %cst_25 = arith.constant dense<0.000000e+00> : vector<512x32xf32>
    %32 = tpu.matmul %29, %31, %cst_25 {dimension_numbers = #tpu.dot_dimension_numbers<[1], [0], [0], [1], [0, 0, 1, 1], [], []>} : vector<512x4xbf16>, vector<4x32xbf16>, vector<512x32xf32> -> vector<512x32xf32>
    %33 = arith.addf %26, %32 : vector<512x32xf32>
    %34 = vector.extract_strided_slice %1 {offsets = [0, 1, 1, 0], sizes = [2, 16, 16, 4], strides = [1, 1, 1, 1]} : vector<2x18x18x4xf32> to vector<2x16x16x4xf32>
    %35 = vector.shape_cast %34 : vector<2x16x16x4xf32> to vector<512x4xf32>
    %36 = arith.truncf %35 : vector<512x4xf32> to vector<512x4xbf16>
    %c0_26 = arith.constant 0 : index
    %c4 = arith.constant 4 : index
    %c0_27 = arith.constant 0 : index
    %c0_28 = arith.constant 0 : index
    %37 = vector.load %arg3[%c0_26, %c4, %c0_27, %c0_28] : memref<2x9x4x32xbf16, #tpu.memory_space<vmem>>, vector<1x1x4x32xbf16>
    %38 = vector.shape_cast %37 : vector<1x1x4x32xbf16> to vector<4x32xbf16>
    %cst_29 = arith.constant dense<0.000000e+00> : vector<512x32xf32>
    %39 = tpu.matmul %36, %38, %cst_29 {dimension_numbers = #tpu.dot_dimension_numbers<[1], [0], [0], [1], [0, 0, 1, 1], [], []>} : vector<512x4xbf16>, vector<4x32xbf16>, vector<512x32xf32> -> vector<512x32xf32>
    %40 = arith.addf %33, %39 : vector<512x32xf32>
    %41 = vector.extract_strided_slice %1 {offsets = [0, 1, 2, 0], sizes = [2, 16, 16, 4], strides = [1, 1, 1, 1]} : vector<2x18x18x4xf32> to vector<2x16x16x4xf32>
    %42 = vector.shape_cast %41 : vector<2x16x16x4xf32> to vector<512x4xf32>
    %43 = arith.truncf %42 : vector<512x4xf32> to vector<512x4xbf16>
    %c0_30 = arith.constant 0 : index
    %c5 = arith.constant 5 : index
    %c0_31 = arith.constant 0 : index
    %c0_32 = arith.constant 0 : index
    %44 = vector.load %arg3[%c0_30, %c5, %c0_31, %c0_32] : memref<2x9x4x32xbf16, #tpu.memory_space<vmem>>, vector<1x1x4x32xbf16>
    %45 = vector.shape_cast %44 : vector<1x1x4x32xbf16> to vector<4x32xbf16>
    %cst_33 = arith.constant dense<0.000000e+00> : vector<512x32xf32>
    %46 = tpu.matmul %43, %45, %cst_33 {dimension_numbers = #tpu.dot_dimension_numbers<[1], [0], [0], [1], [0, 0, 1, 1], [], []>} : vector<512x4xbf16>, vector<4x32xbf16>, vector<512x32xf32> -> vector<512x32xf32>
    %47 = arith.addf %40, %46 : vector<512x32xf32>
    %48 = vector.extract_strided_slice %1 {offsets = [0, 2, 0, 0], sizes = [2, 16, 16, 4], strides = [1, 1, 1, 1]} : vector<2x18x18x4xf32> to vector<2x16x16x4xf32>
    %49 = vector.shape_cast %48 : vector<2x16x16x4xf32> to vector<512x4xf32>
    %50 = arith.truncf %49 : vector<512x4xf32> to vector<512x4xbf16>
    %c0_34 = arith.constant 0 : index
    %c6 = arith.constant 6 : index
    %c0_35 = arith.constant 0 : index
    %c0_36 = arith.constant 0 : index
    %51 = vector.load %arg3[%c0_34, %c6, %c0_35, %c0_36] : memref<2x9x4x32xbf16, #tpu.memory_space<vmem>>, vector<1x1x4x32xbf16>
    %52 = vector.shape_cast %51 : vector<1x1x4x32xbf16> to vector<4x32xbf16>
    %cst_37 = arith.constant dense<0.000000e+00> : vector<512x32xf32>
    %53 = tpu.matmul %50, %52, %cst_37 {dimension_numbers = #tpu.dot_dimension_numbers<[1], [0], [0], [1], [0, 0, 1, 1], [], []>} : vector<512x4xbf16>, vector<4x32xbf16>, vector<512x32xf32> -> vector<512x32xf32>
    %54 = arith.addf %47, %53 : vector<512x32xf32>
    %55 = vector.extract_strided_slice %1 {offsets = [0, 2, 1, 0], sizes = [2, 16, 16, 4], strides = [1, 1, 1, 1]} : vector<2x18x18x4xf32> to vector<2x16x16x4xf32>
    %56 = vector.shape_cast %55 : vector<2x16x16x4xf32> to vector<512x4xf32>
    %57 = arith.truncf %56 : vector<512x4xf32> to vector<512x4xbf16>
    %c0_38 = arith.constant 0 : index
    %c7 = arith.constant 7 : index
    %c0_39 = arith.constant 0 : index
    %c0_40 = arith.constant 0 : index
    %58 = vector.load %arg3[%c0_38, %c7, %c0_39, %c0_40] : memref<2x9x4x32xbf16, #tpu.memory_space<vmem>>, vector<1x1x4x32xbf16>
    %59 = vector.shape_cast %58 : vector<1x1x4x32xbf16> to vector<4x32xbf16>
    %cst_41 = arith.constant dense<0.000000e+00> : vector<512x32xf32>
    %60 = tpu.matmul %57, %59, %cst_41 {dimension_numbers = #tpu.dot_dimension_numbers<[1], [0], [0], [1], [0, 0, 1, 1], [], []>} : vector<512x4xbf16>, vector<4x32xbf16>, vector<512x32xf32> -> vector<512x32xf32>
    %61 = arith.addf %54, %60 : vector<512x32xf32>
    %62 = vector.extract_strided_slice %1 {offsets = [0, 2, 2, 0], sizes = [2, 16, 16, 4], strides = [1, 1, 1, 1]} : vector<2x18x18x4xf32> to vector<2x16x16x4xf32>
    %63 = vector.shape_cast %62 : vector<2x16x16x4xf32> to vector<512x4xf32>
    %64 = arith.truncf %63 : vector<512x4xf32> to vector<512x4xbf16>
    %c0_42 = arith.constant 0 : index
    %c8 = arith.constant 8 : index
    %c0_43 = arith.constant 0 : index
    %c0_44 = arith.constant 0 : index
    %65 = vector.load %arg3[%c0_42, %c8, %c0_43, %c0_44] : memref<2x9x4x32xbf16, #tpu.memory_space<vmem>>, vector<1x1x4x32xbf16>
    %66 = vector.shape_cast %65 : vector<1x1x4x32xbf16> to vector<4x32xbf16>
    %cst_45 = arith.constant dense<0.000000e+00> : vector<512x32xf32>
    %67 = tpu.matmul %64, %66, %cst_45 {dimension_numbers = #tpu.dot_dimension_numbers<[1], [0], [0], [1], [0, 0, 1, 1], [], []>} : vector<512x4xbf16>, vector<4x32xbf16>, vector<512x32xf32> -> vector<512x32xf32>
    %68 = arith.addf %61, %67 : vector<512x32xf32>
    %69 = vector.broadcast %2 : vector<1x32xf32> to vector<512x32xf32>
    %70 = arith.addf %68, %69 : vector<512x32xf32>
    %cst_46 = arith.constant 0.000000e+00 : f32
    %71 = vector.broadcast %cst_46 : f32 to vector<512x32xf32>
    %72 = arith.maximumf %70, %71 : vector<512x32xf32>
    %73 = vector.shape_cast %72 : vector<512x32xf32> to vector<2x256x32xf32>
    %cst_47 = arith.constant dense<0.000000e+00> : vector<2x32xf32>
    %74 = vector.multi_reduction <add>, %73, %cst_47 [1] : vector<2x256x32xf32> to vector<2x32xf32>
    %cst_48 = arith.constant 3.906250e-03 : f32
    %75 = vector.broadcast %cst_48 : f32 to vector<2x32xf32>
    %76 = arith.mulf %74, %75 : vector<2x32xf32>
    %77 = arith.truncf %76 : vector<2x32xf32> to vector<2x32xbf16>
    %c0_49 = arith.constant 0 : index
    %c0_50 = arith.constant 0 : index
    %c0_51 = arith.constant 0 : index
    %78 = vector.load %arg4[%c0_49, %c0_50, %c0_51] : memref<2x32x64xbf16, #tpu.memory_space<vmem>>, vector<1x32x64xbf16>
    %79 = vector.shape_cast %78 : vector<1x32x64xbf16> to vector<32x64xbf16>
    %cst_52 = arith.constant dense<0.000000e+00> : vector<2x64xf32>
    %80 = tpu.matmul %77, %79, %cst_52 {dimension_numbers = #tpu.dot_dimension_numbers<[1], [0], [0], [1], [0, 0, 1, 1], [], []>} : vector<2x32xbf16>, vector<32x64xbf16>, vector<2x64xf32> -> vector<2x64xf32>
    %81 = vector.broadcast %3 : vector<1x64xf32> to vector<2x64xf32>
    %82 = arith.addf %80, %81 : vector<2x64xf32>
    %cst_53 = arith.constant 0.000000e+00 : f32
    %83 = vector.broadcast %cst_53 : f32 to vector<2x64xf32>
    %84 = arith.maximumf %82, %83 : vector<2x64xf32>
    %85 = arith.truncf %84 : vector<2x64xf32> to vector<2x64xbf16>
    %c0_54 = arith.constant 0 : index
    %c0_55 = arith.constant 0 : index
    %c0_56 = arith.constant 0 : index
    %86 = vector.load %arg5[%c0_54, %c0_55, %c0_56] : memref<2x64x32xbf16, #tpu.memory_space<vmem>>, vector<1x64x32xbf16>
    %87 = vector.shape_cast %86 : vector<1x64x32xbf16> to vector<64x32xbf16>
    %cst_57 = arith.constant dense<0.000000e+00> : vector<2x32xf32>
    %88 = tpu.matmul %85, %87, %cst_57 {dimension_numbers = #tpu.dot_dimension_numbers<[1], [0], [0], [1], [0, 0, 1, 1], [], []>} : vector<2x64xbf16>, vector<64x32xbf16>, vector<2x32xf32> -> vector<2x32xf32>
    %89 = vector.broadcast %4 : vector<1x32xf32> to vector<2x32xf32>
    %90 = arith.addf %88, %89 : vector<2x32xf32>
    %c0_58 = arith.constant 0 : index
    %c0_59 = arith.constant 0 : index
    %c0_60 = arith.constant 0 : index
    %c0_61 = arith.constant 0 : index
    %91 = vector.load %arg2[%c0_58, %c0_59, %c0_60, %c0_61] : memref<2x18x18x4xbf16, #tpu.memory_space<vmem>>, vector<2x18x18x4xbf16>
    %92 = arith.extf %91 : vector<2x18x18x4xbf16> to vector<2x18x18x4xf32>
    %c3_62 = arith.constant 3 : index
    %c0_63 = arith.constant 0 : index
    %93 = vector.load %arg6[%c3_62, %c0_63] : memref<6x128xf32, #tpu.memory_space<vmem>>, vector<1x32xf32>
    %c4_64 = arith.constant 4 : index
    %c0_65 = arith.constant 0 : index
    %94 = vector.load %arg6[%c4_64, %c0_65] : memref<6x128xf32, #tpu.memory_space<vmem>>, vector<1x64xf32>
    %c5_66 = arith.constant 5 : index
    %c0_67 = arith.constant 0 : index
    %95 = vector.load %arg6[%c5_66, %c0_67] : memref<6x128xf32, #tpu.memory_space<vmem>>, vector<1x32xf32>
    %cst_68 = arith.constant 0.000000e+00 : f32
    %96 = vector.broadcast %cst_68 : f32 to vector<512x32xf32>
    %97 = vector.extract_strided_slice %92 {offsets = [0, 0, 0, 0], sizes = [2, 16, 16, 4], strides = [1, 1, 1, 1]} : vector<2x18x18x4xf32> to vector<2x16x16x4xf32>
    %98 = vector.shape_cast %97 : vector<2x16x16x4xf32> to vector<512x4xf32>
    %99 = arith.truncf %98 : vector<512x4xf32> to vector<512x4xbf16>
    %c1_69 = arith.constant 1 : index
    %c0_70 = arith.constant 0 : index
    %c0_71 = arith.constant 0 : index
    %c0_72 = arith.constant 0 : index
    %100 = vector.load %arg3[%c1_69, %c0_70, %c0_71, %c0_72] : memref<2x9x4x32xbf16, #tpu.memory_space<vmem>>, vector<1x1x4x32xbf16>
    %101 = vector.shape_cast %100 : vector<1x1x4x32xbf16> to vector<4x32xbf16>
    %cst_73 = arith.constant dense<0.000000e+00> : vector<512x32xf32>
    %102 = tpu.matmul %99, %101, %cst_73 {dimension_numbers = #tpu.dot_dimension_numbers<[1], [0], [0], [1], [0, 0, 1, 1], [], []>} : vector<512x4xbf16>, vector<4x32xbf16>, vector<512x32xf32> -> vector<512x32xf32>
    %103 = arith.addf %96, %102 : vector<512x32xf32>
    %104 = vector.extract_strided_slice %92 {offsets = [0, 0, 1, 0], sizes = [2, 16, 16, 4], strides = [1, 1, 1, 1]} : vector<2x18x18x4xf32> to vector<2x16x16x4xf32>
    %105 = vector.shape_cast %104 : vector<2x16x16x4xf32> to vector<512x4xf32>
    %106 = arith.truncf %105 : vector<512x4xf32> to vector<512x4xbf16>
    %c1_74 = arith.constant 1 : index
    %c1_75 = arith.constant 1 : index
    %c0_76 = arith.constant 0 : index
    %c0_77 = arith.constant 0 : index
    %107 = vector.load %arg3[%c1_74, %c1_75, %c0_76, %c0_77] : memref<2x9x4x32xbf16, #tpu.memory_space<vmem>>, vector<1x1x4x32xbf16>
    %108 = vector.shape_cast %107 : vector<1x1x4x32xbf16> to vector<4x32xbf16>
    %cst_78 = arith.constant dense<0.000000e+00> : vector<512x32xf32>
    %109 = tpu.matmul %106, %108, %cst_78 {dimension_numbers = #tpu.dot_dimension_numbers<[1], [0], [0], [1], [0, 0, 1, 1], [], []>} : vector<512x4xbf16>, vector<4x32xbf16>, vector<512x32xf32> -> vector<512x32xf32>
    %110 = arith.addf %103, %109 : vector<512x32xf32>
    %111 = vector.extract_strided_slice %92 {offsets = [0, 0, 2, 0], sizes = [2, 16, 16, 4], strides = [1, 1, 1, 1]} : vector<2x18x18x4xf32> to vector<2x16x16x4xf32>
    %112 = vector.shape_cast %111 : vector<2x16x16x4xf32> to vector<512x4xf32>
    %113 = arith.truncf %112 : vector<512x4xf32> to vector<512x4xbf16>
    %c1_79 = arith.constant 1 : index
    %c2_80 = arith.constant 2 : index
    %c0_81 = arith.constant 0 : index
    %c0_82 = arith.constant 0 : index
    %114 = vector.load %arg3[%c1_79, %c2_80, %c0_81, %c0_82] : memref<2x9x4x32xbf16, #tpu.memory_space<vmem>>, vector<1x1x4x32xbf16>
    %115 = vector.shape_cast %114 : vector<1x1x4x32xbf16> to vector<4x32xbf16>
    %cst_83 = arith.constant dense<0.000000e+00> : vector<512x32xf32>
    %116 = tpu.matmul %113, %115, %cst_83 {dimension_numbers = #tpu.dot_dimension_numbers<[1], [0], [0], [1], [0, 0, 1, 1], [], []>} : vector<512x4xbf16>, vector<4x32xbf16>, vector<512x32xf32> -> vector<512x32xf32>
    %117 = arith.addf %110, %116 : vector<512x32xf32>
    %118 = vector.extract_strided_slice %92 {offsets = [0, 1, 0, 0], sizes = [2, 16, 16, 4], strides = [1, 1, 1, 1]} : vector<2x18x18x4xf32> to vector<2x16x16x4xf32>
    %119 = vector.shape_cast %118 : vector<2x16x16x4xf32> to vector<512x4xf32>
    %120 = arith.truncf %119 : vector<512x4xf32> to vector<512x4xbf16>
    %c1_84 = arith.constant 1 : index
    %c3_85 = arith.constant 3 : index
    %c0_86 = arith.constant 0 : index
    %c0_87 = arith.constant 0 : index
    %121 = vector.load %arg3[%c1_84, %c3_85, %c0_86, %c0_87] : memref<2x9x4x32xbf16, #tpu.memory_space<vmem>>, vector<1x1x4x32xbf16>
    %122 = vector.shape_cast %121 : vector<1x1x4x32xbf16> to vector<4x32xbf16>
    %cst_88 = arith.constant dense<0.000000e+00> : vector<512x32xf32>
    %123 = tpu.matmul %120, %122, %cst_88 {dimension_numbers = #tpu.dot_dimension_numbers<[1], [0], [0], [1], [0, 0, 1, 1], [], []>} : vector<512x4xbf16>, vector<4x32xbf16>, vector<512x32xf32> -> vector<512x32xf32>
    %124 = arith.addf %117, %123 : vector<512x32xf32>
    %125 = vector.extract_strided_slice %92 {offsets = [0, 1, 1, 0], sizes = [2, 16, 16, 4], strides = [1, 1, 1, 1]} : vector<2x18x18x4xf32> to vector<2x16x16x4xf32>
    %126 = vector.shape_cast %125 : vector<2x16x16x4xf32> to vector<512x4xf32>
    %127 = arith.truncf %126 : vector<512x4xf32> to vector<512x4xbf16>
    %c1_89 = arith.constant 1 : index
    %c4_90 = arith.constant 4 : index
    %c0_91 = arith.constant 0 : index
    %c0_92 = arith.constant 0 : index
    %128 = vector.load %arg3[%c1_89, %c4_90, %c0_91, %c0_92] : memref<2x9x4x32xbf16, #tpu.memory_space<vmem>>, vector<1x1x4x32xbf16>
    %129 = vector.shape_cast %128 : vector<1x1x4x32xbf16> to vector<4x32xbf16>
    %cst_93 = arith.constant dense<0.000000e+00> : vector<512x32xf32>
    %130 = tpu.matmul %127, %129, %cst_93 {dimension_numbers = #tpu.dot_dimension_numbers<[1], [0], [0], [1], [0, 0, 1, 1], [], []>} : vector<512x4xbf16>, vector<4x32xbf16>, vector<512x32xf32> -> vector<512x32xf32>
    %131 = arith.addf %124, %130 : vector<512x32xf32>
    %132 = vector.extract_strided_slice %92 {offsets = [0, 1, 2, 0], sizes = [2, 16, 16, 4], strides = [1, 1, 1, 1]} : vector<2x18x18x4xf32> to vector<2x16x16x4xf32>
    %133 = vector.shape_cast %132 : vector<2x16x16x4xf32> to vector<512x4xf32>
    %134 = arith.truncf %133 : vector<512x4xf32> to vector<512x4xbf16>
    %c1_94 = arith.constant 1 : index
    %c5_95 = arith.constant 5 : index
    %c0_96 = arith.constant 0 : index
    %c0_97 = arith.constant 0 : index
    %135 = vector.load %arg3[%c1_94, %c5_95, %c0_96, %c0_97] : memref<2x9x4x32xbf16, #tpu.memory_space<vmem>>, vector<1x1x4x32xbf16>
    %136 = vector.shape_cast %135 : vector<1x1x4x32xbf16> to vector<4x32xbf16>
    %cst_98 = arith.constant dense<0.000000e+00> : vector<512x32xf32>
    %137 = tpu.matmul %134, %136, %cst_98 {dimension_numbers = #tpu.dot_dimension_numbers<[1], [0], [0], [1], [0, 0, 1, 1], [], []>} : vector<512x4xbf16>, vector<4x32xbf16>, vector<512x32xf32> -> vector<512x32xf32>
    %138 = arith.addf %131, %137 : vector<512x32xf32>
    %139 = vector.extract_strided_slice %92 {offsets = [0, 2, 0, 0], sizes = [2, 16, 16, 4], strides = [1, 1, 1, 1]} : vector<2x18x18x4xf32> to vector<2x16x16x4xf32>
    %140 = vector.shape_cast %139 : vector<2x16x16x4xf32> to vector<512x4xf32>
    %141 = arith.truncf %140 : vector<512x4xf32> to vector<512x4xbf16>
    %c1_99 = arith.constant 1 : index
    %c6_100 = arith.constant 6 : index
    %c0_101 = arith.constant 0 : index
    %c0_102 = arith.constant 0 : index
    %142 = vector.load %arg3[%c1_99, %c6_100, %c0_101, %c0_102] : memref<2x9x4x32xbf16, #tpu.memory_space<vmem>>, vector<1x1x4x32xbf16>
    %143 = vector.shape_cast %142 : vector<1x1x4x32xbf16> to vector<4x32xbf16>
    %cst_103 = arith.constant dense<0.000000e+00> : vector<512x32xf32>
    %144 = tpu.matmul %141, %143, %cst_103 {dimension_numbers = #tpu.dot_dimension_numbers<[1], [0], [0], [1], [0, 0, 1, 1], [], []>} : vector<512x4xbf16>, vector<4x32xbf16>, vector<512x32xf32> -> vector<512x32xf32>
    %145 = arith.addf %138, %144 : vector<512x32xf32>
    %146 = vector.extract_strided_slice %92 {offsets = [0, 2, 1, 0], sizes = [2, 16, 16, 4], strides = [1, 1, 1, 1]} : vector<2x18x18x4xf32> to vector<2x16x16x4xf32>
    %147 = vector.shape_cast %146 : vector<2x16x16x4xf32> to vector<512x4xf32>
    %148 = arith.truncf %147 : vector<512x4xf32> to vector<512x4xbf16>
    %c1_104 = arith.constant 1 : index
    %c7_105 = arith.constant 7 : index
    %c0_106 = arith.constant 0 : index
    %c0_107 = arith.constant 0 : index
    %149 = vector.load %arg3[%c1_104, %c7_105, %c0_106, %c0_107] : memref<2x9x4x32xbf16, #tpu.memory_space<vmem>>, vector<1x1x4x32xbf16>
    %150 = vector.shape_cast %149 : vector<1x1x4x32xbf16> to vector<4x32xbf16>
    %cst_108 = arith.constant dense<0.000000e+00> : vector<512x32xf32>
    %151 = tpu.matmul %148, %150, %cst_108 {dimension_numbers = #tpu.dot_dimension_numbers<[1], [0], [0], [1], [0, 0, 1, 1], [], []>} : vector<512x4xbf16>, vector<4x32xbf16>, vector<512x32xf32> -> vector<512x32xf32>
    %152 = arith.addf %145, %151 : vector<512x32xf32>
    %153 = vector.extract_strided_slice %92 {offsets = [0, 2, 2, 0], sizes = [2, 16, 16, 4], strides = [1, 1, 1, 1]} : vector<2x18x18x4xf32> to vector<2x16x16x4xf32>
    %154 = vector.shape_cast %153 : vector<2x16x16x4xf32> to vector<512x4xf32>
    %155 = arith.truncf %154 : vector<512x4xf32> to vector<512x4xbf16>
    %c1_109 = arith.constant 1 : index
    %c8_110 = arith.constant 8 : index
    %c0_111 = arith.constant 0 : index
    %c0_112 = arith.constant 0 : index
    %156 = vector.load %arg3[%c1_109, %c8_110, %c0_111, %c0_112] : memref<2x9x4x32xbf16, #tpu.memory_space<vmem>>, vector<1x1x4x32xbf16>
    %157 = vector.shape_cast %156 : vector<1x1x4x32xbf16> to vector<4x32xbf16>
    %cst_113 = arith.constant dense<0.000000e+00> : vector<512x32xf32>
    %158 = tpu.matmul %155, %157, %cst_113 {dimension_numbers = #tpu.dot_dimension_numbers<[1], [0], [0], [1], [0, 0, 1, 1], [], []>} : vector<512x4xbf16>, vector<4x32xbf16>, vector<512x32xf32> -> vector<512x32xf32>
    %159 = arith.addf %152, %158 : vector<512x32xf32>
    %160 = vector.broadcast %93 : vector<1x32xf32> to vector<512x32xf32>
    %161 = arith.addf %159, %160 : vector<512x32xf32>
    %cst_114 = arith.constant 0.000000e+00 : f32
    %162 = vector.broadcast %cst_114 : f32 to vector<512x32xf32>
    %163 = arith.maximumf %161, %162 : vector<512x32xf32>
    %164 = vector.shape_cast %163 : vector<512x32xf32> to vector<2x256x32xf32>
    %cst_115 = arith.constant dense<0.000000e+00> : vector<2x32xf32>
    %165 = vector.multi_reduction <add>, %164, %cst_115 [1] : vector<2x256x32xf32> to vector<2x32xf32>
    %cst_116 = arith.constant 3.906250e-03 : f32
    %166 = vector.broadcast %cst_116 : f32 to vector<2x32xf32>
    %167 = arith.mulf %165, %166 : vector<2x32xf32>
    %168 = arith.truncf %167 : vector<2x32xf32> to vector<2x32xbf16>
    %c1_117 = arith.constant 1 : index
    %c0_118 = arith.constant 0 : index
    %c0_119 = arith.constant 0 : index
    %169 = vector.load %arg4[%c1_117, %c0_118, %c0_119] : memref<2x32x64xbf16, #tpu.memory_space<vmem>>, vector<1x32x64xbf16>
    %170 = vector.shape_cast %169 : vector<1x32x64xbf16> to vector<32x64xbf16>
    %cst_120 = arith.constant dense<0.000000e+00> : vector<2x64xf32>
    %171 = tpu.matmul %168, %170, %cst_120 {dimension_numbers = #tpu.dot_dimension_numbers<[1], [0], [0], [1], [0, 0, 1, 1], [], []>} : vector<2x32xbf16>, vector<32x64xbf16>, vector<2x64xf32> -> vector<2x64xf32>
    %172 = vector.broadcast %94 : vector<1x64xf32> to vector<2x64xf32>
    %173 = arith.addf %171, %172 : vector<2x64xf32>
    %cst_121 = arith.constant 0.000000e+00 : f32
    %174 = vector.broadcast %cst_121 : f32 to vector<2x64xf32>
    %175 = arith.maximumf %173, %174 : vector<2x64xf32>
    %176 = arith.truncf %175 : vector<2x64xf32> to vector<2x64xbf16>
    %c1_122 = arith.constant 1 : index
    %c0_123 = arith.constant 0 : index
    %c0_124 = arith.constant 0 : index
    %177 = vector.load %arg5[%c1_122, %c0_123, %c0_124] : memref<2x64x32xbf16, #tpu.memory_space<vmem>>, vector<1x64x32xbf16>
    %178 = vector.shape_cast %177 : vector<1x64x32xbf16> to vector<64x32xbf16>
    %cst_125 = arith.constant dense<0.000000e+00> : vector<2x32xf32>
    %179 = tpu.matmul %176, %178, %cst_125 {dimension_numbers = #tpu.dot_dimension_numbers<[1], [0], [0], [1], [0, 0, 1, 1], [], []>} : vector<2x64xbf16>, vector<64x32xbf16>, vector<2x32xf32> -> vector<2x32xf32>
    %180 = vector.broadcast %95 : vector<1x32xf32> to vector<2x32xf32>
    %181 = arith.addf %179, %180 : vector<2x32xf32>
    %182 = arith.mulf %90, %90 : vector<2x32xf32>
    %cst_126 = arith.constant dense<0.000000e+00> : vector<2xf32>
    %183 = vector.multi_reduction <add>, %182, %cst_126 [1] : vector<2x32xf32> to vector<2xf32>
    %184 = vector.shape_cast %183 : vector<2xf32> to vector<2x1xf32>
    %cst_127 = arith.constant 9.99999996E-13 : f32
    %185 = vector.broadcast %cst_127 : f32 to vector<2x1xf32>
    %186 = arith.addf %184, %185 : vector<2x1xf32>
    %187 = math.rsqrt %186 : vector<2x1xf32>
    %188 = vector.broadcast %187 : vector<2x1xf32> to vector<2x32xf32>
    %189 = arith.mulf %90, %188 : vector<2x32xf32>
    %190 = arith.mulf %181, %181 : vector<2x32xf32>
    %cst_128 = arith.constant dense<0.000000e+00> : vector<2xf32>
    %191 = vector.multi_reduction <add>, %190, %cst_128 [1] : vector<2x32xf32> to vector<2xf32>
    %192 = vector.shape_cast %191 : vector<2xf32> to vector<2x1xf32>
    %cst_129 = arith.constant 9.99999996E-13 : f32
    %193 = vector.broadcast %cst_129 : f32 to vector<2x1xf32>
    %194 = arith.addf %192, %193 : vector<2x1xf32>
    %195 = math.rsqrt %194 : vector<2x1xf32>
    %196 = vector.broadcast %195 : vector<2x1xf32> to vector<2x32xf32>
    %197 = arith.mulf %181, %196 : vector<2x32xf32>
    %198 = arith.mulf %189, %197 : vector<2x32xf32>
    %cst_130 = arith.constant dense<0.000000e+00> : vector<2xf32>
    %199 = vector.multi_reduction <add>, %198, %cst_130 [1] : vector<2x32xf32> to vector<2xf32>
    %200 = vector.shape_cast %199 : vector<2xf32> to vector<2x1xf32>
    %cst_131 = arith.constant dense<0.000000e+00> : vector<1xf32>
    %201 = vector.multi_reduction <add>, %200, %cst_131 [0] : vector<2x1xf32> to vector<1xf32>
    %202 = vector.shape_cast %201 : vector<1xf32> to vector<1x1xf32>
    %203 = vector.shape_cast %202 : vector<1x1xf32> to vector<1x1xf32>
    %204 = vector.broadcast %203 : vector<1x1xf32> to vector<8x128xf32>
    %c0_132 = arith.constant 0 : index
    %c0_133 = arith.constant 0 : index
    %c0_134 = arith.constant 0 : index
    %205 = vector.load %arg7[%c0_132, %c0_133, %c0_134] : memref<1x8x128xf32, #tpu.memory_space<vmem>>, vector<1x8x128xf32>
    %206 = vector.shape_cast %205 : vector<1x8x128xf32> to vector<8x128xf32>
    %207 = vector.shape_cast %204 : vector<8x128xf32> to vector<1x8x128xf32>
    tpu.vector_store %arg7[%c0_132, %c0_133, %c0_134], %207 {strides = array<i32>} : memref<1x8x128xf32, #tpu.memory_space<vmem>>, vector<1x8x128xf32>,
    return
  }
  func.func @transform_0(%arg0: i32) -> (i32, i32, i32, i32) {
    %c0_i32 = arith.constant 0 : i32
    %c0_i32_0 = arith.constant 0 : i32
    %c0_i32_1 = arith.constant 0 : i32
    %c0_i32_2 = arith.constant 0 : i32
    return %arg0, %c0_i32, %c0_i32_0, %c0_i32_1 : i32, i32, i32, i32
  }
  func.func @transform_1(%arg0: i32) -> (i32, i32, i32, i32) {
    %c0_i32 = arith.constant 0 : i32
    %c0_i32_0 = arith.constant 0 : i32
    %c0_i32_1 = arith.constant 0 : i32
    %c0_i32_2 = arith.constant 0 : i32
    return %arg0, %c0_i32, %c0_i32_0, %c0_i32_1 : i32, i32, i32, i32
  }
  func.func @transform_2(%arg0: i32) -> (i32, i32, i32, i32) {
    %c0_i32 = arith.constant 0 : i32
    %c0_i32_0 = arith.constant 0 : i32
    %c0_i32_1 = arith.constant 0 : i32
    %c0_i32_2 = arith.constant 0 : i32
    %c0_i32_3 = arith.constant 0 : i32
    return %c0_i32, %c0_i32_0, %c0_i32_1, %c0_i32_2 : i32, i32, i32, i32
  }
  func.func @transform_3(%arg0: i32) -> (i32, i32, i32) {
    %c0_i32 = arith.constant 0 : i32
    %c0_i32_0 = arith.constant 0 : i32
    %c0_i32_1 = arith.constant 0 : i32
    %c0_i32_2 = arith.constant 0 : i32
    return %c0_i32, %c0_i32_0, %c0_i32_1 : i32, i32, i32
  }
  func.func @transform_4(%arg0: i32) -> (i32, i32, i32) {
    %c0_i32 = arith.constant 0 : i32
    %c0_i32_0 = arith.constant 0 : i32
    %c0_i32_1 = arith.constant 0 : i32
    %c0_i32_2 = arith.constant 0 : i32
    return %c0_i32, %c0_i32_0, %c0_i32_1 : i32, i32, i32
  }
  func.func @transform_5(%arg0: i32) -> (i32, i32) {
    %c0_i32 = arith.constant 0 : i32
    %c0_i32_0 = arith.constant 0 : i32
    %c0_i32_1 = arith.constant 0 : i32
    return %c0_i32, %c0_i32_0 : i32, i32
  }
  func.func @transform_6(%arg0: i32) -> (i32, i32, i32) {
    %c0_i32 = arith.constant 0 : i32
    %c0_i32_0 = arith.constant 0 : i32
    %c0_i32_1 = arith.constant 0 : i32
    return %arg0, %c0_i32, %c0_i32_0 : i32, i32, i32
  }
}

</mosaic_0001>

<bundles_post_ra>
// kernel: tpu_custom_call.1
= control target key start
LH: loop header
LB: loop body
LE: loop exit
PB: predicated region body
PF: predicated region fallthrough
CT: control target
= control target key end

     0   :  { %vm729_vm0 = vcmask 1041408   ;;  %vm373_vm1 = vcmask 1046528   ;;  %vm632_vm2 = vcmask 31744   ;;  %s17263_s0 = inlined_call_operand.vmem [shape: bf16[2,18,18,4], index: 0, kind: input, shape index: {}]   ;;  %s17264_s1 = inlined_call_operand.vmem [shape: bf16[2,18,18,4], index: 1, kind: input, shape index: {}]   ;;  %s17265_s2 = inlined_call_operand.vmem [shape: bf16[2,9,4,32], index: 2, kind: input, shape index: {}]   ;;  %s17266_s3 = inlined_call_operand.vmem [shape: bf16[2,32,64], index: 3, kind: input, shape index: {}]   ;;  %s17267_s4 = inlined_call_operand.vmem [shape: bf16[2,64,32], index: 4, kind: input, shape index: {}]   ;;  %s17268_s5 = inlined_call_operand.vmem [shape: f32[6,128], index: 5, kind: input, shape index: {}]   ;;  %s17269_s6 = inlined_call_operand.hbm [shape: f32[1,8,128], index: 6, kind: output, shape index: {}]  }
   0x1   :  { %v9668_v0 = vld [vmem:[%s17265_s2 + $0x2] sm:$0x3]  ;;  %v13451_v2 = vld [vmem:[%s17263_s0 + $0x8] sm:$0x1]  ;;  %v276_v7 = vld [vmem:[%s17265_s2] sm:$0x3] }
   0x2   :  { %v13446_v1 = vld [vmem:[%s17263_s0] sm:$0xff]   ;;  %13197 = vmatprep.subr.msk.bf16.mxu0 %vm729_vm0, %v9668_v0  ;;  %v731_v3 = vsel %vm729_vm0, %v9668_v0, 0  ;;  %v17312_v6 = vunpack.c.l.bf16 %v13451_v2  ;;  %v13464_v8 = vld [vmem:[%s17263_s0 + $0xc] sm:$0xff]   ;;  %v13469_v9 = vld [vmem:[%s17263_s0 + $0x14] sm:$0x1]  ;;  %v1119_v27 = vsel %vm729_vm0, %v276_v7, 0 }
   0x3   :  { %v17314_v4 = vunpack.c.l.bf16 %v13446_v1  ;;  %v17313_v5 = vunpack.c.h.bf16 %v13446_v1  ;;  %10946 = vmatpush3.bf16.msra.mxu0 %v731_v3  ;;  %v17311_v10 = vunpack.c.l.bf16 %v13464_v8  ;;  %v17310_v11 = vunpack.c.h.bf16 %v13464_v8  ;;  %v13484_v16 = vld [vmem:[%s17263_s0 + $0x18] sm:$0xff]   ;;  %v13495_v21 = vld [vmem:[%s17263_s0 + $0x20] sm:$0x1]  ;;  %v13500_v22 = vld [vmem:[%s17263_s0 + $0x24] sm:$0xff]  }
   0x4   :  { %v377_v14 = vrot.slane %v17312_v6, 1  ;;  %13198 = vmatprep.subr.msk.bf16.mxu0 %vm729_vm0, %v276_v7  ;;  %v17303_v15 = vunpack.c.l.bf16 %v13469_v9  ;;  %v13507_v25 = vld [vmem:[%s17263_s0 + $0x2c] sm:$0x1]  ;;  %v17302_v28 = vunpack.c.l.bf16 %v13484_v16  ;;  %v13515_v29 = vld [vmem:[%s17263_s0 + $0x30] sm:$0xff]   ;;  %v17301_v31 = vunpack.c.h.bf16 %v13484_v16  ;;  %v13525_v34 = vld [vmem:[%s17263_s0 + $0x38] sm:$0x1] }
   0x5   :  { %v374_v12 = vrot.slane %v17314_v4, 1  ;;  %v375_v13 = vrot.slane %v17313_v5, 1  ;;  %v379_v19 = vrot.slane %v17311_v10, 1  ;;  %v380_v20 = vrot.slane %v17310_v11, 1  ;;  %v13536_v39 = vld [vmem:[%s17263_s0 + $0x3c] sm:$0xff]   ;;  %v13566_v53 = vld [vmem:[%s17263_s0 + $0x48] sm:$0xff]  }
   0x6   :  { %v382_v24 = vrot.slane %v17303_v15, 1  ;;  %v17300_v32 = vunpack.c.l.bf16 %v13495_v21  ;;  %v17299_v33 = vunpack.c.l.bf16 %v13500_v22  ;;  %v384_v36 = vrot.slane %v17302_v28, 1  ;;  %v13556_v48 = vld [vmem:[%s17263_s0 + $0x44] sm:$0x1]  ;;  %v13577_v58 = vld [vmem:[%s17263_s0 + $0x50] sm:$0x1] }
   0x7   :  { %v376_v17 = vsel %vm373_vm1, %v374_v12, %v375_v13  ;;  %v378_v18 = vsel %vm373_vm1, %v375_v13, %v377_v14  ;;  %v381_v26 = vsel %vm373_vm1, %v379_v19, %v380_v20  ;;  %v17298_v37 = vunpack.c.h.bf16 %v13500_v22 }
   0x8   :  { %v598_v23 = vpack.c.bf16 %v378_v18, %v376_v17  ;;  %v383_v30 = vsel %vm373_vm1, %v380_v20, %v382_v24  ;;  %v17297_v38 = vunpack.c.l.bf16 %v13507_v25  ;;  %v385_v40 = vrot.slane %v17301_v31, 1  ;;  %v13601_v18 = vld [vmem:[%s17263_s0 + $0x54] sm:$0xff]   ;;  %v13612_v24 = vld [vmem:[%s17263_s0 + $0x5c] sm:$0x1] }
   0x9   :  { %v13527_v35 = vpack.c.bf16 %v383_v30, %v381_v26  ;;  %v387_v41 = vrot.slane %v17300_v32, 1  ;;  %v389_v42 = vrot.slane %v17299_v33, 1  ;;  %v17290_v43 = vunpack.c.l.bf16 %v13515_v29  ;;  %v13617_v26 = vld [vmem:[%s17263_s0 + $0x60] sm:$0xff]   ;;  %v13624_v30 = vld [vmem:[%s17263_s0 + $0x68] sm:$0x1] }
   0xa   :  { %10947 = vmatprep.mubr.msk.bf16.mxu0 %vm632_vm2, %v598_v23  ;;  %v390_v44 = vrot.slane %v17298_v37, 1  ;;  %v392_v45 = vrot.slane %v17297_v38, 1  ;;  %v17289_v46 = vunpack.c.h.bf16 %v13515_v29  ;;  %v17288_v47 = vunpack.c.l.bf16 %v13525_v34 }
   0xb   :  { %17629 = vst [vmem:[#allocation5_spill] sm:$0xff] %v13527_v35  ;;  %10948 = vmatmul.mubr.msk.bf16.vlgmr.msra.gmra.mrb[0].mxu0 %vm632_vm2, %v13527_v35  ;;  %v386_v49 = vsel %vm373_vm1, %v384_v36, %v385_v40  ;;  %v388_v50 = vsel %vm373_vm1, %v385_v40, %v387_v41  ;;  %v394_v51 = vrot.slane %v17290_v43, 1  ;;  %v17287_v52 = vunpack.c.l.bf16 %v13536_v39 }
   0xc   :  { %11012 = vmatpush3.bf16.msra.mxu0 %v1119_v27  ;;  %v13568_v54 = vpack.c.bf16 %v388_v50, %v386_v49  ;;  %v391_v55 = vsel %vm373_vm1, %v389_v42, %v390_v44  ;;  %v393_v56 = vsel %vm373_vm1, %v390_v44, %v392_v45  ;;  %v395_v57 = vrot.slane %v17289_v46, 1 }
   0xd   :  { %v13579_v59 = vpack.c.bf16 %v393_v56, %v391_v55  ;;  %v397_v60 = vrot.slane %v17288_v47, 1  ;;  %v17286_v61 = vunpack.c.h.bf16 %v13536_v39  ;;  %v17281_v62 = vunpack.c.l.bf16 %v13556_v48 }
   0xe   :  { %17630 = vst [vmem:[#allocation6_spill] sm:$0xff] %v13568_v54  ;;  %10951 = vmatprep.mubr.msk.bf16.mxu0 %vm632_vm2, %v13568_v54  ;;  %v396_v63 = vsel %vm373_vm1, %v394_v51, %v395_v57  ;;  %v399_v0 = vrot.slane %v17287_v52, 1  ;;  %v17278_v3 = vunpack.c.l.bf16 %v13566_v53  ;;  %v17277_v7 = vunpack.c.h.bf16 %v13566_v53 }
   0xf   :  { %17631 = vst [vmem:[#allocation7_spill] sm:$0xff] %v13579_v59  ;;  %v398_v12 = vsel %vm373_vm1, %v395_v57, %v397_v60  ;;  %v400_v13 = vrot.slane %v17286_v61, 1  ;;  %v402_v14 = vrot.slane %v17281_v62, 1  ;;  %v17276_v17 = vunpack.c.l.bf16 %v13577_v58  ;;  %v13647_v60 = vld [vmem:[%s17263_s0 + $0x6c] sm:$0xff]   ;;  %v13731_v62 = vld [vmem:[%s17263_s0 + $0x98] sm:$0x1] }
  0x10   :  { %v13603_v19 = vpack.c.bf16 %v398_v12, %v396_v63  ;;  %v404_v20 = vrot.slane %v17278_v3, 1  ;;  %v405_v23 = vrot.slane %v17277_v7, 1  ;;  %v17275_v40 = vunpack.c.l.bf16 %v13601_v18  ;;  %v13652_v63 = vld [vmem:[%s17263_s0 + $0x74] sm:$0x1]  ;;  %v13700_v3 = vld [vmem:[%s17263_s0 + $0x84] sm:$0xff]  }
  0x11   :  { %v407_v27 = vrot.slane %v17276_v17, 1  ;;  %v401_v36 = vsel %vm373_vm1, %v399_v0, %v400_v13  ;;  %v403_v41 = vsel %vm373_vm1, %v400_v13, %v402_v14  ;;  %v17274_v42 = vunpack.c.h.bf16 %v13601_v18 }
  0x12   :  { %17632 = vst [vmem:[#allocation8_spill] sm:$0xff] %v13603_v19  ;;  %v17273_v44 = vunpack.c.l.bf16 %v13612_v24  ;;  %v17272_v45 = vunpack.c.l.bf16 %v13617_v26  ;;  %v406_v49 = vsel %vm373_vm1, %v404_v20, %v405_v23  ;;  %v17271_v51 = vunpack.c.h.bf16 %v13617_v26  ;;  %v13665_v20 = vld [vmem:[%s17263_s0 + $0x78] sm:$0xff]  }
  0x13   :  { %10952 = vmatmul.mubr.msk.bf16.gmra.mrb[4].mxu0 %vm632_vm2, %v13579_v59  ;;  %v408_v50 = vsel %vm373_vm1, %v405_v23, %v407_v27  ;;  %v17270_v55 = vunpack.c.l.bf16 %v13624_v30  ;;  %v13640_v56 = vpack.c.bf16 %v403_v41, %v401_v36  ;;  %v409_v57 = vrot.slane %v17275_v40, 1  ;;  %v13670_v23 = vld [vmem:[%s17265_s2 + $0x4] sm:$0x3]  ;;  %v13681_v41 = vld [vmem:[%s17263_s0 + $0x80] sm:$0x1] }
  0x14   :  { %10955 = vmatprep.mubr.msk.bf16.mxu0 %vm632_vm2, %v13603_v19  ;;  %v13654_v0 = vpack.c.bf16 %v408_v50, %v406_v49  ;;  %v410_v12 = vrot.slane %v17274_v42, 1  ;;  %v412_v13 = vrot.slane %v17273_v44, 1  ;;  %v414_v14 = vrot.slane %v17272_v45, 1  ;;  %13199 = vmatprep.subr.msk.bf16.mxu0 %vm729_vm0, %v13670_v23 }
  0x15   :  { %17633 = vst [vmem:[#allocation9_spill] sm:$0xff] %v13640_v56  ;;  %v415_v27 = vrot.slane %v17271_v51, 1  ;;  %v417_v36 = vrot.slane %v17270_v55, 1  ;;  %v17280_v49 = vunpack.c.l.bf16 %v13647_v60  ;;  %v17279_v50 = vunpack.c.h.bf16 %v13647_v60 }
  0x16   :  { %17634 = vst [vmem:[#allocation10_spill] sm:$0xff] %v13654_v0  ;;  %v411_v55 = vsel %vm373_vm1, %v409_v57, %v410_v12  ;;  %v413_v51 = vsel %vm373_vm1, %v410_v12, %v412_v13  ;;  %v17285_v45 = vunpack.c.l.bf16 %v13652_v63  ;;  %v17283_v44 = vunpack.c.l.bf16 %v13665_v20 }
  0x17   :  { %v416_v42 = vsel %vm373_vm1, %v414_v14, %v415_v27  ;;  %v418_v40 = vsel %vm373_vm1, %v415_v27, %v417_v36  ;;  %v17282_v17 = vunpack.c.h.bf16 %v13665_v20  ;;  %v17284_v7 = vunpack.c.l.bf16 %v13681_v41  ;;  %v13711_v14 = vld [vmem:[%s17263_s0 + $0x8c] sm:$0x1]  ;;  %v13716_v27 = vld [vmem:[%s17263_s0 + $0x90] sm:$0xff]  }
  0x18   :  { %v13702_v57 = vpack.c.bf16 %v413_v51, %v411_v55  ;;  %v419_v12 = vrot.slane %v17280_v49, 1  ;;  %v420_v13 = vrot.slane %v17279_v50, 1  ;;  %v13718_v36 = vpack.c.bf16 %v418_v40, %v416_v42 }
  0x19   :  { %v422_v51 = vrot.slane %v17285_v45, 1  ;;  %v424_v55 = vrot.slane %v17283_v44, 1  ;;  %v425_v50 = vrot.slane %v17282_v17, 1  ;;  %v427_v49 = vrot.slane %v17284_v7, 1 }
  0x1a   :  { %17635 = vst [vmem:[#allocation11_spill] sm:$0xff] %v13702_v57  ;;  %17636 = vst [vmem:[#allocation12_spill] sm:$0xff] %v13718_v36  ;;  %v421_v40 = vsel %vm373_vm1, %v419_v12, %v420_v13  ;;  %v17296_v42 = vunpack.c.l.bf16 %v13700_v3  ;;  %v17295_v44 = vunpack.c.h.bf16 %v13700_v3  ;;  %v17294_v7 = vunpack.c.l.bf16 %v13711_v14 }
  0x1b   :  { %10956 = vmatmul.mubr.msk.bf16.gmra.mrb[8].mxu0 %vm632_vm2, %v13640_v56  ;;  %v423_v17 = vsel %vm373_vm1, %v420_v13, %v422_v51  ;;  %v17291_v45 = vunpack.c.l.bf16 %v13716_v27  ;;  %v426_v61 = vsel %vm373_vm1, %v424_v55, %v425_v50  ;;  %v428_v52 = vsel %vm373_vm1, %v425_v50, %v427_v49 }
  0x1c   :  { %10959 = vmatprep.mubr.msk.bf16.mxu0 %vm632_vm2, %v13654_v0  ;;  %v17293_v47 = vunpack.c.h.bf16 %v13716_v27  ;;  %v17292_v12 = vunpack.c.l.bf16 %v13731_v62 }
  0x23   :  { %10960 = vmatmul.mubr.msk.bf16.gmra.mrb[12].mxu0 %vm632_vm2, %v13702_v57 }
  0x24   :  { %10963 = vmatprep.mubr.msk.bf16.mxu0 %vm632_vm2, %v13718_v36 }
  0x25   :  { %11 = vsyncpa [#allocation3], 0  ;;  %v13747_v46 = vpack.c.bf16 %v423_v17, %v421_v40  ;;  %v13749_v43 = vpack.c.bf16 %v428_v52, %v426_v61  ;;  %v429_v13 = vrot.slane %v17296_v42, 1  ;;  %v430_v51 = vrot.slane %v17295_v44, 1  ;;  %v13760_v49 = vld [vmem:[%s17263_s0 + $0x9c] sm:$0xff]   ;;  %v13776_v40 = vld [vmem:[%s17263_s0 + $0xa8] sm:$0xff]  }
  0x26   :  { %v432_v55 = vrot.slane %v17294_v7, 1  ;;  %v434_v17 = vrot.slane %v17291_v45, 1  ;;  %v435_v52 = vrot.slane %v17293_v47, 1  ;;  %v437_v61 = vrot.slane %v17292_v12, 1  ;;  %v13771_v50 = vld [vmem:[%s17263_s0 + $0xa4] sm:$0x1] }
  0x27   :  { %17637 = vst [vmem:[#allocation13_spill] sm:$0xff] %v13747_v46  ;;  %17638 = vst [vmem:[#allocation14_spill] sm:$0xff] %v13749_v43  ;;  %v13781_v45 = vld [vmem:[%s17263_s0 + $0xb0] sm:$0x1]  ;;  %v17309_v12 = vunpack.c.l.bf16 %v13760_v49  ;;  %v17308_v47 = vunpack.c.h.bf16 %v13760_v49  ;;  %v431_v7 = vsel %vm373_vm1, %v429_v13, %v430_v51  ;;  %v17307_v42 = vunpack.c.l.bf16 %v13771_v50 }
  0x28   :  { %17639 = vst [vmem:[#allocation15_spill] sm:$0xff] %v13771_v50  ;;  %17640 = vst [vmem:[#allocation16_spill] sm:$0xff] %v13781_v45  ;;  %v433_v44 = vsel %vm373_vm1, %v430_v51, %v432_v55  ;;  %v17306_v38 = vunpack.c.l.bf16 %v13776_v40  ;;  %v436_v37 = vsel %vm373_vm1, %v434_v17, %v435_v52  ;;  %v438_v33 = vsel %vm373_vm1, %v435_v52, %v437_v61  ;;  %v13810_v17 = vld [vmem:[%s17263_s0 + $0xb4] sm:$0xff]   ;;  %v13831_v61 = vld [vmem:[%s17263_s0 + $0xe0] sm:$0x1] }
  0x29   :  { %v17305_v32 = vunpack.c.h.bf16 %v13776_v40  ;;  %v17304_v31 = vunpack.c.l.bf16 %v13781_v45  ;;  %v13797_v28 = vpack.c.bf16 %v433_v44, %v431_v7  ;;  %v439_v15 = vrot.slane %v17309_v12, 1  ;;  %17644 = vst [vmem:[#allocation20_spill] sm:$0xff] %v13831_v61 }
  0x2a   :  { %v440_v13 = vrot.slane %v17308_v47, 1  ;;  %v13803_v51 = vpack.c.bf16 %v438_v33, %v436_v37  ;;  %v442_v55 = vrot.slane %v17307_v42, 1  ;;  %v444_v7 = vrot.slane %v17306_v38, 1  ;;  %v13821_v33 = vld [vmem:[%s17263_s0 + $0xbc] sm:$0x1] }
  0x2b   :  { %10964 = vmatmul.mubr.msk.bf16.gmra.mrb[16].mxu0 %vm632_vm2, %v13747_v46  ;;  %17641 = vst [vmem:[#allocation17_spill] sm:$0xff] %v13797_v28  ;;  %v445_v44 = vrot.slane %v17305_v32, 1  ;;  %v447_v52 = vrot.slane %v17304_v31, 1  ;;  %17643 = vst [vmem:[#allocation19_spill] sm:$0xff] %v13821_v33  ;;  %v13826_v37 = vld [vmem:[%s17263_s0 + $0xd8] sm:$0xff]   ;;  %v17319_v32 = vunpack.c.l.bf16 %v13810_v17  ;;  %v17318_v42 = vunpack.c.h.bf16 %v13810_v17 }
  0x2c   :  { %10967 = vmatprep.mubr.msk.bf16.mxu0 %vm632_vm2, %v13749_v43  ;;  %17642 = vst [vmem:[#allocation18_spill] sm:$0xff] %v13803_v51  ;;  %v441_v31 = vsel %vm373_vm1, %v439_v15, %v440_v13  ;;  %v443_v38 = vsel %vm373_vm1, %v440_v13, %v442_v55  ;;  %v17317_v47 = vunpack.c.l.bf16 %v13821_v33  ;;  %v17316_v6 = vunpack.c.h.bf16 %v13826_v37 }
  0x2d   :  { %v446_v11 = vsel %vm373_vm1, %v444_v7, %v445_v44  ;;  %v448_v10 = vsel %vm373_vm1, %v445_v44, %v447_v52  ;;  %v17315_v15 = vunpack.c.l.bf16 %v13831_v61  ;;  %v13847_v5 = vpack.c.bf16 %v443_v38, %v441_v31  ;;  %v13860_v7 = vld [vmem:[%s17263_s0 + $0xe4] sm:$0xff]   ;;  %v13871_v38 = vld [vmem:[%s17263_s0 + $0xec] sm:$0x1]  ;;  %v13876_v52 = vld [vmem:[%s17263_s0 + $0xf0] sm:$0xff]  }
  0x2e   :  { %v13849_v4 = vpack.c.bf16 %v448_v10, %v446_v11  ;;  %v449_v13 = vrot.slane %v17319_v32, 1  ;;  %v450_v55 = vrot.slane %v17318_v42, 1  ;;  %v452_v12 = vrot.slane %v17317_v47, 1  ;;  %17648 = vst [vmem:[#allocation23_spill] sm:$0xff] %v13871_v38 }
  0x2f   :  { %17645 = vst [vmem:[#allocation21_spill] sm:$0xff] %v13847_v5  ;;  %v17647_v44 = vunpack.c.l.bf16 %v13826_v37  ;;  %v455_v10 = vrot.slane %v17316_v6, 1  ;;  %v457_v11 = vrot.slane %v17315_v15, 1  ;;  %v17334_v32 = vunpack.c.l.bf16 %v13871_v38 }
  0x30   :  { %17646 = vst [vmem:[#allocation22_spill] sm:$0xff] %v13849_v4  ;;  %v451_v47 = vsel %vm373_vm1, %v449_v13, %v450_v55  ;;  %v453_v42 = vsel %vm373_vm1, %v450_v55, %v452_v12  ;;  %v17652_v13 = vunpack.c.h.bf16 %v13860_v7  ;;  %vm1410_vm3 = vcmask 1045504  }
  0x31   :  { %v454_v31 = vrot.slane %v17647_v44, 1  ;;  %v13881_v44 = vld [vmem:[%s17263_s0 + $0xf8] sm:$0x1]  ;;  %v458_v43 = vsel %vm373_vm1, %v455_v10, %v457_v11  ;;  %v13897_v6 = vpack.c.bf16 %v453_v42, %v451_v47  ;;  %v13929_v42 = vld [vmem:[%s17263_s0 + $0x110] sm:$0x1]  ;;  %vm4517_vm4 = vcmask 261120  }
  0x32   :  { %17649 = vst [vmem:[#allocation24_spill] sm:$0xff] %v13881_v44  ;;  %v17332_v15 = vunpack.c.l.bf16 %v13881_v44  ;;  %v460_v12 = vrot.slane %v17652_v13, 1  ;;  %17655 = vst [vmem:[#allocation27_spill] sm:$0xff] %v13929_v42  ;;  %vm13403_vm5 = vmmov 0   ;;  %vm4672_vm6 = vcmask 1041409  }
  0x33   :  { %10968 = vmatmul.mubr.msk.bf16.gmra.mrb[20].mxu0 %vm632_vm2, %v13797_v28  ;;  %v456_v28 = vsel %vm373_vm1, %v454_v31, %v455_v10  ;;  %17650 = vst [vmem:[#allocation25_spill] sm:$0xff] %v13897_v6  ;;  %v13908_v31 = vld [vmem:[%s17263_s0 + $0xfc] sm:$0xff]   ;;  %v17653_v10 = vunpack.c.l.bf16 %v13876_v52  ;;  %vm4768_vm7 = vcmask 523264   ;;  %vm9596_vm8 = vcmask 254976  }
  0x34   :  { %10971 = vmatprep.mubr.msk.bf16.mxu0 %vm632_vm2, %v13803_v51  ;;  %v614_v55 = vpack.c.bf16 %v458_v43, %v456_v28  ;;  %v462_v51 = vrot.slane %v17334_v32, 1  ;;  %v13919_v28 = vld [vmem:[%s17263_s0 + $0x104] sm:$0x1]  ;;  %v13924_v43 = vld [vmem:[%s17263_s0 + $0x108] sm:$0xff]  }
  0x35   :  { %v464_v11 = vrot.slane %v17653_v10, 1  ;;  %17654 = vst [vmem:[#allocation26_spill] sm:$0xff] %v13919_v28  ;;  %v17347_v32 = vunpack.c.l.bf16 %v13919_v28 }
  0x37   :  { %v472_v36 = vrot.slane %v17347_v32, 1 }
  0x3b   :  { %10972 = vmatmul.mubr.msk.bf16.gmra.mrb[24].mxu0 %vm632_vm2, %v13847_v5  ;;  %v17333_v5 = vunpack.c.h.bf16 %v13876_v52 }
  0x3c   :  { %10975 = vmatprep.mubr.msk.bf16.mxu0 %vm632_vm2, %v13849_v4  ;;  %v17651_v4 = vunpack.c.l.bf16 %v13860_v7 }
  0x3d   :  { %v465_v47 = vrot.slane %v17333_v5, 1  ;;  %v17348_v5 = vunpack.c.h.bf16 %v13908_v31 }
  0x3e   :  { %v459_v46 = vrot.slane %v17651_v4, 1  ;;  %v467_v4 = vrot.slane %v17332_v15, 1  ;;  %v463_v15 = vsel %vm373_vm1, %v460_v12, %v462_v51  ;;  %v17658_v51 = vunpack.c.l.bf16 %v13908_v31 }
  0x3f   :  { %v466_v57 = vsel %vm373_vm1, %v464_v11, %v465_v47  ;;  %v13957_v11 = vld [vmem:[%s17263_s0 + $0x114] sm:$0xff]  }
  0x40   :  { %v461_v13 = vsel %vm373_vm1, %v459_v46, %v460_v12  ;;  %v468_v0 = vsel %vm373_vm1, %v465_v47, %v467_v4  ;;  %v17345_v46 = vunpack.c.l.bf16 %v13929_v42  ;;  %v469_v12 = vrot.slane %v17658_v51, 1  ;;  %v13968_v4 = vld [vmem:[%s17263_s0 + $0x11c] sm:$0x1]  ;;  %v13978_v51 = vld [vmem:[%s17263_s0 + $0x128] sm:$0x1] }
  0x41   :  { %v13944_v56 = vpack.c.bf16 %v463_v15, %v461_v13  ;;  %v13946_v10 = vpack.c.bf16 %v468_v0, %v466_v57  ;;  %v17659_v47 = vunpack.c.l.bf16 %v13924_v43  ;;  %17660 = vst [vmem:[#allocation30_spill] sm:$0xff] %v13968_v4  ;;  %v13973_v13 = vld [vmem:[%s17263_s0 + $0x120] sm:$0xff]   ;;  %17661 = vst [vmem:[#allocation31_spill] sm:$0xff] %v13978_v51 }
  0x42   :  { %v477_v57 = vrot.slane %v17345_v46, 1 }
  0x43   :  { %10976 = vmatmul.mubr.msk.bf16.gmra.mrb[28].mxu0 %vm632_vm2, %v13897_v6  ;;  %v17346_v6 = vunpack.c.h.bf16 %v13924_v43  ;;  %17656 = vst [vmem:[#allocation28_spill] sm:$0xff] %v13944_v56  ;;  %17657 = vst [vmem:[#allocation29_spill] sm:$0xff] %v13946_v10  ;;  %v474_v15 = vrot.slane %v17659_v47, 1  ;;  %v17359_v47 = vunpack.c.l.bf16 %v13978_v51 }
  0x44   :  { %10979 = vmatprep.mubr.msk.bf16.mxu0 %vm632_vm2, %v614_v55  ;;  %v470_v55 = vrot.slane %v17348_v5, 1  ;;  %v17361_v5 = vunpack.c.l.bf16 %v13968_v4 }
  0x45   :  { %v475_v0 = vrot.slane %v17346_v6, 1 }
  0x46   :  { %v471_v6 = vsel %vm373_vm1, %v469_v12, %v470_v55  ;;  %v473_v32 = vsel %vm373_vm1, %v470_v55, %v472_v36  ;;  %v17664_v12 = vunpack.c.h.bf16 %v13957_v11  ;;  %v482_v19 = vrot.slane %v17361_v5, 1 }
  0x47   :  { %v476_v59 = vsel %vm373_vm1, %v474_v15, %v475_v0  ;;  %v478_v54 = vsel %vm373_vm1, %v475_v0, %v477_v57  ;;  %v13994_v46 = vpack.c.bf16 %v473_v32, %v471_v6  ;;  %v14007_v15 = vld [vmem:[%s17263_s0 + $0x12c] sm:$0xff]   ;;  %v17666_v0 = vunpack.c.l.bf16 %v13973_v13  ;;  %v14028_v57 = vld [vmem:[%s17263_s0 + $0x140] sm:$0x1] }
  0x48   :  { %v480_v36 = vrot.slane %v17664_v12, 1  ;;  %v14000_v55 = vpack.c.bf16 %v478_v54, %v476_v59  ;;  %v14018_v54 = vld [vmem:[%s17263_s0 + $0x134] sm:$0x1]  ;;  %v14023_v59 = vld [vmem:[%s17263_s0 + $0x138] sm:$0xff]   ;;  %17668 = vst [vmem:[#allocation35_spill] sm:$0xff] %v14028_v57 }
  0x49   :  { %17662 = vst [vmem:[#allocation32_spill] sm:$0xff] %v13994_v46  ;;  %v484_v6 = vrot.slane %v17666_v0, 1  ;;  %17667 = vst [vmem:[#allocation34_spill] sm:$0xff] %v14018_v54  ;;  %v17672_v51 = vunpack.c.l.bf16 %v14018_v54 }
  0x4a   :  { %17665 = vst [vmem:[#allocation33_spill] sm:$0xff] %v14000_v55 }
  0x4b   :  { %10980 = vmatmul.mubr.msk.bf16.gmra.mrb[32].mxu0 %vm632_vm2, %v13944_v56  ;;  %v17360_v56 = vunpack.c.h.bf16 %v13973_v13 }
  0x4c   :  { %10983 = vmatprep.mubr.msk.bf16.mxu0 %vm632_vm2, %v13946_v10  ;;  %v17663_v10 = vunpack.c.l.bf16 %v13957_v11 }
  0x4d   :  { %v485_v32 = vrot.slane %v17360_v56, 1  ;;  %v17372_v56 = vunpack.c.h.bf16 %v14007_v15 }
  0x4e   :  { %v479_v35 = vrot.slane %v17663_v10, 1  ;;  %v487_v10 = vrot.slane %v17359_v47, 1  ;;  %v483_v47 = vsel %vm373_vm1, %v480_v36, %v482_v19  ;;  %v17671_v19 = vunpack.c.l.bf16 %v14007_v15 }
  0x4f   :  { %v486_v4 = vsel %vm373_vm1, %v484_v6, %v485_v32  ;;  %v490_v5 = vrot.slane %v17372_v56, 1  ;;  %v14057_v6 = vld [vmem:[%s17263_s0 + $0x144] sm:$0xff]  }
  0x50   :  { %v481_v12 = vsel %vm373_vm1, %v479_v35, %v480_v36  ;;  %v488_v42 = vsel %vm373_vm1, %v485_v32, %v487_v10  ;;  %v17370_v35 = vunpack.c.l.bf16 %v14028_v57  ;;  %v489_v36 = vrot.slane %v17671_v19, 1  ;;  %v14068_v10 = vld [vmem:[%s17263_s0 + $0x14c] sm:$0x1] }
  0x51   :  { %v14044_v0 = vpack.c.bf16 %v483_v47, %v481_v12  ;;  %v14046_v28 = vpack.c.bf16 %v488_v42, %v486_v4  ;;  %v17673_v32 = vunpack.c.l.bf16 %v14023_v59  ;;  %17674 = vst [vmem:[#allocation38_spill] sm:$0xff] %v14068_v10  ;;  %v14078_v12 = vld [vmem:[%s17263_s0 + $0x158] sm:$0x1]  ;;  %v17383_v56 = vunpack.c.l.bf16 %v14068_v10 }
  0x52   :  { %v497_v4 = vrot.slane %v17370_v35, 1  ;;  %17675 = vst [vmem:[#allocation39_spill] sm:$0xff] %v14078_v12  ;;  %v491_v35 = vsel %vm373_vm1, %v489_v36, %v490_v5  ;;  %v17381_v19 = vunpack.c.l.bf16 %v14078_v12  ;;  %v17678_v36 = vunpack.c.h.bf16 %v14057_v6 }
  0x53   :  { %10984 = vmatmul.mubr.msk.bf16.gmra.mrb[36].mxu0 %vm632_vm2, %v13994_v46  ;;  %v17371_v46 = vunpack.c.h.bf16 %v14023_v59  ;;  %17669 = vst [vmem:[#allocation36_spill] sm:$0xff] %v14044_v0  ;;  %17670 = vst [vmem:[#allocation37_spill] sm:$0xff] %v14046_v28  ;;  %v494_v47 = vrot.slane %v17673_v32, 1  ;;  %v502_v57 = vrot.slane %v17383_v56, 1 }
  0x54   :  { %10987 = vmatprep.mubr.msk.bf16.mxu0 %vm632_vm2, %v14000_v55  ;;  %v492_v55 = vrot.slane %v17672_v51, 1  ;;  %v14073_v51 = vld [vmem:[%s17263_s0 + $0x150] sm:$0xff]  }
  0x55   :  { %v495_v42 = vrot.slane %v17371_v46, 1 }
  0x56   :  { %v493_v46 = vsel %vm373_vm1, %v490_v5, %v492_v55  ;;  %v500_v5 = vrot.slane %v17678_v36, 1 }
  0x57   :  { %v496_v54 = vsel %vm373_vm1, %v494_v47, %v495_v42  ;;  %v498_v44 = vsel %vm373_vm1, %v495_v42, %v497_v4  ;;  %v14094_v32 = vpack.c.bf16 %v493_v46, %v491_v35  ;;  %v14107_v47 = vld [vmem:[%s17263_s0 + $0x15c] sm:$0xff]   ;;  %v17680_v42 = vunpack.c.l.bf16 %v14073_v51  ;;  %v14128_v4 = vld [vmem:[%s17263_s0 + $0x170] sm:$0x1] }
  0x58   :  { %v14100_v55 = vpack.c.bf16 %v498_v44, %v496_v54  ;;  %v14118_v44 = vld [vmem:[%s17263_s0 + $0x164] sm:$0x1]  ;;  %v14123_v54 = vld [vmem:[%s17263_s0 + $0x168] sm:$0xff]   ;;  %17682 = vst [vmem:[#allocation43_spill] sm:$0xff] %v14128_v4 }
  0x59   :  { %17676 = vst [vmem:[#allocation40_spill] sm:$0xff] %v14094_v32  ;;  %v504_v46 = vrot.slane %v17680_v42, 1  ;;  %17681 = vst [vmem:[#allocation42_spill] sm:$0xff] %v14118_v44  ;;  %v17686_v12 = vunpack.c.l.bf16 %v14118_v44 }
  0x5a   :  { %17679 = vst [vmem:[#allocation41_spill] sm:$0xff] %v14100_v55 }
  0x5b   :  { %10988 = vmatmul.mubr.msk.bf16.gmra.mrb[40].mxu0 %vm632_vm2, %v14044_v0  ;;  %v17382_v0 = vunpack.c.h.bf16 %v14073_v51 }
  0x5c   :  { %10991 = vmatprep.mubr.msk.bf16.mxu0 %vm632_vm2, %v14046_v28  ;;  %v17677_v28 = vunpack.c.l.bf16 %v14057_v6 }
  0x5d   :  { %v505_v35 = vrot.slane %v17382_v0, 1  ;;  %v17394_v0 = vunpack.c.h.bf16 %v14107_v47 }
  0x5e   :  { %v499_v38 = vrot.slane %v17677_v28, 1  ;;  %v507_v28 = vrot.slane %v17381_v19, 1  ;;  %v503_v19 = vsel %vm373_vm1, %v500_v5, %v502_v57  ;;  %v17685_v57 = vunpack.c.l.bf16 %v14107_v47 }
  0x5f   :  { %v506_v10 = vsel %vm373_vm1, %v504_v46, %v505_v35  ;;  %v510_v56 = vrot.slane %v17394_v0, 1  ;;  %v14157_v46 = vld [vmem:[%s17263_s0 + $0x174] sm:$0xff]  }
  0x60   :  { %v501_v36 = vsel %vm373_vm1, %v499_v38, %v500_v5  ;;  %v508_v61 = vsel %vm373_vm1, %v505_v35, %v507_v28  ;;  %v17392_v38 = vunpack.c.l.bf16 %v14128_v4  ;;  %v509_v5 = vrot.slane %v17685_v57, 1  ;;  %v14168_v28 = vld [vmem:[%s17263_s0 + $0x17c] sm:$0x1] }
  0x61   :  { %v14144_v42 = vpack.c.bf16 %v503_v19, %v501_v36  ;;  %v14146_v33 = vpack.c.bf16 %v508_v61, %v506_v10  ;;  %v17687_v35 = vunpack.c.l.bf16 %v14123_v54  ;;  %v14178_v36 = vld [vmem:[%s17263_s0 + $0x188] sm:$0x1]  ;;  %v17405_v0 = vunpack.c.l.bf16 %v14168_v28 }
  0x62   :  { %v517_v10 = vrot.slane %v17392_v38, 1  ;;  %17688 = vst [vmem:[#allocation46_spill] sm:$0xff] %v14178_v36  ;;  %v511_v38 = vsel %vm373_vm1, %v509_v5, %v510_v56  ;;  %v17403_v57 = vunpack.c.l.bf16 %v14178_v36  ;;  %v17691_v5 = vunpack.c.h.bf16 %v14157_v46 }
  0x63   :  { %10992 = vmatmul.mubr.msk.bf16.gmra.mrb[44].mxu0 %vm632_vm2, %v14094_v32  ;;  %v17393_v32 = vunpack.c.h.bf16 %v14123_v54  ;;  %17683 = vst [vmem:[#allocation44_spill] sm:$0xff] %v14144_v42  ;;  %17684 = vst [vmem:[#allocation45_spill] sm:$0xff] %v14146_v33  ;;  %v514_v19 = vrot.slane %v17687_v35, 1  ;;  %v522_v4 = vrot.slane %v17405_v0, 1 }
  0x64   :  { %10995 = vmatprep.mubr.msk.bf16.mxu0 %vm632_vm2, %v14100_v55  ;;  %v512_v55 = vrot.slane %v17686_v12, 1  ;;  %v14173_v12 = vld [vmem:[%s17263_s0 + $0x180] sm:$0xff]  }
  0x65   :  { %v515_v61 = vrot.slane %v17393_v32, 1 }
  0x66   :  { %v513_v32 = vsel %vm373_vm1, %v510_v56, %v512_v55  ;;  %v520_v56 = vrot.slane %v17691_v5, 1 }
  0x67   :  { %v516_v44 = vsel %vm373_vm1, %v514_v19, %v515_v61  ;;  %v518_v45 = vsel %vm373_vm1, %v515_v61, %v517_v10  ;;  %v14194_v35 = vpack.c.bf16 %v513_v32, %v511_v38  ;;  %v17693_v19 = vunpack.c.l.bf16 %v14173_v12 }
  0x68   :  { %v14200_v55 = vpack.c.bf16 %v518_v45, %v516_v44  ;;  %v527_v32 = vrot.slane %v17403_v57, 1  ;;  %v14218_v45 = vld [vmem:[%s17263_s0 + $0x194] sm:$0x1]  ;;  %v523_v38 = vsel %vm373_vm1, %v520_v56, %v522_v4 }
  0x69   :  { %17689 = vst [vmem:[#allocation47_spill] sm:$0xff] %v14194_v35  ;;  %v524_v61 = vrot.slane %v17693_v19, 1  ;;  %v17410_v57 = vunpack.c.l.bf16 %v14218_v45 }
  0x6a   :  { %17692 = vst [vmem:[#allocation48_spill] sm:$0xff] %v14200_v55 }
  0x6b   :  { %10996 = vmatmul.mubr.msk.bf16.gmra.mrb[48].mxu0 %vm632_vm2, %v14144_v42  ;;  %v17404_v42 = vunpack.c.h.bf16 %v14173_v12 }
  0x6c   :  { %10999 = vmatprep.mubr.msk.bf16.mxu0 %vm632_vm2, %v14146_v33  ;;  %v17690_v33 = vunpack.c.l.bf16 %v14157_v46 }
  0x6d   :  { %v525_v10 = vrot.slane %v17404_v42, 1 }
  0x6e   :  { %v519_v50 = vrot.slane %v17690_v33, 1  ;;  %v14213_v33 = vld [vmem:[%s17263_s0 + $0x18c] sm:$0xff]  }
  0x6f   :  { %v17411_v5 = vunpack.c.l.bf16 %v14213_v33  ;;  %v17409_v19 = vunpack.c.h.bf16 %v14213_v33  ;;  %v526_v42 = vsel %vm373_vm1, %v524_v61, %v525_v10  ;;  %v528_v0 = vsel %vm373_vm1, %v525_v10, %v527_v32 }
  0x70   :  { %v521_v44 = vsel %vm373_vm1, %v519_v50, %v520_v56  ;;  %v532_v56 = vrot.slane %v17410_v57, 1  ;;  %v17697_v32 = vunpack.c.h.bf16 %v13446_v1 }
  0x71   :  { %v14231_v36 = vpack.c.bf16 %v523_v38, %v521_v44  ;;  %v529_v50 = vrot.slane %v17411_v5, 1  ;;  %v530_v4 = vrot.slane %v17409_v19, 1  ;;  %v17698_v38 = vunpack.c.l.bf16 %v13451_v2 }
  0x72   :  { %v1412_v44 = vrot.slane %v17697_v32, 2  ;;  %v17699_v5 = vunpack.c.l.bf16 %v13464_v8 }
  0x73   :  { %11000 = vmatmul.mubr.msk.bf16.gmra.mrb[52].mxu0 %vm632_vm2, %v14194_v35  ;;  %17694 = vst [vmem:[#allocation49_spill] sm:$0xff] %v14231_v36  ;;  %v14233_v35 = vpack.c.bf16 %v528_v0, %v526_v42  ;;  %v531_v61 = vsel %vm373_vm1, %v529_v50, %v530_v4  ;;  %v533_v0 = vsel %vm373_vm1, %v530_v4, %v532_v56  ;;  %v17696_v42 = vunpack.c.l.bf16 %v13446_v1 }
  0x74   :  { %11003 = vmatprep.mubr.msk.bf16.mxu0 %vm632_vm2, %v14200_v55  ;;  %v1414_v19 = vrot.slane %v17698_v38, 2  ;;  %v14253_v57 = vpack.c.bf16 %v533_v0, %v531_v61  ;;  %v17701_v50 = vunpack.c.l.bf16 %v13469_v9  ;;  %v1766_v9 = vsel %vm729_vm0, %v13670_v23, 0 }
  0x75   :  { %17695 = vst [vmem:[#allocation50_spill] sm:$0xff] %v14233_v35  ;;  %v1411_v10 = vrot.slane %v17696_v42, 2  ;;  %v9768_v42 = vld [vmem:[%s17265_s2 + $0x6] sm:$0x3] }
  0x76   :  { %v1419_v4 = vrot.slane %v17701_v50, 2  ;;  %v1415_v56 = vsel %vm1410_vm3, %v1412_v44, %v1414_v19  ;;  %v17704_v19 = vunpack.c.l.bf16 %v13495_v21  ;;  %v17705_v50 = vunpack.c.l.bf16 %v13500_v22 }
  0x77   :  { %v1413_v2 = vsel %vm1410_vm3, %v1411_v10, %v1412_v44  ;;  %v17707_v21 = vunpack.c.l.bf16 %v13507_v25 }
  0x78   :  { %v1635_v0 = vpack.c.bf16 %v1415_v56, %v1413_v2  ;;  %v1424_v10 = vrot.slane %v17704_v19, 2  ;;  %v17706_v2 = vunpack.c.h.bf16 %v13500_v22  ;;  %v14366_v19 = vld [vmem:[%s17265_s2 + $0x8] sm:$0x3] }
  0x7a   :  { %v1427_v56 = vrot.slane %v17706_v2, 2 }
  0x7b   :  { %11004 = vmatmul.mubr.msk.bf16.gmra.mrb[56].mxu0 %vm632_vm2, %v14231_v36  ;;  %v1416_v36 = vrot.slane %v17699_v5, 2 }
  0x7c   :  { %11007 = vmatprep.mubr.msk.bf16.mxu0 %vm632_vm2, %v14233_v35  ;;  %v17700_v35 = vunpack.c.h.bf16 %v13464_v8 }
  0x7e   :  { %v1417_v55 = vrot.slane %v17700_v35, 2 }
  0x80   :  { %v1418_v61 = vsel %vm1410_vm3, %v1416_v36, %v1417_v55  ;;  %v1420_v5 = vsel %vm1410_vm3, %v1417_v55, %v1419_v4  ;;  %v17703_v36 = vunpack.c.h.bf16 %v13484_v16  ;;  %v1426_v4 = vrot.slane %v17705_v50, 2 }
  0x81   :  { %v14269_v35 = vpack.c.bf16 %v1420_v5, %v1418_v61  ;;  %v1429_v61 = vrot.slane %v17707_v21, 2  ;;  %v2132_v5 = vsel %vm729_vm0, %v9768_v42, 0  ;;  %v17711_v50 = vunpack.c.l.bf16 %v13536_v39 }
  0x82   :  { %v1422_v55 = vrot.slane %v17703_v36, 2  ;;  %v17710_v36 = vunpack.c.l.bf16 %v13525_v34  ;;  %v1428_v25 = vsel %vm1410_vm3, %v1426_v4, %v1427_v56  ;;  %v17712_v21 = vunpack.c.h.bf16 %v13536_v39 }
  0x83   :  { %11008 = vmatmul.mubr.msk.bf16.gmra.mrb[60].mxu0 %vm632_vm2, %v14253_v57  ;;  %v1436_v2 = vrot.slane %v17711_v50, 2  ;;  %v17713_v4 = vunpack.c.l.bf16 %v13556_v48 }
  0x84   :  { %11013 = vmatprep.mubr.msk.bf16.mxu0 %vm632_vm2, %v13446_v1  ;;  %v17702_v1 = vunpack.c.l.bf16 %v13484_v16  ;;  %v1425_v44 = vsel %vm1410_vm3, %v1422_v55, %v1424_v10 }
  0x86   :  { %v1421_v23 = vrot.slane %v17702_v1, 2  ;;  %v17709_v1 = vunpack.c.h.bf16 %v13515_v29 }
  0x88   :  { %v1423_v32 = vsel %vm1410_vm3, %v1421_v23, %v1422_v55  ;;  %v1432_v23 = vrot.slane %v17709_v1, 2  ;;  %v1434_v55 = vrot.slane %v17710_v36, 2 }
  0x89   :  { %v14348_v38 = vpack.c.bf16 %v1425_v44, %v1423_v32 }
  0x8a   :  { %v1435_v34 = vsel %vm1410_vm3, %v1432_v23, %v1434_v55 }
  0x8b   :  { %11014 = vmatmul.mubr.msk.bf16.vlgmr.msra.gmra.mrb[0].mxu0 %vm632_vm2, %v13464_v8 }
  0x8c   :  { %11078 = vmatpush3.bf16.msra.mxu0 %v1766_v9  ;;  %11017 = vmatprep.mubr.msk.bf16.mxu0 %vm632_vm2, %v13484_v16  ;;  %v17708_v9 = vunpack.c.l.bf16 %v13515_v29 }
  0x8d   :  { %13200 = vmatprep.subr.msk.bf16.mxu0 %vm729_vm0, %v9768_v42  ;;  %v1430_v42 = vsel %vm1410_vm3, %v1427_v56, %v1429_v61  ;;  %v1439_v56 = vrot.slane %v17713_v4, 2  ;;  %v17714_v61 = vunpack.c.l.bf16 %v13566_v53 }
  0x8e   :  { %v14378_v32 = vpack.c.bf16 %v1430_v42, %v1428_v25 }
  0x93   :  { %11018 = vmatmul.mubr.msk.bf16.gmra.mrb[4].mxu0 %vm632_vm2, %v13500_v22 }
  0x94   :  { %11021 = vmatprep.mubr.msk.bf16.mxu0 %vm632_vm2, %v13515_v29 }
  0x9b   :  { %11022 = vmatmul.mubr.msk.bf16.gmra.mrb[8].mxu0 %vm632_vm2, %v13536_v39 }
  0x9c   :  { %11025 = vmatprep.mubr.msk.bf16.mxu0 %vm632_vm2, %v13566_v53 }
  0xa3   :  { %11026 = vmatmul.mubr.msk.bf16.gmra.mrb[12].mxu0 %vm632_vm2, %v13601_v18 }
  0xa4   :  { %11029 = vmatprep.mubr.msk.bf16.mxu0 %vm632_vm2, %v13617_v26 }
  0xab   :  { %11030 = vmatmul.mubr.msk.bf16.gmra.mrb[16].mxu0 %vm632_vm2, %v13647_v60 }
  0xac   :  { %11033 = vmatprep.mubr.msk.bf16.mxu0 %vm632_vm2, %v13665_v20 }
  0xb3   :  { %11034 = vmatmul.mubr.msk.bf16.gmra.mrb[20].mxu0 %vm632_vm2, %v13700_v3 }
  0xb4   :  { %11037 = vmatprep.mubr.msk.bf16.mxu0 %vm632_vm2, %v13716_v27 }
  0xbb   :  { %11038 = vmatmul.mubr.msk.bf16.gmra.mrb[24].mxu0 %vm632_vm2, %v13760_v49 }
  0xbc   :  { %11041 = vmatprep.mubr.msk.bf16.mxu0 %vm632_vm2, %v13776_v40 }
  0xc3   :  { %11042 = vmatmul.mubr.msk.bf16.gmra.mrb[28].mxu0 %vm632_vm2, %v13810_v17 }
  0xc4   :  { %11045 = vmatprep.mubr.msk.bf16.mxu0 %vm632_vm2, %v13826_v37 }
  0xcb   :  { %11046 = vmatmul.mubr.msk.bf16.gmra.mrb[32].mxu0 %vm632_vm2, %v13860_v7 }
  0xcc   :  { %11049 = vmatprep.mubr.msk.bf16.mxu0 %vm632_vm2, %v13876_v52 }
  0xd3   :  { %11050 = vmatmul.mubr.msk.bf16.gmra.mrb[36].mxu0 %vm632_vm2, %v13908_v31 }
  0xd4   :  { %11053 = vmatprep.mubr.msk.bf16.mxu0 %vm632_vm2, %v13924_v43 }
  0xdb   :  { %11054 = vmatmul.mubr.msk.bf16.gmra.mrb[40].mxu0 %vm632_vm2, %v13957_v11 }
  0xdc   :  { %11057 = vmatprep.mubr.msk.bf16.mxu0 %vm632_vm2, %v13973_v13 }
  0xe3   :  { %11058 = vmatmul.mubr.msk.bf16.gmra.mrb[44].mxu0 %vm632_vm2, %v14007_v15 }
  0xe4   :  { %11061 = vmatprep.mubr.msk.bf16.mxu0 %vm632_vm2, %v14023_v59 }
  0xeb   :  { %11062 = vmatmul.mubr.msk.bf16.gmra.mrb[48].mxu0 %vm632_vm2, %v14057_v6 }
  0xec   :  { %11065 = vmatprep.mubr.msk.bf16.mxu0 %vm632_vm2, %v14073_v51 }
  0xf3   :  { %11066 = vmatmul.mubr.msk.bf16.gmra.mrb[52].mxu0 %vm632_vm2, %v14107_v47 }
  0xf4   :  { %11069 = vmatprep.mubr.msk.bf16.mxu0 %vm632_vm2, %v14123_v54 }
  0xfb   :  { %11070 = vmatmul.mubr.msk.bf16.gmra.mrb[56].mxu0 %vm632_vm2, %v14157_v46 }
  0xfc   :  { %11073 = vmatprep.mubr.msk.bf16.mxu0 %vm632_vm2, %v14173_v12 }
 0x103   :  { %11074 = vmatmul.mubr.msk.bf16.gmra.mrb[60].mxu0 %vm632_vm2, %v14213_v33 }
 0x104   :  { %11079 = vmatprep.mubr.msk.bf16.mxu0 %vm632_vm2, %v1635_v0  ;;  %v1431_v0 = vrot.slane %v17708_v9, 2  ;;  %v1441_v9 = vrot.slane %v17714_v61, 2  ;;  %v17719_v61 = vunpack.c.l.bf16 %v13612_v24 }
 0x106   :  { %v1433_v10 = vsel %vm1410_vm3, %v1431_v0, %v1432_v23  ;;  %v17715_v0 = vunpack.c.h.bf16 %v13566_v53  ;;  %v17716_v23 = vunpack.c.l.bf16 %v13577_v58  ;;  %v17717_v58 = vunpack.c.l.bf16 %v13601_v18 }
 0x107   :  { %v14380_v44 = vpack.c.bf16 %v1435_v34, %v1433_v10 }
 0x108   :  { %v1442_v1 = vrot.slane %v17715_v0, 2  ;;  %v1444_v36 = vrot.slane %v17716_v23, 2  ;;  %v1446_v50 = vrot.slane %v17717_v58, 2  ;;  %v1449_v0 = vrot.slane %v17719_v61, 2 }
 0x10a   :  { %v1443_v25 = vsel %vm1410_vm3, %v1441_v9, %v1442_v1  ;;  %v1445_v42 = vsel %vm1410_vm3, %v1442_v1, %v1444_v36  ;;  %v17722_v1 = vunpack.c.l.bf16 %v13624_v30  ;;  %v17723_v30 = vunpack.c.l.bf16 %v13647_v60 }
 0x10b   :  { %11080 = vmatmul.mubr.msk.bf16.vlgmr.msra.gmra.mrb[0].mxu0 %vm632_vm2, %v14269_v35  ;;  %v14404_v34 = vpack.c.bf16 %v1445_v42, %v1443_v25 }
 0x10c   :  { %11144 = vmatpush3.bf16.msra.mxu0 %v2132_v5  ;;  %11083 = vmatprep.mubr.msk.bf16.mxu0 %vm632_vm2, %v14348_v38  ;;  %v1437_v5 = vrot.slane %v17712_v21, 2  ;;  %v17718_v21 = vunpack.c.h.bf16 %v13601_v18  ;;  %v1454_v23 = vrot.slane %v17722_v1, 2  ;;  %v1456_v58 = vrot.slane %v17723_v30, 2 }
 0x10d   :  { %13201 = vmatprep.subr.msk.bf16.mxu0 %vm729_vm0, %v14366_v19 }
 0x10e   :  { %v1438_v55 = vsel %vm1410_vm3, %v1436_v2, %v1437_v5  ;;  %v1440_v48 = vsel %vm1410_vm3, %v1437_v5, %v1439_v56  ;;  %v1447_v4 = vrot.slane %v17718_v21, 2  ;;  %v17720_v2 = vunpack.c.l.bf16 %v13617_v26 }
 0x10f   :  { %v14402_v10 = vpack.c.bf16 %v1440_v48, %v1438_v55  ;;  %v17721_v56 = vunpack.c.h.bf16 %v13617_v26  ;;  %v17724_v21 = vunpack.c.h.bf16 %v13647_v60 }
 0x110   :  { %v1451_v5 = vrot.slane %v17720_v2, 2  ;;  %v1448_v36 = vsel %vm1410_vm3, %v1446_v50, %v1447_v4  ;;  %v1450_v24 = vsel %vm1410_vm3, %v1447_v4, %v1449_v0  ;;  %v17725_v2 = vunpack.c.l.bf16 %v13652_v63 }
 0x111   :  { %v1452_v9 = vrot.slane %v17721_v56, 2  ;;  %v14426_v25 = vpack.c.bf16 %v1450_v24, %v1448_v36  ;;  %v1457_v61 = vrot.slane %v17724_v21, 2  ;;  %v17726_v50 = vunpack.c.l.bf16 %v13665_v20 }
 0x112   :  { %v1459_v56 = vrot.slane %v17725_v2, 2  ;;  %v17727_v0 = vunpack.c.h.bf16 %v13665_v20  ;;  %v17730_v21 = vunpack.c.h.bf16 %v13700_v3 }
 0x113   :  { %11084 = vmatmul.mubr.msk.bf16.gmra.mrb[4].mxu0 %vm632_vm2, %v14378_v32  ;;  %v1453_v55 = vsel %vm1410_vm3, %v1451_v5, %v1452_v9  ;;  %v1455_v48 = vsel %vm1410_vm3, %v1452_v9, %v1454_v23  ;;  %v1461_v4 = vrot.slane %v17726_v50, 2  ;;  %v17728_v9 = vunpack.c.l.bf16 %v13681_v41 }
 0x114   :  { %11087 = vmatprep.mubr.msk.bf16.mxu0 %vm632_vm2, %v14380_v44  ;;  %v14428_v42 = vpack.c.bf16 %v1455_v48, %v1453_v55  ;;  %v1462_v5 = vrot.slane %v17727_v0, 2  ;;  %v1458_v23 = vsel %vm1410_vm3, %v1456_v58, %v1457_v61  ;;  %v1460_v63 = vsel %vm1410_vm3, %v1457_v61, %v1459_v56 }
 0x115   :  { %v1464_v1 = vrot.slane %v17728_v9, 2  ;;  %v14450_v55 = vpack.c.bf16 %v1460_v63, %v1458_v23  ;;  %v17729_v41 = vunpack.c.l.bf16 %v13700_v3  ;;  %v1467_v2 = vrot.slane %v17730_v21, 2 }
 0x116   :  { %v1463_v36 = vsel %vm1410_vm3, %v1461_v4, %v1462_v5  ;;  %v17731_v50 = vunpack.c.l.bf16 %v13711_v14  ;;  %v17732_v58 = vunpack.c.l.bf16 %v13716_v27  ;;  %v17733_v56 = vunpack.c.h.bf16 %v13716_v27 }
 0x117   :  { %v1465_v24 = vsel %vm1410_vm3, %v1462_v5, %v1464_v1  ;;  %v1466_v30 = vrot.slane %v17729_v41, 2  ;;  %v17734_v5 = vunpack.c.l.bf16 %v13731_v62  ;;  %v17737_v62 = vunpack.c.l.bf16 %v13760_v49 }
 0x118   :  { %v14452_v48 = vpack.c.bf16 %v1465_v24, %v1463_v36  ;;  %v1469_v0 = vrot.slane %v17731_v50, 2  ;;  %v1471_v61 = vrot.slane %v17732_v58, 2  ;;  %v1472_v4 = vrot.slane %v17733_v56, 2  ;;  %v17739_v58 = vld [vmem:[#allocation15_spill] sm:$0xff] }
 0x119   :  { %v1474_v9 = vrot.slane %v17734_v5, 2  ;;  %v1468_v1 = vsel %vm1410_vm3, %v1466_v30, %v1467_v2  ;;  %v1476_v41 = vrot.slane %v17737_v62, 2  ;;  %v17738_v21 = vunpack.c.h.bf16 %v13760_v49 }
 0x11a   :  { %v1470_v14 = vsel %vm1410_vm3, %v1467_v2, %v1469_v0  ;;  %v1473_v23 = vsel %vm1410_vm3, %v1471_v61, %v1472_v4  ;;  %v17740_v56 = vunpack.c.l.bf16 %v17739_v58  ;;  %v17741_v30 = vunpack.c.l.bf16 %v13776_v40 }
 0x11b   :  { %11088 = vmatmul.mubr.msk.bf16.gmra.mrb[8].mxu0 %vm632_vm2, %v14402_v10  ;;  %v1475_v63 = vsel %vm1410_vm3, %v1472_v4, %v1474_v9  ;;  %v14474_v36 = vpack.c.bf16 %v1470_v14, %v1468_v1  ;;  %v1477_v50 = vrot.slane %v17738_v21, 2  ;;  %v17742_v0 = vunpack.c.h.bf16 %v13776_v40  ;;  %v17743_v4 = vld [vmem:[#allocation16_spill] sm:$0xff] }
 0x11c   :  { %11091 = vmatprep.mubr.msk.bf16.mxu0 %vm632_vm2, %v14404_v34  ;;  %v14476_v24 = vpack.c.bf16 %v1475_v63, %v1473_v23  ;;  %v1479_v5 = vrot.slane %v17740_v56, 2  ;;  %v1481_v2 = vrot.slane %v17741_v30, 2  ;;  %v17744_v9 = vunpack.c.l.bf16 %v17743_v4 }
 0x11d   :  { %17735 = vst [vmem:[#allocation51_spill] sm:$0xff] %v14474_v36  ;;  %v1482_v61 = vrot.slane %v17742_v0, 2  ;;  %v1478_v14 = vsel %vm1410_vm3, %v1476_v41, %v1477_v50  ;;  %v17747_v56 = vunpack.c.l.bf16 %v13810_v17  ;;  %v17748_v0 = vunpack.c.h.bf16 %v13810_v17 }
 0x11e   :  { %17736 = vst [vmem:[#allocation52_spill] sm:$0xff] %v14476_v24  ;;  %v1484_v1 = vrot.slane %v17744_v9, 2  ;;  %v1480_v23 = vsel %vm1410_vm3, %v1477_v50, %v1479_v5  ;;  %v17749_v9 = vld [vmem:[#allocation19_spill] sm:$0xff]  ;;  %v17751_v41 = vunpack.c.l.bf16 %v13826_v37  ;;  %v17752_v5 = vunpack.c.h.bf16 %v13826_v37 }
 0x11f   :  { %v1483_v63 = vsel %vm1410_vm3, %v1481_v2, %v1482_v61  ;;  %v14498_v21 = vpack.c.bf16 %v1480_v23, %v1478_v14  ;;  %v1486_v30 = vrot.slane %v17747_v56, 2  ;;  %v1487_v4 = vrot.slane %v17748_v0, 2 }
 0x120   :  { %v1485_v62 = vsel %vm1410_vm3, %v1482_v61, %v1484_v1  ;;  %v1491_v50 = vrot.slane %v17751_v41, 2  ;;  %v1492_v2 = vrot.slane %v17752_v5, 2  ;;  %v17753_v61 = vld [vmem:[#allocation20_spill] sm:$0xff]  ;;  %v17755_v0 = vunpack.c.l.bf16 %v13860_v7 }
 0x121   :  { %17745 = vst [vmem:[#allocation15_spill] sm:$0xff] %v14498_v21  ;;  %v14500_v58 = vpack.c.bf16 %v1485_v62, %v1483_v63  ;;  %v17754_v1 = vunpack.c.l.bf16 %v17753_v61  ;;  %v1488_v23 = vsel %vm1410_vm3, %v1486_v30, %v1487_v4  ;;  %v17756_v41 = vunpack.c.h.bf16 %v13860_v7  ;;  %v17757_v61 = vld [vmem:[#allocation23_spill] sm:$0xff] }
 0x122   :  { %v17759_v30 = vunpack.c.l.bf16 %v13876_v52 }
 0x123   :  { %11092 = vmatmul.mubr.msk.bf16.gmra.mrb[12].mxu0 %vm632_vm2, %v14426_v25  ;;  %17746 = vst [vmem:[#allocation16_spill] sm:$0xff] %v14500_v58  ;;  %v1494_v14 = vrot.slane %v17754_v1, 2  ;;  %v1497_v5 = vrot.slane %v17756_v41, 2  ;;  %v17758_v1 = vunpack.c.l.bf16 %v17757_v61  ;;  %v17765_v61 = vunpack.c.l.bf16 %v13908_v31 }
 0x124   :  { %11095 = vmatprep.mubr.msk.bf16.mxu0 %vm632_vm2, %v14428_v42 }
 0x125   :  { %v1495_v62 = vsel %vm1410_vm3, %v1492_v2, %v1494_v14 }
 0x12b   :  { %11096 = vmatmul.mubr.msk.bf16.gmra.mrb[16].mxu0 %vm632_vm2, %v14450_v55 }
 0x12c   :  { %11099 = vmatprep.mubr.msk.bf16.mxu0 %vm632_vm2, %v14452_v48 }
 0x133   :  { %11100 = vmatmul.mubr.msk.bf16.gmra.mrb[20].mxu0 %vm632_vm2, %v14474_v36 }
 0x134   :  { %11103 = vmatprep.mubr.msk.bf16.mxu0 %vm632_vm2, %v14476_v24  ;;  %v17750_v24 = vunpack.c.l.bf16 %v17749_v9  ;;  %v1496_v9 = vrot.slane %v17755_v0, 2 }
 0x136   :  { %v1489_v36 = vrot.slane %v17750_v24, 2  ;;  %v1493_v24 = vsel %vm1410_vm3, %v1491_v50, %v1492_v2  ;;  %v17761_v50 = vld [vmem:[#allocation24_spill] sm:$0xff] }
 0x137   :  { %v1651_v37 = vpack.c.bf16 %v1495_v62, %v1493_v24  ;;  %v17762_v2 = vunpack.c.l.bf16 %v17761_v50  ;;  %v17767_v50 = vld [vmem:[#allocation26_spill] sm:$0xff] }
 0x138   :  { %v1490_v63 = vsel %vm1410_vm3, %v1487_v4, %v1489_v36  ;;  %v17760_v36 = vunpack.c.h.bf16 %v13876_v52 }
 0x139   :  { %v14522_v56 = vpack.c.bf16 %v1490_v63, %v1488_v23  ;;  %v1504_v14 = vrot.slane %v17762_v2, 2  ;;  %v1498_v23 = vsel %vm1410_vm3, %v1496_v9, %v1497_v5  ;;  %v17769_v9 = vunpack.c.l.bf16 %v13924_v43 }
 0x13a   :  { %v1502_v4 = vrot.slane %v17760_v36, 2 }
 0x13b   :  { %11104 = vmatmul.mubr.msk.bf16.gmra.mrb[24].mxu0 %vm632_vm2, %v14498_v21  ;;  %v1501_v21 = vrot.slane %v17759_v30, 2  ;;  %v17766_v30 = vunpack.c.h.bf16 %v13908_v31 }
 0x13c   :  { %11107 = vmatprep.mubr.msk.bf16.mxu0 %vm632_vm2, %v14500_v58  ;;  %v1499_v58 = vrot.slane %v17758_v1, 2  ;;  %v1505_v62 = vsel %vm1410_vm3, %v1502_v4, %v1504_v14  ;;  %v1506_v1 = vrot.slane %v17765_v61, 2 }
 0x13d   :  { %v1503_v24 = vsel %vm1410_vm3, %v1501_v21, %v1502_v4  ;;  %v1507_v36 = vrot.slane %v17766_v30, 2  ;;  %v17770_v21 = vunpack.c.h.bf16 %v13924_v43  ;;  %v17771_v4 = vld [vmem:[#allocation27_spill] sm:$0xff] }
 0x13e   :  { %v1500_v63 = vsel %vm1410_vm3, %v1497_v5, %v1499_v58  ;;  %v14545_v41 = vpack.c.bf16 %v1505_v62, %v1503_v24  ;;  %v1511_v58 = vrot.slane %v17769_v9, 2  ;;  %v17772_v14 = vunpack.c.l.bf16 %v17771_v4 }
 0x13f   :  { %v14543_v0 = vpack.c.bf16 %v1500_v63, %v1498_v23  ;;  %v1512_v5 = vrot.slane %v17770_v21, 2  ;;  %v1508_v63 = vsel %vm1410_vm3, %v1506_v1, %v1507_v36  ;;  %v17776_v21 = vunpack.c.h.bf16 %v13957_v11 }
 0x140   :  { %17764 = vst [vmem:[#allocation20_spill] sm:$0xff] %v14545_v41  ;;  %v1514_v23 = vrot.slane %v17772_v14, 2  ;;  %v17777_v14 = vld [vmem:[#allocation30_spill] sm:$0xff]  ;;  %v17779_v1 = vunpack.c.l.bf16 %v13973_v13 }
 0x141   :  { %17763 = vst [vmem:[#allocation19_spill] sm:$0xff] %v14543_v0  ;;  %v1513_v62 = vsel %vm1410_vm3, %v1511_v58, %v1512_v5  ;;  %v1517_v4 = vrot.slane %v17776_v21, 2 }
 0x142   :  { %v1515_v61 = vsel %vm1410_vm3, %v1512_v5, %v1514_v23  ;;  %v17781_v5 = vld [vmem:[#allocation31_spill] sm:$0xff] }
 0x143   :  { %11108 = vmatmul.mubr.msk.bf16.gmra.mrb[28].mxu0 %vm632_vm2, %v14522_v56  ;;  %v17782_v23 = vunpack.c.l.bf16 %v17781_v5 }
 0x144   :  { %11111 = vmatprep.mubr.msk.bf16.mxu0 %vm632_vm2, %v1651_v37  ;;  %v17768_v37 = vunpack.c.l.bf16 %v17767_v50  ;;  %v14569_v50 = vpack.c.bf16 %v1515_v61, %v1513_v62 }
 0x146   :  { %v1509_v2 = vrot.slane %v17768_v37, 2  ;;  %17774 = vst [vmem:[#allocation24_spill] sm:$0xff] %v14569_v50  ;;  %v17775_v37 = vunpack.c.l.bf16 %v13957_v11 }
 0x148   :  { %v1510_v24 = vsel %vm1410_vm3, %v1507_v36, %v1509_v2  ;;  %v1516_v9 = vrot.slane %v17775_v37, 2  ;;  %v1521_v36 = vrot.slane %v17779_v1, 2  ;;  %v17780_v2 = vunpack.c.h.bf16 %v13973_v13 }
 0x149   :  { %v14567_v30 = vpack.c.bf16 %v1510_v24, %v1508_v63  ;;  %v1524_v63 = vrot.slane %v17782_v23, 2  ;;  %v17787_v23 = vld [vmem:[#allocation34_spill] sm:$0xff] }
 0x14a   :  { %v1522_v58 = vrot.slane %v17780_v2, 2  ;;  %v1518_v24 = vsel %vm1410_vm3, %v1516_v9, %v1517_v4  ;;  %v17786_v2 = vunpack.c.h.bf16 %v14007_v15  ;;  %v17789_v9 = vunpack.c.l.bf16 %v14023_v59 }
 0x14b   :  { %11112 = vmatmul.mubr.msk.bf16.gmra.mrb[32].mxu0 %vm632_vm2, %v14543_v0  ;;  %17773 = vst [vmem:[#allocation23_spill] sm:$0xff] %v14567_v30 }
 0x14c   :  { %11115 = vmatprep.mubr.msk.bf16.mxu0 %vm632_vm2, %v14545_v41  ;;  %v17778_v41 = vunpack.c.l.bf16 %v17777_v14  ;;  %v1525_v61 = vsel %vm1410_vm3, %v1522_v58, %v1524_v63  ;;  %v17785_v14 = vunpack.c.l.bf16 %v14007_v15  ;;  %v1527_v5 = vrot.slane %v17786_v2, 2 }
 0x14e   :  { %v1519_v0 = vrot.slane %v17778_v41, 2  ;;  %v1523_v41 = vsel %vm1410_vm3, %v1521_v36, %v1522_v58  ;;  %v1526_v1 = vrot.slane %v17785_v14, 2  ;;  %v17791_v58 = vld [vmem:[#allocation35_spill] sm:$0xff] }
 0x14f   :  { %v14593_v21 = vpack.c.bf16 %v1525_v61, %v1523_v41  ;;  %v17792_v63 = vunpack.c.l.bf16 %v17791_v58 }
 0x150   :  { %v1520_v62 = vsel %vm1410_vm3, %v1517_v4, %v1519_v0  ;;  %v1531_v0 = vrot.slane %v17789_v9, 2  ;;  %v17790_v4 = vunpack.c.h.bf16 %v14023_v59 }
 0x151   :  { %v14591_v37 = vpack.c.bf16 %v1520_v62, %v1518_v24  ;;  %17784 = vst [vmem:[#allocation27_spill] sm:$0xff] %v14593_v21  ;;  %v1534_v24 = vrot.slane %v17792_v63, 2  ;;  %v1528_v62 = vsel %vm1410_vm3, %v1526_v1, %v1527_v5  ;;  %v17797_v63 = vld [vmem:[#allocation38_spill] sm:$0xff]  ;;  %v17799_v1 = vunpack.c.l.bf16 %v14073_v51 }
 0x152   :  { %v1532_v36 = vrot.slane %v17790_v4, 2  ;;  %v17796_v4 = vunpack.c.h.bf16 %v14057_v6 }
 0x153   :  { %11116 = vmatmul.mubr.msk.bf16.gmra.mrb[36].mxu0 %vm632_vm2, %v14567_v30  ;;  %17783 = vst [vmem:[#allocation26_spill] sm:$0xff] %v14591_v37 }
 0x154   :  { %11119 = vmatprep.mubr.msk.bf16.mxu0 %vm632_vm2, %v14569_v50  ;;  %v17788_v50 = vunpack.c.l.bf16 %v17787_v23  ;;  %v1535_v61 = vsel %vm1410_vm3, %v1532_v36, %v1534_v24  ;;  %v17795_v23 = vunpack.c.l.bf16 %v14057_v6  ;;  %v1537_v58 = vrot.slane %v17796_v4, 2 }
 0x156   :  { %v1529_v30 = vrot.slane %v17788_v50, 2  ;;  %v1533_v50 = vsel %vm1410_vm3, %v1531_v0, %v1532_v36  ;;  %v1536_v9 = vrot.slane %v17795_v23, 2  ;;  %v17801_v36 = vld [vmem:[#allocation39_spill] sm:$0xff] }
 0x157   :  { %v14617_v2 = vpack.c.bf16 %v1535_v61, %v1533_v50  ;;  %v17802_v24 = vunpack.c.l.bf16 %v17801_v36 }
 0x158   :  { %v1530_v41 = vsel %vm1410_vm3, %v1527_v5, %v1529_v30  ;;  %v1541_v30 = vrot.slane %v17799_v1, 2  ;;  %v17800_v5 = vunpack.c.h.bf16 %v14073_v51 }
 0x159   :  { %v14615_v14 = vpack.c.bf16 %v1530_v41, %v1528_v62  ;;  %17794 = vst [vmem:[#allocation31_spill] sm:$0xff] %v14617_v2  ;;  %v1544_v62 = vrot.slane %v17802_v24, 2  ;;  %v1538_v41 = vsel %vm1410_vm3, %v1536_v9, %v1537_v58  ;;  %v17806_v24 = vld [vmem:[#allocation42_spill] sm:$0xff]  ;;  %v17808_v9 = vunpack.c.l.bf16 %v14123_v54 }
 0x15a   :  { %v1542_v0 = vrot.slane %v17800_v5, 2  ;;  %v17805_v5 = vunpack.c.h.bf16 %v14107_v47 }
 0x15b   :  { %11120 = vmatmul.mubr.msk.bf16.gmra.mrb[40].mxu0 %vm632_vm2, %v14591_v37  ;;  %17793 = vst [vmem:[#allocation30_spill] sm:$0xff] %v14615_v14 }
 0x15c   :  { %11123 = vmatprep.mubr.msk.bf16.mxu0 %vm632_vm2, %v14593_v21  ;;  %v17798_v21 = vunpack.c.l.bf16 %v17797_v63  ;;  %v1545_v61 = vsel %vm1410_vm3, %v1542_v0, %v1544_v62  ;;  %v17804_v63 = vunpack.c.l.bf16 %v14107_v47  ;;  %v1547_v36 = vrot.slane %v17805_v5, 2 }
 0x15e   :  { %v1539_v37 = vrot.slane %v17798_v21, 2  ;;  %v1543_v21 = vsel %vm1410_vm3, %v1541_v30, %v1542_v0  ;;  %v1546_v1 = vrot.slane %v17804_v63, 2  ;;  %v17810_v0 = vld [vmem:[#allocation43_spill] sm:$0xff] }
 0x15f   :  { %v14641_v4 = vpack.c.bf16 %v1545_v61, %v1543_v21  ;;  %v17811_v62 = vunpack.c.l.bf16 %v17810_v0 }
 0x160   :  { %v1540_v50 = vsel %vm1410_vm3, %v1537_v58, %v1539_v37  ;;  %v1551_v37 = vrot.slane %v17808_v9, 2  ;;  %v17809_v58 = vunpack.c.h.bf16 %v14123_v54 }
 0x161   :  { %v14639_v23 = vpack.c.bf16 %v1540_v50, %v1538_v41  ;;  %17803 = vst [vmem:[#allocation34_spill] sm:$0xff] %v14641_v4  ;;  %v1554_v41 = vrot.slane %v17811_v62, 2  ;;  %v1548_v50 = vsel %vm1410_vm3, %v1546_v1, %v1547_v36  ;;  %v17816_v62 = vunpack.c.l.bf16 %v14168_v28 }
 0x162   :  { %v1552_v30 = vrot.slane %v17809_v58, 2  ;;  %v17815_v58 = vunpack.c.h.bf16 %v14157_v46  ;;  %v17817_v1 = vunpack.c.l.bf16 %v14173_v12 }
 0x163   :  { %11124 = vmatmul.mubr.msk.bf16.gmra.mrb[44].mxu0 %vm632_vm2, %v14615_v14 }
 0x164   :  { %11127 = vmatprep.mubr.msk.bf16.mxu0 %vm632_vm2, %v14617_v2  ;;  %v17807_v2 = vunpack.c.l.bf16 %v17806_v24  ;;  %v1555_v61 = vsel %vm1410_vm3, %v1552_v30, %v1554_v41  ;;  %v17814_v24 = vunpack.c.l.bf16 %v14157_v46  ;;  %v1557_v0 = vrot.slane %v17815_v58, 2 }
 0x166   :  { %v1549_v14 = vrot.slane %v17807_v2, 2  ;;  %v1553_v2 = vsel %vm1410_vm3, %v1551_v37, %v1552_v30  ;;  %v1556_v9 = vrot.slane %v17814_v24, 2  ;;  %v17819_v30 = vld [vmem:[#allocation46_spill] sm:$0xff] }
 0x167   :  { %v14665_v5 = vpack.c.bf16 %v1555_v61, %v1553_v2  ;;  %v17820_v41 = vunpack.c.l.bf16 %v17819_v30 }
 0x168   :  { %v1550_v21 = vsel %vm1410_vm3, %v1547_v36, %v1549_v14  ;;  %v1561_v14 = vrot.slane %v17817_v1, 2  ;;  %v17818_v36 = vunpack.c.h.bf16 %v14173_v12 }
 0x169   :  { %v14663_v63 = vpack.c.bf16 %v1550_v21, %v1548_v50  ;;  %17813 = vst [vmem:[#allocation38_spill] sm:$0xff] %v14665_v5  ;;  %v1564_v50 = vrot.slane %v17820_v41, 2  ;;  %v1558_v21 = vsel %vm1410_vm3, %v1556_v9, %v1557_v0  ;;  %v17823_v41 = vunpack.c.l.bf16 %v14218_v45 }
 0x16a   :  { %v1562_v37 = vrot.slane %v17818_v36, 2  ;;  %v17822_v36 = vunpack.c.h.bf16 %v14213_v33  ;;  %v2518_v45 = vsel %vm729_vm0, %v14366_v19, 0  ;;  %v17824_v19 = vld [vmem:[#allocation5_spill] sm:$0xff] }
 0x16b   :  { %11128 = vmatmul.mubr.msk.bf16.gmra.mrb[48].mxu0 %vm632_vm2, %v14639_v23  ;;  %17812 = vst [vmem:[#allocation35_spill] sm:$0xff] %v14663_v63 }
 0x16c   :  { %11131 = vmatprep.mubr.msk.bf16.mxu0 %vm632_vm2, %v14641_v4  ;;  %v1559_v4 = vrot.slane %v17816_v62, 2  ;;  %v1563_v2 = vsel %vm1410_vm3, %v1561_v14, %v1562_v37  ;;  %v1565_v61 = vsel %vm1410_vm3, %v1562_v37, %v1564_v50  ;;  %v17821_v62 = vunpack.c.l.bf16 %v14213_v33  ;;  %v9834_v14 = vld [vmem:[%s17265_s2 + $0xa] sm:$0x3]  ;;  %v14793_v37 = vld [vmem:[%s17265_s2 + $0xc] sm:$0x3]  ;;  %v17825_v50 = vld [vmem:[#allocation6_spill] sm:$0xff] }
 0x16d   :  { %v14689_v58 = vpack.c.bf16 %v1565_v61, %v1563_v2  ;;  %v1567_v30 = vrot.slane %v17822_v36, 2  ;;  %v17828_v2 = vld [vmem:[#allocation9_spill] sm:$0xff]  ;;  %v17829_v61 = vld [vmem:[#allocation10_spill] sm:$0xff] }
 0x16e   :  { %v1560_v28 = vsel %vm1410_vm3, %v1557_v0, %v1559_v4  ;;  %v1566_v1 = vrot.slane %v17821_v62, 2  ;;  %v17830_v62 = vld [vmem:[#allocation11_spill] sm:$0xff]  ;;  %v17832_v36 = vld [vmem:[#allocation13_spill] sm:$0xff] }
 0x16f   :  { %v14687_v24 = vpack.c.bf16 %v1560_v28, %v1558_v21  ;;  %v17826_v21 = vld [vmem:[#allocation7_spill] sm:$0xff]  ;;  %v17827_v28 = vld [vmem:[#allocation8_spill] sm:$0xff] }
 0x170   :  { %v1568_v4 = vsel %vm1410_vm3, %v1566_v1, %v1567_v30  ;;  %v17831_v1 = vld [vmem:[#allocation12_spill] sm:$0xff] }
 0x173   :  { %11132 = vmatmul.mubr.msk.bf16.gmra.mrb[52].mxu0 %vm632_vm2, %v14663_v63 }
 0x174   :  { %11135 = vmatprep.mubr.msk.bf16.mxu0 %vm632_vm2, %v14665_v5  ;;  %v1569_v5 = vrot.slane %v17823_v41, 2  ;;  %v17834_v41 = vld [vmem:[#allocation17_spill] sm:$0xff] }
 0x176   :  { %v1570_v9 = vsel %vm1410_vm3, %v1567_v30, %v1569_v5  ;;  %v2898_v5 = vsel %vm729_vm0, %v9834_v14, 0  ;;  %v17833_v30 = vld [vmem:[#allocation14_spill] sm:$0xff] }
 0x177   :  { %v14703_v0 = vpack.c.bf16 %v1570_v9, %v1568_v4  ;;  %v75_v4 = vld [vmem:[%s17263_s0 + $0xc8] sm:$0x1] }
 0x17b   :  { %11136 = vmatmul.mubr.msk.bf16.gmra.mrb[56].mxu0 %vm632_vm2, %v14687_v24 }
 0x17c   :  { %11139 = vmatprep.mubr.msk.bf16.mxu0 %vm632_vm2, %v14689_v58 }
 0x183   :  { %11140 = vmatmul.mubr.msk.bf16.gmra.mrb[60].mxu0 %vm632_vm2, %v14703_v0 }
 0x184   :  { %11145 = vmatprep.mubr.msk.bf16.mxu0 %vm632_vm2, %v13464_v8  ;;  %v14746_v8 = vld [vmem:[%s17263_s0 + $0xc0] sm:$0xff]  }
 0x185   :  { %v181_v9 = vunpack.c.l.bf16 %v14746_v8 }
 0x18b   :  { %11146 = vmatmul.mubr.msk.bf16.vlgmr.msra.gmra.mrb[0].mxu0 %vm632_vm2, %v13484_v16 }
 0x18c   :  { %11210 = vmatpush3.bf16.msra.mxu0 %v2518_v45  ;;  %11149 = vmatprep.mubr.msk.bf16.mxu0 %vm632_vm2, %v13500_v22  ;;  %v17835_v45 = vld [vmem:[#allocation18_spill] sm:$0xff] }
 0x18d   :  { %13202 = vmatprep.subr.msk.bf16.mxu0 %vm729_vm0, %v9834_v14  ;;  %v182_v14 = vunpack.c.h.bf16 %v14746_v8 }
 0x193   :  { %11150 = vmatmul.mubr.msk.bf16.gmra.mrb[4].mxu0 %vm632_vm2, %v13515_v29 }
 0x194   :  { %11153 = vmatprep.mubr.msk.bf16.mxu0 %vm632_vm2, %v13536_v39 }
 0x19b   :  { %11154 = vmatmul.mubr.msk.bf16.gmra.mrb[8].mxu0 %vm632_vm2, %v13566_v53 }
 0x19c   :  { %11157 = vmatprep.mubr.msk.bf16.mxu0 %vm632_vm2, %v13601_v18 }
 0x1a3   :  { %11158 = vmatmul.mubr.msk.bf16.gmra.mrb[12].mxu0 %vm632_vm2, %v13617_v26 }
 0x1a4   :  { %11161 = vmatprep.mubr.msk.bf16.mxu0 %vm632_vm2, %v13647_v60 }
 0x1ab   :  { %11162 = vmatmul.mubr.msk.bf16.gmra.mrb[16].mxu0 %vm632_vm2, %v13665_v20 }
 0x1ac   :  { %11165 = vmatprep.mubr.msk.bf16.mxu0 %vm632_vm2, %v13700_v3 }
 0x1b3   :  { %11166 = vmatmul.mubr.msk.bf16.gmra.mrb[20].mxu0 %vm632_vm2, %v13716_v27 }
 0x1b4   :  { %11169 = vmatprep.mubr.msk.bf16.mxu0 %vm632_vm2, %v13760_v49 }
 0x1bb   :  { %11170 = vmatmul.mubr.msk.bf16.gmra.mrb[24].mxu0 %vm632_vm2, %v13776_v40 }
 0x1bc   :  { %11173 = vmatprep.mubr.msk.bf16.mxu0 %vm632_vm2, %v13810_v17 }
 0x1c3   :  { %11174 = vmatmul.mubr.msk.bf16.gmra.mrb[28].mxu0 %vm632_vm2, %v14746_v8 }
 0x1c4   :  { %11177 = vmatprep.mubr.msk.bf16.mxu0 %vm632_vm2, %v13860_v7  ;;  %v14783_v7 = vld [vmem:[%s17263_s0 + $0x198] sm:$0xff]  }
 0x1cb   :  { %11178 = vmatmul.mubr.msk.bf16.gmra.mrb[32].mxu0 %vm632_vm2, %v13876_v52 }
 0x1cc   :  { %11181 = vmatprep.mubr.msk.bf16.mxu0 %vm632_vm2, %v13908_v31 }
 0x1d3   :  { %11182 = vmatmul.mubr.msk.bf16.gmra.mrb[36].mxu0 %vm632_vm2, %v13924_v43 }
 0x1d4   :  { %11185 = vmatprep.mubr.msk.bf16.mxu0 %vm632_vm2, %v13957_v11 }
 0x1db   :  { %11186 = vmatmul.mubr.msk.bf16.gmra.mrb[40].mxu0 %vm632_vm2, %v13973_v13 }
 0x1dc   :  { %11189 = vmatprep.mubr.msk.bf16.mxu0 %vm632_vm2, %v14007_v15 }
 0x1e3   :  { %11190 = vmatmul.mubr.msk.bf16.gmra.mrb[44].mxu0 %vm632_vm2, %v14023_v59 }
 0x1e4   :  { %11193 = vmatprep.mubr.msk.bf16.mxu0 %vm632_vm2, %v14057_v6 }
 0x1eb   :  { %11194 = vmatmul.mubr.msk.bf16.gmra.mrb[48].mxu0 %vm632_vm2, %v14073_v51 }
 0x1ec   :  { %11197 = vmatprep.mubr.msk.bf16.mxu0 %vm632_vm2, %v14107_v47 }
 0x1f3   :  { %11198 = vmatmul.mubr.msk.bf16.gmra.mrb[52].mxu0 %vm632_vm2, %v14123_v54 }
 0x1f4   :  { %11201 = vmatprep.mubr.msk.bf16.mxu0 %vm632_vm2, %v14157_v46 }
 0x1fb   :  { %11202 = vmatmul.mubr.msk.bf16.gmra.mrb[56].mxu0 %vm632_vm2, %v14173_v12 }
 0x1fc   :  { %11205 = vmatprep.mubr.msk.bf16.mxu0 %vm632_vm2, %v14213_v33 }
 0x203   :  { %11206 = vmatmul.mubr.msk.bf16.gmra.mrb[60].mxu0 %vm632_vm2, %v14783_v7 }
 0x204   :  { %11211 = vmatprep.mubr.msk.bf16.mxu0 %vm632_vm2, %v17824_v19  ;;  %v17836_v19 = vld [vmem:[#allocation21_spill] sm:$0xff] }
 0x20b   :  { %11212 = vmatmul.mubr.msk.bf16.vlgmr.msra.gmra.mrb[0].mxu0 %vm632_vm2, %v17825_v50 }
 0x20c   :  { %11276 = vmatpush3.bf16.msra.mxu0 %v2898_v5  ;;  %11215 = vmatprep.mubr.msk.bf16.mxu0 %vm632_vm2, %v17826_v21  ;;  %v183_v5 = vunpack.c.l.bf16 %v75_v4 }
 0x20d   :  { %13203 = vmatprep.subr.msk.bf16.mxu0 %vm729_vm0, %v14793_v37 }
 0x20e   :  { %v2876_v50 = vrot.slane %v183_v5, 2 }
 0x213   :  { %11216 = vmatmul.mubr.msk.bf16.gmra.mrb[4].mxu0 %vm632_vm2, %v17827_v28 }
 0x214   :  { %11219 = vmatprep.mubr.msk.bf16.mxu0 %vm632_vm2, %v17828_v2  ;;  %v17838_v2 = vld [vmem:[#allocation25_spill] sm:$0xff] }
 0x21b   :  { %11220 = vmatmul.mubr.msk.bf16.gmra.mrb[8].mxu0 %vm632_vm2, %v17829_v61  ;;  %v17837_v61 = vld [vmem:[#allocation22_spill] sm:$0xff] }
 0x21c   :  { %11223 = vmatprep.mubr.msk.bf16.mxu0 %vm632_vm2, %v17830_v62  ;;  %v2874_v62 = vrot.slane %v182_v14, 2 }
 0x21e   :  { %v2877_v4 = vsel %vm1410_vm3, %v2874_v62, %v2876_v50  ;;  %v17844_v50 = vld [vmem:[#allocation36_spill] sm:$0xff] }
 0x223   :  { %11224 = vmatmul.mubr.msk.bf16.gmra.mrb[12].mxu0 %vm632_vm2, %v17831_v1  ;;  %v2873_v1 = vrot.slane %v181_v9, 2 }
 0x224   :  { %11227 = vmatprep.mubr.msk.bf16.mxu0 %vm632_vm2, %v17832_v36  ;;  %v2493_v36 = vrot.slane %v181_v9, 1 }
 0x225   :  { %v2875_v21 = vsel %vm1410_vm3, %v2873_v1, %v2874_v62  ;;  %v17843_v1 = vld [vmem:[#allocation33_spill] sm:$0xff] }
 0x226   :  { %v14836_v9 = vpack.c.bf16 %v2877_v4, %v2875_v21  ;;  %v17845_v21 = vld [vmem:[#allocation37_spill] sm:$0xff]  ;;  %v235_v4 = vunpack.c.l.bf16 %v14783_v7 }
 0x227   :  { %v17847_v62 = vld [vmem:[#allocation41_spill] sm:$0xff] }
 0x22b   :  { %11228 = vmatmul.mubr.msk.bf16.gmra.mrb[16].mxu0 %vm632_vm2, %v17833_v30  ;;  %v2494_v30 = vrot.slane %v182_v14, 1  ;;  %v17840_v14 = vld [vmem:[#allocation28_spill] sm:$0xff] }
 0x22c   :  { %11231 = vmatprep.mubr.msk.bf16.mxu0 %vm632_vm2, %v17834_v41  ;;  %v2496_v41 = vrot.slane %v183_v5, 1  ;;  %v129_v5 = vld [vmem:[%s17263_s0 + $0x1a0] sm:$0x1] }
 0x22d   :  { %v2495_v28 = vsel %vm373_vm1, %v2493_v36, %v2494_v30  ;;  %v17842_v36 = vld [vmem:[#allocation32_spill] sm:$0xff] }
 0x233   :  { %11232 = vmatmul.mubr.msk.bf16.gmra.mrb[20].mxu0 %vm632_vm2, %v17835_v45  ;;  %v2497_v45 = vsel %vm373_vm1, %v2494_v30, %v2496_v41  ;;  %v17848_v30 = vld [vmem:[#allocation44_spill] sm:$0xff]  ;;  %v17849_v41 = vld [vmem:[#allocation45_spill] sm:$0xff] }
 0x234   :  { %11235 = vmatprep.mubr.msk.bf16.mxu0 %vm632_vm2, %v17836_v19  ;;  %v14834_v19 = vpack.c.bf16 %v2497_v45, %v2495_v28  ;;  %v17846_v28 = vld [vmem:[#allocation40_spill] sm:$0xff]  ;;  %v17850_v45 = vld [vmem:[#allocation47_spill] sm:$0xff] }
 0x236   :  { %17839 = vst [vmem:[#allocation39_spill] sm:$0xff] %v14834_v19 }
 0x23b   :  { %11236 = vmatmul.mubr.msk.bf16.gmra.mrb[24].mxu0 %vm632_vm2, %v17837_v61 }
 0x23c   :  { %11239 = vmatprep.mubr.msk.bf16.mxu0 %vm632_vm2, %v17838_v2  ;;  %v17841_v2 = vld [vmem:[#allocation29_spill] sm:$0xff] }
 0x243   :  { %11240 = vmatmul.mubr.msk.bf16.gmra.mrb[28].mxu0 %vm632_vm2, %v14834_v19 }
 0x244   :  { %11243 = vmatprep.mubr.msk.bf16.mxu0 %vm632_vm2, %v17840_v14  ;;  %v17851_v14 = vld [vmem:[#allocation48_spill] sm:$0xff] }
 0x24b   :  { %11244 = vmatmul.mubr.msk.bf16.gmra.mrb[32].mxu0 %vm632_vm2, %v17841_v2 }
 0x24c   :  { %11247 = vmatprep.mubr.msk.bf16.mxu0 %vm632_vm2, %v17842_v36  ;;  %v17853_v36 = vld [vmem:[#allocation50_spill] sm:$0xff] }
 0x253   :  { %11248 = vmatmul.mubr.msk.bf16.gmra.mrb[36].mxu0 %vm632_vm2, %v17843_v1 }
 0x254   :  { %11251 = vmatprep.mubr.msk.bf16.mxu0 %vm632_vm2, %v17844_v50  ;;  %v2878_v50 = vrot.slane %v235_v4, 2 }
 0x25b   :  { %11252 = vmatmul.mubr.msk.bf16.gmra.mrb[40].mxu0 %vm632_vm2, %v17845_v21  ;;  %v2498_v21 = vrot.slane %v235_v4, 1 }
 0x25c   :  { %11255 = vmatprep.mubr.msk.bf16.mxu0 %vm632_vm2, %v17846_v28  ;;  %v17852_v28 = vld [vmem:[#allocation49_spill] sm:$0xff] }
 0x263   :  { %11256 = vmatmul.mubr.msk.bf16.gmra.mrb[44].mxu0 %vm632_vm2, %v17847_v62  ;;  %v236_v62 = vunpack.c.h.bf16 %v14783_v7 }
 0x264   :  { %11259 = vmatprep.mubr.msk.bf16.mxu0 %vm632_vm2, %v17848_v30  ;;  %v237_v30 = vunpack.c.l.bf16 %v129_v5 }
 0x265   :  { %v2879_v1 = vrot.slane %v236_v62, 2 }
 0x266   :  { %v2881_v61 = vrot.slane %v237_v30, 2 }
 0x267   :  { %v2880_v19 = vsel %vm1410_vm3, %v2878_v50, %v2879_v1  ;;  %v9902_v50 = vld [vmem:[%s17265_s2 + $0xe] sm:$0x3] }
 0x268   :  { %v2882_v5 = vsel %vm1410_vm3, %v2879_v1, %v2881_v61  ;;  %v17857_v61 = vld [vmem:[#allocation16_spill] sm:$0xff] }
 0x269   :  { %v14881_v4 = vpack.c.bf16 %v2882_v5, %v2880_v19  ;;  %v17858_v19 = vld [vmem:[#allocation19_spill] sm:$0xff]  ;;  %v17859_v1 = vld [vmem:[#allocation20_spill] sm:$0xff] }
 0x26a   :  { %v17865_v5 = vld [vmem:[#allocation31_spill] sm:$0xff] }
 0x26b   :  { %11260 = vmatmul.mubr.msk.bf16.gmra.mrb[48].mxu0 %vm632_vm2, %v17849_v41  ;;  %v2499_v41 = vrot.slane %v236_v62, 1  ;;  %v17860_v62 = vld [vmem:[#allocation23_spill] sm:$0xff] }
 0x26c   :  { %11263 = vmatprep.mubr.msk.bf16.mxu0 %vm632_vm2, %v17850_v45  ;;  %v2501_v45 = vrot.slane %v237_v30, 1  ;;  %v17861_v30 = vld [vmem:[#allocation24_spill] sm:$0xff] }
 0x26d   :  { %v2500_v2 = vsel %vm373_vm1, %v2498_v21, %v2499_v41  ;;  %v3264_v21 = vsel %vm729_vm0, %v14793_v37, 0  ;;  %v17855_v37 = vld [vmem:[#allocation52_spill] sm:$0xff] }
 0x273   :  { %11264 = vmatmul.mubr.msk.bf16.gmra.mrb[52].mxu0 %vm632_vm2, %v17851_v14  ;;  %v2502_v14 = vsel %vm373_vm1, %v2499_v41, %v2501_v45  ;;  %v17862_v41 = vld [vmem:[#allocation26_spill] sm:$0xff]  ;;  %v17863_v45 = vld [vmem:[#allocation27_spill] sm:$0xff] }
 0x274   :  { %11267 = vmatprep.mubr.msk.bf16.mxu0 %vm632_vm2, %v17852_v28  ;;  %v14879_v28 = vpack.c.bf16 %v2502_v14, %v2500_v2  ;;  %v17856_v2 = vld [vmem:[#allocation15_spill] sm:$0xff]  ;;  %v17864_v14 = vld [vmem:[#allocation30_spill] sm:$0xff] }
 0x27b   :  { %11268 = vmatmul.mubr.msk.bf16.gmra.mrb[56].mxu0 %vm632_vm2, %v17853_v36 }
 0x27c   :  { %11271 = vmatprep.mubr.msk.bf16.mxu0 %vm632_vm2, %v14253_v57 }
 0x283   :  { %11272 = vmatmul.mubr.msk.bf16.gmra.mrb[60].mxu0 %vm632_vm2, %v14879_v28 }
 0x284   :  { %11277 = vmatprep.mubr.msk.bf16.mxu0 %vm632_vm2, %v14269_v35  ;;  %v17854_v35 = vld [vmem:[#allocation51_spill] sm:$0xff] }
 0x28b   :  { %11278 = vmatmul.mubr.msk.bf16.vlgmr.msra.gmra.mrb[0].mxu0 %vm632_vm2, %v14348_v38 }
 0x28c   :  { %11342 = vmatpush3.bf16.msra.mxu0 %v3264_v21  ;;  %11281 = vmatprep.mubr.msk.bf16.mxu0 %vm632_vm2, %v14378_v32  ;;  %v17866_v21 = vld [vmem:[#allocation34_spill] sm:$0xff] }
 0x28d   :  { %13204 = vmatprep.subr.msk.bf16.mxu0 %vm729_vm0, %v9902_v50 }
 0x293   :  { %11282 = vmatmul.mubr.msk.bf16.gmra.mrb[4].mxu0 %vm632_vm2, %v14380_v44 }
 0x294   :  { %11285 = vmatprep.mubr.msk.bf16.mxu0 %vm632_vm2, %v14402_v10 }
 0x29b   :  { %11286 = vmatmul.mubr.msk.bf16.gmra.mrb[8].mxu0 %vm632_vm2, %v14404_v34 }
 0x29c   :  { %11289 = vmatprep.mubr.msk.bf16.mxu0 %vm632_vm2, %v14426_v25 }
 0x2a3   :  { %11290 = vmatmul.mubr.msk.bf16.gmra.mrb[12].mxu0 %vm632_vm2, %v14428_v42 }
 0x2a4   :  { %11293 = vmatprep.mubr.msk.bf16.mxu0 %vm632_vm2, %v14450_v55 }
 0x2ab   :  { %11294 = vmatmul.mubr.msk.bf16.gmra.mrb[16].mxu0 %vm632_vm2, %v14452_v48 }
 0x2ac   :  { %11297 = vmatprep.mubr.msk.bf16.mxu0 %vm632_vm2, %v17854_v35 }
 0x2b3   :  { %11298 = vmatmul.mubr.msk.bf16.gmra.mrb[20].mxu0 %vm632_vm2, %v17855_v37 }
 0x2b4   :  { %11301 = vmatprep.mubr.msk.bf16.mxu0 %vm632_vm2, %v17856_v2 }
 0x2bb   :  { %11302 = vmatmul.mubr.msk.bf16.gmra.mrb[24].mxu0 %vm632_vm2, %v17857_v61 }
 0x2bc   :  { %11305 = vmatprep.mubr.msk.bf16.mxu0 %vm632_vm2, %v14522_v56 }
 0x2c3   :  { %11306 = vmatmul.mubr.msk.bf16.gmra.mrb[28].mxu0 %vm632_vm2, %v14836_v9 }
 0x2c4   :  { %11309 = vmatprep.mubr.msk.bf16.mxu0 %vm632_vm2, %v17858_v19  ;;  %v17867_v19 = vld [vmem:[#allocation38_spill] sm:$0xff] }
 0x2cb   :  { %11310 = vmatmul.mubr.msk.bf16.gmra.mrb[32].mxu0 %vm632_vm2, %v17859_v1 }
 0x2cc   :  { %11313 = vmatprep.mubr.msk.bf16.mxu0 %vm632_vm2, %v17860_v62 }
 0x2d3   :  { %11314 = vmatmul.mubr.msk.bf16.gmra.mrb[36].mxu0 %vm632_vm2, %v17861_v30 }
 0x2d4   :  { %11317 = vmatprep.mubr.msk.bf16.mxu0 %vm632_vm2, %v17862_v41 }
 0x2db   :  { %11318 = vmatmul.mubr.msk.bf16.gmra.mrb[40].mxu0 %vm632_vm2, %v17863_v45 }
 0x2dc   :  { %11321 = vmatprep.mubr.msk.bf16.mxu0 %vm632_vm2, %v17864_v14 }
 0x2e3   :  { %11322 = vmatmul.mubr.msk.bf16.gmra.mrb[44].mxu0 %vm632_vm2, %v17865_v5 }
 0x2e4   :  { %11325 = vmatprep.mubr.msk.bf16.mxu0 %vm632_vm2, %v14639_v23 }
 0x2eb   :  { %11326 = vmatmul.mubr.msk.bf16.gmra.mrb[48].mxu0 %vm632_vm2, %v17866_v21 }
 0x2ec   :  { %11329 = vmatprep.mubr.msk.bf16.mxu0 %vm632_vm2, %v14663_v63  ;;  %v3650_v63 = vsel %vm729_vm0, %v9902_v50, 0 }
 0x2f3   :  { %11330 = vmatmul.mubr.msk.bf16.gmra.mrb[52].mxu0 %vm632_vm2, %v17867_v19  ;;  %v9935_v19 = vld [vmem:[%s17265_s2 + $0x10] sm:$0x3] }
 0x2f4   :  { %11333 = vmatprep.mubr.msk.bf16.mxu0 %vm632_vm2, %v14687_v24 }
 0x2fb   :  { %11334 = vmatmul.mubr.msk.bf16.gmra.mrb[56].mxu0 %vm632_vm2, %v14689_v58 }
 0x2fc   :  { %11337 = vmatprep.mubr.msk.bf16.mxu0 %vm632_vm2, %v14703_v0 }
 0x303   :  { %11338 = vmatmul.mubr.msk.bf16.gmra.mrb[60].mxu0 %vm632_vm2, %v14881_v4 }
 0x304   :  { %11343 = vmatprep.mubr.msk.bf16.mxu0 %vm632_vm2, %v13484_v16  ;;  %v76_v16 = vld [vmem:[%s17263_s0 + $0xcc] sm:$0xff]  }
 0x30b   :  { %11344 = vmatmul.mubr.msk.bf16.vlgmr.msra.gmra.mrb[0].mxu0 %vm632_vm2, %v13500_v22  ;;  %v130_v22 = vld [vmem:[%s17263_s0 + $0x1a4] sm:$0xff]  }
 0x30c   :  { %11408 = vmatpush3.bf16.msra.mxu0 %v3650_v63  ;;  %11347 = vmatprep.mubr.msk.bf16.mxu0 %vm632_vm2, %v13515_v29  ;;  %v17868_v29 = vld [vmem:[#allocation6_spill] sm:$0xff] }
 0x30d   :  { %13205 = vmatprep.subr.msk.bf16.mxu0 %vm729_vm0, %v9935_v19 }
 0x313   :  { %11348 = vmatmul.mubr.msk.bf16.gmra.mrb[4].mxu0 %vm632_vm2, %v13536_v39  ;;  %v4030_v39 = vsel %vm729_vm0, %v9935_v19, 0 }
 0x314   :  { %11351 = vmatprep.mubr.msk.bf16.mxu0 %vm632_vm2, %v13566_v53  ;;  %v17869_v53 = vld [vmem:[#allocation7_spill] sm:$0xff] }
 0x31b   :  { %11352 = vmatmul.mubr.msk.bf16.gmra.mrb[8].mxu0 %vm632_vm2, %v13601_v18  ;;  %v17871_v18 = vld [vmem:[#allocation9_spill] sm:$0xff] }
 0x31c   :  { %11355 = vmatprep.mubr.msk.bf16.mxu0 %vm632_vm2, %v13617_v26  ;;  %v17872_v26 = vld [vmem:[#allocation10_spill] sm:$0xff] }
 0x323   :  { %11356 = vmatmul.mubr.msk.bf16.gmra.mrb[12].mxu0 %vm632_vm2, %v13647_v60  ;;  %v17873_v60 = vld [vmem:[#allocation11_spill] sm:$0xff] }
 0x324   :  { %11359 = vmatprep.mubr.msk.bf16.mxu0 %vm632_vm2, %v13665_v20  ;;  %v17874_v20 = vld [vmem:[#allocation12_spill] sm:$0xff] }
 0x32b   :  { %11360 = vmatmul.mubr.msk.bf16.gmra.mrb[16].mxu0 %vm632_vm2, %v13700_v3  ;;  %v17870_v3 = vld [vmem:[#allocation8_spill] sm:$0xff] }
 0x32c   :  { %11363 = vmatprep.mubr.msk.bf16.mxu0 %vm632_vm2, %v13716_v27  ;;  %v17875_v27 = vld [vmem:[#allocation13_spill] sm:$0xff] }
 0x333   :  { %11364 = vmatmul.mubr.msk.bf16.gmra.mrb[20].mxu0 %vm632_vm2, %v13760_v49  ;;  %v17876_v49 = vld [vmem:[#allocation14_spill] sm:$0xff] }
 0x334   :  { %11367 = vmatprep.mubr.msk.bf16.mxu0 %vm632_vm2, %v13776_v40  ;;  %v17877_v40 = vld [vmem:[#allocation17_spill] sm:$0xff] }
 0x33b   :  { %11368 = vmatmul.mubr.msk.bf16.gmra.mrb[24].mxu0 %vm632_vm2, %v13810_v17  ;;  %v17878_v17 = vld [vmem:[#allocation18_spill] sm:$0xff] }
 0x33c   :  { %11371 = vmatprep.mubr.msk.bf16.mxu0 %vm632_vm2, %v14746_v8 }
 0x343   :  { %11372 = vmatmul.mubr.msk.bf16.gmra.mrb[28].mxu0 %vm632_vm2, %v76_v16 }
 0x344   :  { %11375 = vmatprep.mubr.msk.bf16.mxu0 %vm632_vm2, %v13876_v52  ;;  %v78_v52 = vld [vmem:[%s17263_s0 + $0xd4] sm:$0x1] }
 0x34b   :  { %11376 = vmatmul.mubr.msk.bf16.gmra.mrb[32].mxu0 %vm632_vm2, %v13908_v31  ;;  %v184_v31 = vunpack.c.l.bf16 %v76_v16 }
 0x34c   :  { %11379 = vmatprep.mubr.msk.bf16.mxu0 %vm632_vm2, %v13924_v43  ;;  %v17879_v43 = vld [vmem:[#allocation21_spill] sm:$0xff] }
 0x353   :  { %11380 = vmatmul.mubr.msk.bf16.gmra.mrb[36].mxu0 %vm632_vm2, %v13957_v11  ;;  %v185_v11 = vunpack.c.h.bf16 %v76_v16 }
 0x354   :  { %11383 = vmatprep.mubr.msk.bf16.mxu0 %vm632_vm2, %v13973_v13  ;;  %v17880_v13 = vld [vmem:[#allocation22_spill] sm:$0xff] }
 0x35b   :  { %11384 = vmatmul.mubr.msk.bf16.gmra.mrb[40].mxu0 %vm632_vm2, %v14007_v15  ;;  %v186_v15 = vunpack.c.l.bf16 %v78_v52  ;;  %v238_v52 = vunpack.c.l.bf16 %v130_v22 }
 0x35c   :  { %11387 = vmatprep.mubr.msk.bf16.mxu0 %vm632_vm2, %v14023_v59  ;;  %v3625_v59 = vrot.slane %v184_v31, 1 }
 0x363   :  { %11388 = vmatmul.mubr.msk.bf16.gmra.mrb[44].mxu0 %vm632_vm2, %v14057_v6  ;;  %v3626_v6 = vrot.slane %v185_v11, 1 }
 0x364   :  { %11391 = vmatprep.mubr.msk.bf16.mxu0 %vm632_vm2, %v14073_v51  ;;  %v4005_v51 = vrot.slane %v184_v31, 2  ;;  %v17894_v31 = vld [vmem:[#allocation49_spill] sm:$0xff] }
 0x36b   :  { %11392 = vmatmul.mubr.msk.bf16.gmra.mrb[48].mxu0 %vm632_vm2, %v14107_v47  ;;  %v4006_v47 = vrot.slane %v185_v11, 2 }
 0x36c   :  { %11395 = vmatprep.mubr.msk.bf16.mxu0 %vm632_vm2, %v14123_v54  ;;  %v3628_v54 = vrot.slane %v186_v15, 1 }
 0x36d   :  { %v4007_v8 = vsel %vm1410_vm3, %v4005_v51, %v4006_v47 }
 0x36e   :  { %v3629_v63 = vsel %vm373_vm1, %v3626_v6, %v3628_v54 }
 0x373   :  { %11396 = vmatmul.mubr.msk.bf16.gmra.mrb[52].mxu0 %vm632_vm2, %v14157_v46  ;;  %v17881_v46 = vld [vmem:[#allocation25_spill] sm:$0xff] }
 0x374   :  { %11399 = vmatprep.mubr.msk.bf16.mxu0 %vm632_vm2, %v14173_v12  ;;  %v17882_v12 = vld [vmem:[#allocation39_spill] sm:$0xff] }
 0x37b   :  { %11400 = vmatmul.mubr.msk.bf16.gmra.mrb[56].mxu0 %vm632_vm2, %v14213_v33  ;;  %v3627_v33 = vsel %vm373_vm1, %v3625_v59, %v3626_v6  ;;  %v4010_v59 = vrot.slane %v238_v52, 2 }
 0x37c   :  { %11403 = vmatprep.mubr.msk.bf16.mxu0 %vm632_vm2, %v14783_v7  ;;  %v4008_v7 = vrot.slane %v186_v15, 2  ;;  %v3639_v19 = vpack.c.bf16 %v3629_v63, %v3627_v33 }
 0x37e   :  { %v4009_v50 = vsel %vm1410_vm3, %v4006_v47, %v4008_v7 }
 0x37f   :  { %v4019_v16 = vpack.c.bf16 %v4009_v50, %v4007_v8 }
 0x383   :  { %11404 = vmatmul.mubr.msk.bf16.gmra.mrb[60].mxu0 %vm632_vm2, %v130_v22 }
 0x384   :  { %11409 = vmatprep.mubr.msk.bf16.mxu0 %vm632_vm2, %v17868_v29  ;;  %v17883_v29 = vld [vmem:[#allocation29_spill] sm:$0xff] }
 0x38b   :  { %11410 = vmatmul.mubr.msk.bf16.vlgmr.msra.gmra.mrb[0].mxu0 %vm632_vm2, %v17869_v53  ;;  %v17885_v53 = vld [vmem:[#allocation33_spill] sm:$0xff] }
 0x38c   :  { %11474 = vmatpush3.bf16.msra.mxu0 %v4030_v39  ;;  %11413 = vmatprep.mubr.msk.bf16.mxu0 %vm632_vm2, %v17870_v3  ;;  %v17884_v39 = vld [vmem:[#allocation32_spill] sm:$0xff] }
 0x38d   :  { %v17886_v3 = vld [vmem:[#allocation36_spill] sm:$0xff] }
 0x393   :  { %11414 = vmatmul.mubr.msk.bf16.gmra.mrb[4].mxu0 %vm632_vm2, %v17871_v18  ;;  %v17887_v18 = vld [vmem:[#allocation37_spill] sm:$0xff] }
 0x394   :  { %11417 = vmatprep.mubr.msk.bf16.mxu0 %vm632_vm2, %v17872_v26  ;;  %v17888_v26 = vld [vmem:[#allocation40_spill] sm:$0xff] }
 0x39b   :  { %11418 = vmatmul.mubr.msk.bf16.gmra.mrb[8].mxu0 %vm632_vm2, %v17873_v60  ;;  %v17889_v60 = vld [vmem:[#allocation41_spill] sm:$0xff] }
 0x39c   :  { %11421 = vmatprep.mubr.msk.bf16.mxu0 %vm632_vm2, %v17874_v20  ;;  %v17890_v20 = vld [vmem:[#allocation44_spill] sm:$0xff] }
 0x3a3   :  { %11422 = vmatmul.mubr.msk.bf16.gmra.mrb[12].mxu0 %vm632_vm2, %v17875_v27  ;;  %v17891_v27 = vld [vmem:[#allocation45_spill] sm:$0xff] }
 0x3a4   :  { %11425 = vmatprep.mubr.msk.bf16.mxu0 %vm632_vm2, %v17876_v49  ;;  %v17892_v49 = vld [vmem:[#allocation47_spill] sm:$0xff] }
 0x3ab   :  { %11426 = vmatmul.mubr.msk.bf16.gmra.mrb[16].mxu0 %vm632_vm2, %v17877_v40  ;;  %v17893_v40 = vld [vmem:[#allocation48_spill] sm:$0xff] }
 0x3ac   :  { %11429 = vmatprep.mubr.msk.bf16.mxu0 %vm632_vm2, %v17878_v17  ;;  %v132_v17 = vld [vmem:[%s17263_s0 + $0x1ac] sm:$0x1] }
 0x3ad   :  { %v240_v11 = vunpack.c.l.bf16 %v132_v17 }
 0x3af   :  { %v3633_v51 = vrot.slane %v240_v11, 1 }
 0x3b3   :  { %11430 = vmatmul.mubr.msk.bf16.gmra.mrb[20].mxu0 %vm632_vm2, %v17879_v43  ;;  %v239_v43 = vunpack.c.h.bf16 %v130_v22 }
 0x3b4   :  { %11433 = vmatprep.mubr.msk.bf16.mxu0 %vm632_vm2, %v17880_v13  ;;  %v3630_v13 = vrot.slane %v238_v52, 1 }
 0x3b5   :  { %v3631_v15 = vrot.slane %v239_v43, 1  ;;  %v4011_v6 = vrot.slane %v239_v43, 2 }
 0x3b7   :  { %v3632_v47 = vsel %vm373_vm1, %v3630_v13, %v3631_v15  ;;  %v3634_v54 = vsel %vm373_vm1, %v3631_v15, %v3633_v51  ;;  %v4012_v22 = vsel %vm1410_vm3, %v4010_v59, %v4011_v6 }
 0x3bb   :  { %11434 = vmatmul.mubr.msk.bf16.gmra.mrb[24].mxu0 %vm632_vm2, %v17881_v46  ;;  %v4013_v46 = vrot.slane %v240_v11, 2 }
 0x3bc   :  { %11437 = vmatprep.mubr.msk.bf16.mxu0 %vm632_vm2, %v17882_v12  ;;  %v3640_v12 = vpack.c.bf16 %v3634_v54, %v3632_v47 }
 0x3c3   :  { %11438 = vmatmul.mubr.msk.bf16.gmra.mrb[28].mxu0 %vm632_vm2, %v3639_v19 }
 0x3c4   :  { %11441 = vmatprep.mubr.msk.bf16.mxu0 %vm632_vm2, %v17883_v29 }
 0x3cb   :  { %11442 = vmatmul.mubr.msk.bf16.gmra.mrb[32].mxu0 %vm632_vm2, %v17884_v39 }
 0x3cc   :  { %11445 = vmatprep.mubr.msk.bf16.mxu0 %vm632_vm2, %v17885_v53 }
 0x3d3   :  { %11446 = vmatmul.mubr.msk.bf16.gmra.mrb[36].mxu0 %vm632_vm2, %v17886_v3  ;;  %v17447_v3 = vmov 0.0  }
 0x3d4   :  { %11449 = vmatprep.mubr.msk.bf16.mxu0 %vm632_vm2, %v17887_v18  ;;  %11539 = vmatprep.subr.bf16.mxu1 %v17447_v3 }
 0x3d5   :  { %11543 = vmatprep.mubr.msk.bf16.mxu1 %vm13403_vm5, %v17447_v3  ;;  %12153 = vmatprep.subr.bf16.mxu0 %v17447_v3 }
 0x3db   :  { %11450 = vmatmul.mubr.msk.bf16.gmra.mrb[40].mxu0 %vm632_vm2, %v17888_v26 }
 0x3dc   :  { %11453 = vmatprep.mubr.msk.bf16.mxu0 %vm632_vm2, %v17889_v60  ;;  %v13255_v60 = vld [vmem:[%s17266_s3 + $0x8] sm:$0xff]  }
 0x3e3   :  { %11454 = vmatmul.mubr.msk.bf16.gmra.mrb[44].mxu0 %vm632_vm2, %v17890_v20 }
 0x3e4   :  { %11457 = vmatprep.mubr.msk.bf16.mxu0 %vm632_vm2, %v17891_v27 }
 0x3eb   :  { %11458 = vmatmul.mubr.msk.bf16.gmra.mrb[48].mxu0 %vm632_vm2, %v17892_v49 }
 0x3ec   :  { %11461 = vmatprep.mubr.msk.bf16.mxu0 %vm632_vm2, %v17893_v40 }
 0x3f3   :  { %11462 = vmatmul.mubr.msk.bf16.gmra.mrb[52].mxu0 %vm632_vm2, %v17894_v31 }
 0x3f4   :  { %11465 = vmatprep.mubr.msk.bf16.mxu0 %vm632_vm2, %v17853_v36  ;;  %v4014_v36 = vsel %vm1410_vm3, %v4011_v6, %v4013_v46 }
 0x3f5   :  { %v4020_v33 = vpack.c.bf16 %v4014_v36, %v4012_v22 }
 0x3fb   :  { %11466 = vmatmul.mubr.msk.bf16.gmra.mrb[56].mxu0 %vm632_vm2, %v14253_v57  ;;  %v17895_v57 = vld [vmem:[#allocation35_spill] sm:$0xff] }
 0x3fc   :  { %11469 = vmatprep.mubr.msk.bf16.mxu0 %vm632_vm2, %v14879_v28 }
 0x403   :  { %11470 = vmatmul.mubr.msk.bf16.gmra.mrb[60].mxu0 %vm632_vm2, %v3640_v12 }
 0x404   :  { %11475 = vmatprep.mubr.msk.bf16.mxu0 %vm632_vm2, %v14348_v38  ;;  %v17896_v38 = vld [vmem:[#allocation38_spill] sm:$0xff] }
 0x40b   :  { %11476 = vmatmul.mubr.msk.bf16.vlgmr.msra.gmra.mrb[0].mxu0 %vm632_vm2, %v14378_v32  ;;  %v15170_v32 = vld [vmem:[%s17268_s5] ss:$0 sm:$0xff] }
 0x40c   :  { %11479 = vmatprep.mubr.msk.bf16.mxu0 %vm632_vm2, %v14380_v44 }
 0x413   :  { %11480 = vmatmul.mubr.msk.bf16.gmra.mrb[4].mxu0 %vm632_vm2, %v14402_v10 }
 0x414   :  { %11483 = vmatprep.mubr.msk.bf16.mxu0 %vm632_vm2, %v14404_v34 }
 0x41b   :  { %11484 = vmatmul.mubr.msk.bf16.gmra.mrb[8].mxu0 %vm632_vm2, %v14426_v25 }
 0x41c   :  { %11487 = vmatprep.mubr.msk.bf16.mxu0 %vm632_vm2, %v14428_v42 }
 0x423   :  { %11488 = vmatmul.mubr.msk.bf16.gmra.mrb[12].mxu0 %vm632_vm2, %v14450_v55 }
 0x424   :  { %11491 = vmatprep.mubr.msk.bf16.mxu0 %vm632_vm2, %v14452_v48 }
 0x42b   :  { %11492 = vmatmul.mubr.msk.bf16.gmra.mrb[16].mxu0 %vm632_vm2, %v17854_v35 }
 0x42c   :  { %11495 = vmatprep.mubr.msk.bf16.mxu0 %vm632_vm2, %v17855_v37 }
 0x433   :  { %11496 = vmatmul.mubr.msk.bf16.gmra.mrb[20].mxu0 %vm632_vm2, %v17856_v2 }
 0x434   :  { %11499 = vmatprep.mubr.msk.bf16.mxu0 %vm632_vm2, %v17857_v61 }
 0x43b   :  { %11500 = vmatmul.mubr.msk.bf16.gmra.mrb[24].mxu0 %vm632_vm2, %v14522_v56 }
 0x43c   :  { %11503 = vmatprep.mubr.msk.bf16.mxu0 %vm632_vm2, %v14836_v9 }
 0x443   :  { %11504 = vmatmul.mubr.msk.bf16.gmra.mrb[28].mxu0 %vm632_vm2, %v4019_v16  ;;  %v13254_v16 = vld [vmem:[%s17266_s3] sm:$0xff]  }
 0x444   :  { %11507 = vmatprep.mubr.msk.bf16.mxu0 %vm632_vm2, %v17859_v1  ;;  %11540 = vmatpush3.bf16.msra.mxu1 %v13254_v16 }
 0x445   :  { %11541 = vmatprep.subr.bf16.mxu1 %v17447_v3 }
 0x448   :  { %11542 = vmatpush3.bf16.msra.mxu1 %v13255_v60 }
 0x449   :  { %11547 = vmatprep.subr.bf16.mxu1 %v17447_v3 }
 0x44b   :  { %11508 = vmatmul.mubr.msk.bf16.gmra.mrb[32].mxu0 %vm632_vm2, %v17860_v62 }
 0x44c   :  { %11511 = vmatprep.mubr.msk.bf16.mxu0 %vm632_vm2, %v17861_v30 }
 0x453   :  { %11512 = vmatmul.mubr.msk.bf16.gmra.mrb[36].mxu0 %vm632_vm2, %v17862_v41 }
 0x454   :  { %11515 = vmatprep.mubr.msk.bf16.mxu0 %vm632_vm2, %v17863_v45 }
 0x45b   :  { %11516 = vmatmul.mubr.msk.bf16.gmra.mrb[40].mxu0 %vm632_vm2, %v17864_v14 }
 0x45c   :  { %11519 = vmatprep.mubr.msk.bf16.mxu0 %vm632_vm2, %v17865_v5 }
 0x463   :  { %11520 = vmatmul.mubr.msk.bf16.gmra.mrb[44].mxu0 %vm632_vm2, %v14639_v23 }
 0x464   :  { %11523 = vmatprep.mubr.msk.bf16.mxu0 %vm632_vm2, %v17866_v21 }
 0x46b   :  { %11524 = vmatmul.mubr.msk.bf16.gmra.mrb[48].mxu0 %vm632_vm2, %v17895_v57 }
 0x46c   :  { %11527 = vmatprep.mubr.msk.bf16.mxu0 %vm632_vm2, %v17896_v38 }
 0x473   :  { %11528 = vmatmul.mubr.msk.bf16.gmra.mrb[52].mxu0 %vm632_vm2, %v14687_v24 }
 0x474   :  { %11531 = vmatprep.mubr.msk.bf16.mxu0 %vm632_vm2, %v14689_v58 }
 0x47b   :  { %11532 = vmatmul.mubr.msk.bf16.gmra.mrb[56].mxu0 %vm632_vm2, %v14703_v0 }
 0x47c   :  { %11535 = vmatprep.mubr.msk.bf16.mxu0 %vm632_vm2, %v14881_v4 }
 0x483   :  { %11536 = vmatmul.mubr.msk.bf16.gmra.mrb[60].mxu0 %vm632_vm2, %v4020_v33 }
 0x484   :  { %12157 = vmatprep.mubr.msk.bf16.mxu0 %vm13403_vm5, %v17447_v3 }
 0x4de   :  { %v11477_v44 = vpop.f32.mrb[0].mxu0 }
 0x4df   :  { %v4066_v10 = vpop.f32.mrb[1].mxu0  ;;  %v4391_v34 = vadd.f32 %v11477_v44, %v15170_v32 }
 0x4e0   :  { %v4389_v25 = vadd.f32 %v15170_v32, %v4066_v10  ;;  %v11478_v42 = vpop.f32.mrb[2].mxu0 }
 0x4e1   :  { %v4069_v55 = vpop.f32.mrb[3].mxu0  ;;  %v4392_v56 = vadd.f32 %v11478_v42, %v15170_v32  ;;  %v4455_v24 = vmax.f32 %v4391_v34, 0.0 }
 0x4e2   :  { %v4453_v48 = vmax.f32 %v4389_v25, 0.0  ;;  %v4390_v23 = vadd.f32 %v15170_v32, %v4069_v55 }
 0x4e3   :  { %v4456_v9 = vmax.f32 %v4392_v56, 0.0  ;;  %v4521_v2 = vsel %vm4517_vm4, %v4455_v24, 0.0 }
 0x4e4   :  { %v4454_v58 = vmax.f32 %v4390_v23, 0.0  ;;  %v4518_v0 = vsel %vm4517_vm4, %v4453_v48, 0.0 }
 0x4e5   :  { %v4523_v45 = vsel %vm4517_vm4, %v4456_v9, 0.0 }
 0x4e6   :  { %v4519_v28 = vsel %vm4517_vm4, %v4454_v58, 0.0  ;;  %v11481_v4 = vpop.f32.mrb[4].mxu0 }
 0x4e7   :  { %v4520_v35 = vadd.f32 %v4519_v28, %v4518_v0  ;;  %v4082_v37 = vpop.f32.mrb[5].mxu0  ;;  %v4395_v61 = vadd.f32 %v11481_v4, %v15170_v32 }
 0x4e8   :  { %v4393_v1 = vadd.f32 %v15170_v32, %v4082_v37  ;;  %v11482_v62 = vpop.f32.mrb[6].mxu0 }
 0x4e9   :  { %v4522_v30 = vadd.f32 %v4521_v2, %v4520_v35  ;;  %v4085_v41 = vpop.f32.mrb[7].mxu0  ;;  %v4396_v5 = vadd.f32 %v11482_v62, %v15170_v32  ;;  %v4459_v8 = vmax.f32 %v4395_v61, 0.0 }
 0x4ea   :  { %v4457_v14 = vmax.f32 %v4393_v1, 0.0  ;;  %v4394_v21 = vadd.f32 %v15170_v32, %v4085_v41 }
 0x4eb   :  { %v4524_v63 = vadd.f32 %v4523_v45, %v4522_v30  ;;  %v4460_v29 = vmax.f32 %v4396_v5, 0.0  ;;  %v4529_v20 = vsel %vm4517_vm4, %v4459_v8, 0.0 }
 0x4ec   :  { %v4525_v7 = vsel %vm4517_vm4, %v4457_v14, 0.0  ;;  %v4458_v50 = vmax.f32 %v4394_v21, 0.0 }
 0x4ed   :  { %v4526_v19 = vadd.f32 %v4525_v7, %v4524_v63  ;;  %v4531_v31 = vsel %vm4517_vm4, %v4460_v29, 0.0 }
 0x4ee   :  { %v4527_v39 = vsel %vm4517_vm4, %v4458_v50, 0.0  ;;  %v11485_v53 = vpop.f32.mrb[8].mxu0 }
 0x4ef   :  { %v4528_v18 = vadd.f32 %v4527_v39, %v4526_v19  ;;  %v4098_v26 = vpop.f32.mrb[9].mxu0  ;;  %v4399_v27 = vadd.f32 %v11485_v53, %v15170_v32 }
 0x4f0   :  { %v4397_v49 = vadd.f32 %v15170_v32, %v4098_v26  ;;  %v11486_v40 = vpop.f32.mrb[10].mxu0 }
 0x4f1   :  { %v4530_v17 = vadd.f32 %v4529_v20, %v4528_v18  ;;  %v4101_v52 = vpop.f32.mrb[11].mxu0  ;;  %v4400_v11 = vadd.f32 %v11486_v40, %v15170_v32  ;;  %v4463_v59 = vmax.f32 %v4399_v27, 0.0 }
 0x4f2   :  { %v4461_v43 = vmax.f32 %v4397_v49, 0.0  ;;  %v4398_v13 = vadd.f32 %v15170_v32, %v4101_v52 }
 0x4f3   :  { %v4532_v15 = vadd.f32 %v4531_v31, %v4530_v17  ;;  %v4464_v54 = vmax.f32 %v4400_v11, 0.0  ;;  %v4537_v33 = vsel %vm4517_vm4, %v4463_v59, 0.0 }
 0x4f4   :  { %v4533_v6 = vsel %vm4517_vm4, %v4461_v43, 0.0  ;;  %v4462_v51 = vmax.f32 %v4398_v13, 0.0 }
 0x4f5   :  { %v4534_v47 = vadd.f32 %v4533_v6, %v4532_v15  ;;  %v4539_v25 = vsel %vm4517_vm4, %v4464_v54, 0.0 }
 0x4f6   :  { %v4535_v22 = vsel %vm4517_vm4, %v4462_v51, 0.0  ;;  %v11489_v46 = vpop.f32.mrb[12].mxu0 }
 0x4f7   :  { %v4536_v36 = vadd.f32 %v4535_v22, %v4534_v47  ;;  %v4114_v12 = vpop.f32.mrb[13].mxu0  ;;  %v4403_v57 = vadd.f32 %v11489_v46, %v15170_v32 }
 0x4f8   :  { %v4401_v38 = vadd.f32 %v15170_v32, %v4114_v12  ;;  %v11490_v44 = vpop.f32.mrb[14].mxu0 }
 0x4f9   :  { %v4538_v10 = vadd.f32 %v4537_v33, %v4536_v36  ;;  %v4117_v34 = vpop.f32.mrb[15].mxu0  ;;  %v4404_v55 = vadd.f32 %v11490_v44, %v15170_v32  ;;  %v4467_v23 = vmax.f32 %v4403_v57, 0.0 }
 0x4fa   :  { %v4465_v42 = vmax.f32 %v4401_v38, 0.0  ;;  %v4402_v48 = vadd.f32 %v15170_v32, %v4117_v34 }
 0x4fb   :  { %v4540_v56 = vadd.f32 %v4539_v25, %v4538_v10  ;;  %v4468_v9 = vmax.f32 %v4404_v55, 0.0  ;;  %v4545_v2 = vsel %vm4517_vm4, %v4467_v23, 0.0 }
 0x4fc   :  { %v4541_v24 = vsel %vm4517_vm4, %v4465_v42, 0.0  ;;  %v4466_v58 = vmax.f32 %v4402_v48, 0.0 }
 0x4fd   :  { %v4542_v0 = vadd.f32 %v4541_v24, %v4540_v56  ;;  %v4547_v45 = vsel %vm4517_vm4, %v4468_v9, 0.0 }
 0x4fe   :  { %v4543_v28 = vsel %vm4517_vm4, %v4466_v58, 0.0  ;;  %v11493_v4 = vpop.f32.mrb[16].mxu0 }
 0x4ff   :  { %v4544_v35 = vadd.f32 %v4543_v28, %v4542_v0  ;;  %v4130_v37 = vpop.f32.mrb[17].mxu0  ;;  %v4407_v61 = vadd.f32 %v11493_v4, %v15170_v32 }
 0x500   :  { %v4405_v1 = vadd.f32 %v15170_v32, %v4130_v37  ;;  %v11494_v62 = vpop.f32.mrb[18].mxu0 }
 0x501   :  { %v4546_v30 = vadd.f32 %v4545_v2, %v4544_v35  ;;  %v4133_v41 = vpop.f32.mrb[19].mxu0  ;;  %v4408_v5 = vadd.f32 %v11494_v62, %v15170_v32  ;;  %v4471_v8 = vmax.f32 %v4407_v61, 0.0 }
 0x502   :  { %v4469_v14 = vmax.f32 %v4405_v1, 0.0  ;;  %v4406_v21 = vadd.f32 %v15170_v32, %v4133_v41 }
 0x503   :  { %v4548_v63 = vadd.f32 %v4547_v45, %v4546_v30  ;;  %v4472_v16 = vmax.f32 %v4408_v5, 0.0  ;;  %v4553_v26 = vsel %vm4517_vm4, %v4471_v8, 0.0 }
 0x504   :  { %v4549_v7 = vsel %vm4517_vm4, %v4469_v14, 0.0  ;;  %v4470_v50 = vmax.f32 %v4406_v21, 0.0 }
 0x505   :  { %v4550_v19 = vadd.f32 %v4549_v7, %v4548_v63  ;;  %v4555_v17 = vsel %vm4517_vm4, %v4472_v16, 0.0 }
 0x506   :  { %v4551_v29 = vsel %vm4517_vm4, %v4470_v50, 0.0  ;;  %v11497_v39 = vpop.f32.mrb[20].mxu0 }
 0x507   :  { %v4552_v53 = vadd.f32 %v4551_v29, %v4550_v19  ;;  %v4146_v18 = vpop.f32.mrb[21].mxu0  ;;  %v4411_v60 = vadd.f32 %v11497_v39, %v15170_v32 }
 0x508   :  { %v4409_v20 = vadd.f32 %v15170_v32, %v4146_v18  ;;  %v11498_v27 = vpop.f32.mrb[22].mxu0 }
 0x509   :  { %v4554_v49 = vadd.f32 %v4553_v26, %v4552_v53  ;;  %v4149_v40 = vpop.f32.mrb[23].mxu0  ;;  %v4412_v31 = vadd.f32 %v11498_v27, %v15170_v32  ;;  %v4475_v13 = vmax.f32 %v4411_v60, 0.0 }
 0x50a   :  { %v4473_v52 = vmax.f32 %v4409_v20, 0.0  ;;  %v4410_v43 = vadd.f32 %v15170_v32, %v4149_v40 }
 0x50b   :  { %v4556_v11 = vadd.f32 %v4555_v17, %v4554_v49  ;;  %v4476_v51 = vmax.f32 %v4412_v31, 0.0  ;;  %v4561_v36 = vsel %vm4517_vm4, %v4475_v13, 0.0 }
 0x50c   :  { %v4557_v15 = vsel %vm4517_vm4, %v4473_v52, 0.0  ;;  %v4474_v59 = vmax.f32 %v4410_v43, 0.0 }
 0x50d   :  { %v4558_v6 = vadd.f32 %v4557_v15, %v4556_v11  ;;  %v4563_v10 = vsel %vm4517_vm4, %v4476_v51, 0.0 }
 0x50e   :  { %v4559_v47 = vsel %vm4517_vm4, %v4474_v59, 0.0  ;;  %v11501_v54 = vpop.f32.mrb[24].mxu0 }
 0x50f   :  { %v4560_v22 = vadd.f32 %v4559_v47, %v4558_v6  ;;  %v4162_v46 = vpop.f32.mrb[25].mxu0  ;;  %v4415_v12 = vadd.f32 %v11501_v54, %v15170_v32 }
 0x510   :  { %v4413_v33 = vadd.f32 %v15170_v32, %v4162_v46  ;;  %v11502_v57 = vpop.f32.mrb[26].mxu0 }
 0x511   :  { %v4562_v38 = vadd.f32 %v4561_v36, %v4560_v22  ;;  %v4165_v44 = vpop.f32.mrb[27].mxu0  ;;  %v4416_v25 = vadd.f32 %v11502_v57, %v15170_v32  ;;  %v4479_v48 = vmax.f32 %v4415_v12, 0.0 }
 0x512   :  { %v4477_v34 = vmax.f32 %v4413_v33, 0.0  ;;  %v4414_v42 = vadd.f32 %v15170_v32, %v4165_v44 }
 0x513   :  { %v4564_v55 = vadd.f32 %v4563_v10, %v4562_v38  ;;  %v4480_v58 = vmax.f32 %v4416_v25, 0.0  ;;  %v4569_v35 = vsel %vm4517_vm4, %v4479_v48, 0.0 }
 0x514   :  { %v4565_v56 = vsel %vm4517_vm4, %v4477_v34, 0.0  ;;  %v4478_v23 = vmax.f32 %v4414_v42, 0.0 }
 0x515   :  { %v4566_v24 = vadd.f32 %v4565_v56, %v4564_v55  ;;  %v4571_v30 = vsel %vm4517_vm4, %v4480_v58, 0.0 }
 0x516   :  { %v4567_v0 = vsel %vm4517_vm4, %v4478_v23, 0.0  ;;  %v11505_v9 = vpop.f32.mrb[28].mxu0 }
 0x517   :  { %v4568_v28 = vadd.f32 %v4567_v0, %v4566_v24  ;;  %v4178_v4 = vpop.f32.mrb[29].mxu0  ;;  %v4419_v37 = vadd.f32 %v11505_v9, %v15170_v32 }
 0x518   :  { %v4417_v2 = vadd.f32 %v15170_v32, %v4178_v4  ;;  %v11506_v61 = vpop.f32.mrb[30].mxu0 }
 0x519   :  { %v4570_v1 = vadd.f32 %v4569_v35, %v4568_v28  ;;  %v4181_v62 = vpop.f32.mrb[31].mxu0  ;;  %v4420_v45 = vadd.f32 %v11506_v61, %v15170_v32  ;;  %v4483_v21 = vmax.f32 %v4419_v37, 0.0 }
 0x51a   :  { %v4481_v41 = vmax.f32 %v4417_v2, 0.0  ;;  %v4418_v14 = vadd.f32 %v15170_v32, %v4181_v62 }
 0x51b   :  { %v4572_v5 = vadd.f32 %v4571_v30, %v4570_v1  ;;  %v4484_v50 = vmax.f32 %v4420_v45, 0.0  ;;  %v4577_v53 = vsel %vm4517_vm4, %v4483_v21, 0.0 }
 0x51c   :  { %v4573_v63 = vsel %vm4517_vm4, %v4481_v41, 0.0  ;;  %v4482_v8 = vmax.f32 %v4418_v14, 0.0 }
 0x51d   :  { %v4574_v7 = vadd.f32 %v4573_v63, %v4572_v5  ;;  %v4579_v49 = vsel %vm4517_vm4, %v4484_v50, 0.0 }
 0x51e   :  { %v4575_v19 = vsel %vm4517_vm4, %v4482_v8, 0.0  ;;  %v11509_v16 = vpop.f32.mrb[32].mxu0 }
 0x51f   :  { %v4576_v29 = vadd.f32 %v4575_v19, %v4574_v7  ;;  %v4194_v39 = vpop.f32.mrb[33].mxu0  ;;  %v4423_v18 = vadd.f32 %v11509_v16, %v15170_v32 }
 0x520   :  { %v4421_v26 = vadd.f32 %v15170_v32, %v4194_v39  ;;  %v11510_v60 = vpop.f32.mrb[34].mxu0 }
 0x521   :  { %v4578_v20 = vadd.f32 %v4577_v53, %v4576_v29  ;;  %v4197_v27 = vpop.f32.mrb[35].mxu0  ;;  %v4424_v17 = vadd.f32 %v11510_v60, %v15170_v32  ;;  %v4487_v43 = vmax.f32 %v4423_v18, 0.0 }
 0x522   :  { %v4485_v40 = vmax.f32 %v4421_v26, 0.0  ;;  %v4422_v52 = vadd.f32 %v15170_v32, %v4197_v27 }
 0x523   :  { %v15254_v31 = vadd.f32 %v4579_v49, %v4578_v20  ;;  %v4488_v15 = vmax.f32 %v4424_v17, 0.0  ;;  %v4590_v54 = vsel %vm4517_vm4, %v4487_v43, 0.0 }
 0x524   :  { %v4486_v11 = vmax.f32 %v4422_v52, 0.0  ;;  %v4587_v13 = vsel %vm4517_vm4, %v4485_v40, 0.0 }
 0x525   :  { %v4592_v57 = vsel %vm4517_vm4, %v4488_v15, 0.0 }
 0x526   :  { %v4588_v59 = vsel %vm4517_vm4, %v4486_v11, 0.0  ;;  %v11513_v6 = vpop.f32.mrb[36].mxu0 }
 0x527   :  { %v4589_v51 = vadd.f32 %v4588_v59, %v4587_v13  ;;  %v4210_v47 = vpop.f32.mrb[37].mxu0  ;;  %v4427_v22 = vadd.f32 %v11513_v6, %v15170_v32 }
 0x528   :  { %v4425_v46 = vadd.f32 %v15170_v32, %v4210_v47  ;;  %v11514_v36 = vpop.f32.mrb[38].mxu0 }
 0x529   :  { %v4591_v12 = vadd.f32 %v4590_v54, %v4589_v51  ;;  %v4213_v33 = vpop.f32.mrb[39].mxu0  ;;  %v4428_v44 = vadd.f32 %v11514_v36, %v15170_v32  ;;  %v4491_v25 = vmax.f32 %v4427_v22, 0.0 }
 0x52a   :  { %v4489_v38 = vmax.f32 %v4425_v46, 0.0  ;;  %v4426_v10 = vadd.f32 %v15170_v32, %v4213_v33 }
 0x52b   :  { %v4593_v34 = vadd.f32 %v4592_v57, %v4591_v12  ;;  %v4492_v56 = vmax.f32 %v4428_v44, 0.0  ;;  %v4598_v9 = vsel %vm4517_vm4, %v4491_v25, 0.0 }
 0x52c   :  { %v4594_v42 = vsel %vm4517_vm4, %v4489_v38, 0.0  ;;  %v4490_v55 = vmax.f32 %v4426_v10, 0.0 }
 0x52d   :  { %v4595_v48 = vadd.f32 %v4594_v42, %v4593_v34  ;;  %v4600_v61 = vsel %vm4517_vm4, %v4492_v56, 0.0 }
 0x52e   :  { %v4596_v23 = vsel %vm4517_vm4, %v4490_v55, 0.0  ;;  %v11517_v24 = vpop.f32.mrb[40].mxu0 }
 0x52f   :  { %v4597_v58 = vadd.f32 %v4596_v23, %v4595_v48  ;;  %v4226_v0 = vpop.f32.mrb[41].mxu0  ;;  %v4431_v28 = vadd.f32 %v11517_v24, %v15170_v32 }
 0x530   :  { %v4429_v4 = vadd.f32 %v15170_v32, %v4226_v0  ;;  %v11518_v35 = vpop.f32.mrb[42].mxu0 }
 0x531   :  { %v4599_v37 = vadd.f32 %v4598_v9, %v4597_v58  ;;  %v4229_v2 = vpop.f32.mrb[43].mxu0  ;;  %v4432_v62 = vadd.f32 %v11518_v35, %v15170_v32  ;;  %v4495_v45 = vmax.f32 %v4431_v28, 0.0 }
 0x532   :  { %v4493_v1 = vmax.f32 %v4429_v4, 0.0  ;;  %v4430_v30 = vadd.f32 %v15170_v32, %v4229_v2 }
 0x533   :  { %v4601_v41 = vadd.f32 %v4600_v61, %v4599_v37  ;;  %v4496_v63 = vmax.f32 %v4432_v62, 0.0  ;;  %v4606_v16 = vsel %vm4517_vm4, %v4495_v45, 0.0 }
 0x534   :  { %v4602_v14 = vsel %vm4517_vm4, %v4493_v1, 0.0  ;;  %v4494_v5 = vmax.f32 %v4430_v30, 0.0 }
 0x535   :  { %v4603_v21 = vadd.f32 %v4602_v14, %v4601_v41  ;;  %v4608_v60 = vsel %vm4517_vm4, %v4496_v63, 0.0 }
 0x536   :  { %v4604_v8 = vsel %vm4517_vm4, %v4494_v5, 0.0  ;;  %v11521_v7 = vpop.f32.mrb[44].mxu0 }
 0x537   :  { %v4605_v50 = vadd.f32 %v4604_v8, %v4603_v21  ;;  %v4242_v19 = vpop.f32.mrb[45].mxu0  ;;  %v4435_v29 = vadd.f32 %v11521_v7, %v15170_v32 }
 0x538   :  { %v4433_v39 = vadd.f32 %v15170_v32, %v4242_v19  ;;  %v11522_v53 = vpop.f32.mrb[46].mxu0 }
 0x539   :  { %v4607_v18 = vadd.f32 %v4606_v16, %v4605_v50  ;;  %v4245_v26 = vpop.f32.mrb[47].mxu0  ;;  %v4436_v27 = vadd.f32 %v11522_v53, %v15170_v32  ;;  %v4499_v17 = vmax.f32 %v4435_v29, 0.0 }
 0x53a   :  { %v4497_v20 = vmax.f32 %v4433_v39, 0.0  ;;  %v4434_v49 = vadd.f32 %v15170_v32, %v4245_v26 }
 0x53b   :  { %v4609_v40 = vadd.f32 %v4608_v60, %v4607_v18  ;;  %v4500_v13 = vmax.f32 %v4436_v27, 0.0  ;;  %v4614_v47 = vsel %vm4517_vm4, %v4499_v17, 0.0 }
 0x53c   :  { %v4610_v52 = vsel %vm4517_vm4, %v4497_v20, 0.0  ;;  %v4498_v43 = vmax.f32 %v4434_v49, 0.0 }
 0x53d   :  { %v4611_v11 = vadd.f32 %v4610_v52, %v4609_v40  ;;  %v4616_v33 = vsel %vm4517_vm4, %v4500_v13, 0.0 }
 0x53e   :  { %v4612_v15 = vsel %vm4517_vm4, %v4498_v43, 0.0  ;;  %v11525_v59 = vpop.f32.mrb[48].mxu0  ;;  %v4581_v43 = vrot.slane %v15254_v31, 4 }
 0x53f   :  { %v4613_v6 = vadd.f32 %v4612_v15, %v4611_v11  ;;  %v4258_v51 = vpop.f32.mrb[49].mxu0  ;;  %v4439_v54 = vadd.f32 %v11525_v59, %v15170_v32 }
 0x540   :  { %v4437_v22 = vadd.f32 %v15170_v32, %v4258_v51  ;;  %v11526_v46 = vpop.f32.mrb[50].mxu0 }
 0x541   :  { %v4615_v36 = vadd.f32 %v4614_v47, %v4613_v6  ;;  %v4261_v12 = vpop.f32.mrb[51].mxu0  ;;  %v4440_v38 = vadd.f32 %v11526_v46, %v15170_v32  ;;  %v4503_v34 = vmax.f32 %v4439_v54, 0.0 }
 0x542   :  { %v4501_v57 = vmax.f32 %v4437_v22, 0.0  ;;  %v4438_v44 = vadd.f32 %v15170_v32, %v4261_v12 }
 0x543   :  { %v4617_v10 = vadd.f32 %v4616_v33, %v4615_v36  ;;  %v4504_v48 = vmax.f32 %v4440_v38, 0.0  ;;  %v4622_v0 = vsel %vm4517_vm4, %v4503_v34, 0.0  ;;  %v4582_v36 = vadd.f32 %v4581_v43, %v15254_v31  ;;  %v9969_v43 = vld [vmem:[%s17268_s5 + $0x1] ss:$0 sm:$0xff] }
 0x544   :  { %v4618_v25 = vsel %vm4517_vm4, %v4501_v57, 0.0  ;;  %v4502_v42 = vmax.f32 %v4438_v44, 0.0 }
 0x545   :  { %v4619_v55 = vadd.f32 %v4618_v25, %v4617_v10  ;;  %v4624_v2 = vsel %vm4517_vm4, %v4504_v48, 0.0  ;;  %v4583_v48 = vrot.slane %v4582_v36, 2 }
 0x546   :  { %v4620_v56 = vsel %vm4517_vm4, %v4502_v42, 0.0  ;;  %v11529_v23 = vpop.f32.mrb[52].mxu0 }
 0x547   :  { %v4621_v24 = vadd.f32 %v4620_v56, %v4619_v55  ;;  %v4274_v58 = vpop.f32.mrb[53].mxu0  ;;  %v4443_v9 = vadd.f32 %v11529_v23, %v15170_v32 }
 0x548   :  { %v4441_v28 = vadd.f32 %v15170_v32, %v4274_v58  ;;  %v11530_v4 = vpop.f32.mrb[54].mxu0 }
 0x549   :  { %v4623_v35 = vadd.f32 %v4622_v0, %v4621_v24  ;;  %v4277_v37 = vpop.f32.mrb[55].mxu0  ;;  %v4444_v1 = vadd.f32 %v11530_v4, %v15170_v32  ;;  %v4507_v41 = vmax.f32 %v4443_v9, 0.0  ;;  %v4584_v0 = vadd.f32 %v4583_v48, %v4582_v36  ;;  %v15401_v48 = vld [vmem:[%s17264_s1 + $0x24] sm:$0xff]  }
 0x54a   :  { %v4505_v61 = vmax.f32 %v4441_v28, 0.0  ;;  %v4442_v62 = vadd.f32 %v15170_v32, %v4277_v37 }
 0x54b   :  { %v4625_v30 = vadd.f32 %v4624_v2, %v4623_v35  ;;  %v4508_v21 = vmax.f32 %v4444_v1, 0.0  ;;  %v4630_v19 = vsel %vm4517_vm4, %v4507_v41, 0.0  ;;  %v4585_v35 = vrot.slane %v4584_v0, 1 }
 0x54c   :  { %v4626_v45 = vsel %vm4517_vm4, %v4505_v61, 0.0  ;;  %v4506_v14 = vmax.f32 %v4442_v62, 0.0 }
 0x54d   :  { %v4627_v5 = vadd.f32 %v4626_v45, %v4625_v30  ;;  %v4632_v26 = vsel %vm4517_vm4, %v4508_v21, 0.0  ;;  %v4586_v61 = vadd.f32 %v4585_v35, %v4584_v0  ;;  %v15417_v0 = vld [vmem:[%s17264_s1 + $0x30] sm:$0xff]   ;;  %v17478_v35 = vunpack.c.l.bf16 %v15401_v48 }
 0x54e   :  { %v4628_v63 = vsel %vm4517_vm4, %v4506_v14, 0.0  ;;  %v11533_v8 = vpop.f32.mrb[56].mxu0 }
 0x54f   :  { %v4629_v7 = vadd.f32 %v4628_v63, %v4627_v5  ;;  %v4290_v50 = vpop.f32.mrb[57].mxu0  ;;  %v4447_v16 = vadd.f32 %v11533_v8, %v15170_v32  ;;  %v4656_v30 = vmul.f32 0.00390625, %v4586_v61  ;;  %v17469_v61 = vunpack.c.l.bf16 %v15417_v0 }
 0x550   :  { %v4445_v29 = vadd.f32 %v15170_v32, %v4290_v50  ;;  %v11534_v39 = vpop.f32.mrb[58].mxu0 }
 0x551   :  { %v4631_v53 = vadd.f32 %v4630_v19, %v4629_v7  ;;  %v4293_v18 = vpop.f32.mrb[59].mxu0  ;;  %v4448_v20 = vadd.f32 %v11534_v39, %v15170_v32  ;;  %v4511_v40 = vmax.f32 %v4447_v16, 0.0  ;;  %v4658_v14 = vpack.c.bf16 %v4656_v30, %v4656_v30  ;;  %v13256_v7 = vld [vmem:[%s17267_s4] sm:$0xff]   ;;  %v13257_v19 = vld [vmem:[%s17267_s4 + $0x8] sm:$0xff]   ;;  %v13258_v16 = vld [vmem:[%s17267_s4 + $0x10] sm:$0xff]  }
 0x552   :  { %v4509_v60 = vmax.f32 %v4445_v29, 0.0  ;;  %v4446_v27 = vadd.f32 %v15170_v32, %v4293_v18  ;;  %v13259_v29 = vld [vmem:[%s17267_s4 + $0x18] sm:$0xff]   ;;  %v10012_v39 = vld [vmem:[%s17265_s2 + $0x14] sm:$0x3]  ;;  %v15349_v18 = vld [vmem:[%s17264_s1 + $0x8] sm:$0x1] }
 0x553   :  { %v4633_v49 = vadd.f32 %v4632_v26, %v4631_v53  ;;  %v4512_v13 = vmax.f32 %v4448_v20, 0.0  ;;  %v4638_v47 = vsel %vm4517_vm4, %v4511_v40, 0.0  ;;  %v4670_v21 = vunpack.c.l.b16 %v4658_v14  ;;  %v15344_v53 = vld [vmem:[%s17264_s1] sm:$0xff]  }
 0x554   :  { %v4634_v17 = vsel %vm4517_vm4, %v4509_v60, 0.0  ;;  %v4510_v52 = vmax.f32 %v4446_v27, 0.0  ;;  %v17490_v26 = vunpack.c.l.bf16 %v15344_v53  ;;  %v17489_v60 = vunpack.c.h.bf16 %v15344_v53 }
 0x555   :  { %v4635_v11 = vadd.f32 %v4634_v17, %v4633_v49  ;;  %v4640_v57 = vsel %vm4517_vm4, %v4512_v13, 0.0  ;;  %v17482_v20 = vunpack.c.l.bf16 %v15349_v18  ;;  %v15363_v17 = vld [vmem:[%s17264_s1 + $0xc] sm:$0xff]   ;;  %v15381_v13 = vld [vmem:[%s17264_s1 + $0x20] sm:$0x1]  ;;  %v5176_v14 = vrot.slane %v17478_v35, 1 }
 0x556   :  { %v4636_v15 = vsel %vm4517_vm4, %v4510_v52, 0.0  ;;  %v11537_v59 = vpop.f32.mrb[60].mxu0  ;;  %v5161_v27 = vrot.slane %v17490_v26, 1  ;;  %v5162_v49 = vrot.slane %v17489_v60, 1  ;;  %v15368_v52 = vld [vmem:[%s17264_s1 + $0x14] sm:$0x1] }
 0x557   :  { %v4637_v6 = vadd.f32 %v4636_v15, %v4635_v11  ;;  %v4306_v51 = vpop.f32.mrb[61].mxu0  ;;  %v4451_v54 = vadd.f32 %v11537_v59, %v15170_v32  ;;  %v5164_v40 = vrot.slane %v17482_v20, 1  ;;  %v15376_v11 = vld [vmem:[%s17264_s1 + $0x18] sm:$0xff]   ;;  %v17493_v15 = vunpack.c.l.bf16 %v15363_v17 }
 0x558   :  { %v4449_v22 = vadd.f32 %v15170_v32, %v4306_v51  ;;  %v11538_v46 = vpop.f32.mrb[62].mxu0  ;;  %v17492_v59 = vunpack.c.h.bf16 %v15363_v17  ;;  %v5163_v51 = vsel %vm373_vm1, %v5161_v27, %v5162_v49  ;;  %v17481_v36 = vunpack.c.l.bf16 %v15376_v11  ;;  %v15475_v27 = vld [vmem:[%s17264_s1 + $0x50] sm:$0x1] }
 0x559   :  { %v4639_v12 = vadd.f32 %v4638_v47, %v4637_v6  ;;  %v4309_v33 = vpop.f32.mrb[63].mxu0  ;;  %v4452_v44 = vadd.f32 %v11538_v46, %v15170_v32  ;;  %v4515_v25 = vmax.f32 %v4451_v54, 0.0  ;;  %v5165_v47 = vsel %vm373_vm1, %v5162_v49, %v5164_v40  ;;  %v15480_v49 = vld [vmem:[%s17265_s2 + $0x16] sm:$0x3] }
 0x55a   :  { %v4513_v38 = vmax.f32 %v4449_v22, 0.0  ;;  %v4450_v10 = vadd.f32 %v15170_v32, %v4309_v33  ;;  %v17491_v54 = vunpack.c.l.bf16 %v15368_v52  ;;  %v17479_v33 = vunpack.c.l.bf16 %v15381_v13 }
 0x55b   :  { %v4641_v34 = vadd.f32 %v4640_v57, %v4639_v12  ;;  %v4516_v23 = vmax.f32 %v4452_v44, 0.0  ;;  %v4646_v58 = vsel %vm4517_vm4, %v4515_v25, 0.0  ;;  %v17480_v12 = vunpack.c.h.bf16 %v15376_v11 }
 0x55c   :  { %v4642_v42 = vsel %vm4517_vm4, %v4513_v38, 0.0  ;;  %v4514_v55 = vmax.f32 %v4450_v10, 0.0  ;;  %v5166_v10 = vrot.slane %v17493_v15, 1  ;;  %v5516_v25 = vsel %vm729_vm0, %v10012_v39, 0 }
 0x55d   :  { %v4643_v56 = vadd.f32 %v4642_v42, %v4641_v34  ;;  %v4648_v28 = vsel %vm4517_vm4, %v4516_v23, 0.0  ;;  %v5167_v34 = vrot.slane %v17492_v59, 1  ;;  %v5385_v42 = vpack.c.bf16 %v5165_v47, %v5163_v51 }
 0x55e   :  { %v4644_v24 = vsel %vm4517_vm4, %v4514_v55, 0.0  ;;  %v5169_v55 = vrot.slane %v17491_v54, 1  ;;  %v5171_v23 = vrot.slane %v17481_v36, 1 }
 0x55f   :  { %v4645_v31 = vadd.f32 %v4644_v24, %v4643_v56  ;;  %v5172_v24 = vrot.slane %v17480_v12, 1 }
 0x561   :  { %v4647_v9 = vadd.f32 %v4646_v58, %v4645_v31  ;;  %v5174_v31 = vrot.slane %v17479_v33, 1  ;;  %v15412_v58 = vld [vmem:[%s17264_s1 + $0x2c] sm:$0x1] }
 0x563   :  { %v4649_v4 = vadd.f32 %v4648_v28, %v4647_v9  ;;  %v10011_v9 = vld [vmem:[%s17265_s2 + $0x12] sm:$0x3]  ;;  %v15425_v28 = vld [vmem:[%s17264_s1 + $0x38] sm:$0x1]  ;;  %v5175_v30 = vsel %vm373_vm1, %v5172_v24, %v5174_v31 }
 0x565   :  { %v4650_v32 = vrot.slane %v4649_v4, 4 }
 0x567   :  { %v4651_v37 = vadd.f32 %v4650_v32, %v4649_v4  ;;  %v5168_v4 = vsel %vm373_vm1, %v5166_v10, %v5167_v34  ;;  %v17477_v32 = vunpack.c.h.bf16 %v15401_v48 }
 0x569   :  { %v4652_v2 = vrot.slane %v4651_v37, 2 }
 0x56b   :  { %v4653_v1 = vadd.f32 %v4652_v2, %v4651_v37  ;;  %v5170_v37 = vsel %vm373_vm1, %v5167_v34, %v5169_v55  ;;  %v17470_v2 = vunpack.c.l.bf16 %v15412_v58 }
 0x56d   :  { %v4654_v62 = vrot.slane %v4653_v1, 1 }
 0x56f   :  { %v4655_v41 = vadd.f32 %v4654_v62, %v4653_v1  ;;  %v17468_v1 = vunpack.c.h.bf16 %v15417_v0  ;;  %v5173_v62 = vsel %vm373_vm1, %v5171_v23, %v5172_v24 }
 0x571   :  { %v4657_v45 = vmul.f32 0.00390625, %v4655_v41  ;;  %v17467_v41 = vunpack.c.l.bf16 %v15425_v28 }
 0x573   :  { %v4659_v5 = vpack.c.bf16 %v4657_v45, %v4657_v45  ;;  %v15440_v45 = vpack.c.bf16 %v5170_v37, %v5168_v4  ;;  %v15527_v4 = vld [vmem:[%s17264_s1 + $0x60] sm:$0xff]   ;;  %v15532_v37 = vld [vmem:[%s17264_s1 + $0x68] sm:$0x1] }
 0x575   :  { %v4671_v63 = vunpack.c.l.b16 %v4659_v5  ;;  %17897 = vst [vmem:[#allocation42_spill] sm:$0xff] %v15440_v45  ;;  %v5177_v5 = vrot.slane %v17477_v32, 1 }
 0x577   :  { %v4673_v8 = vsel %vm4672_vm6, %v4671_v63, %v4670_v21  ;;  %v15446_v21 = vpack.c.bf16 %v5175_v30, %v5173_v62  ;;  %v5179_v63 = vrot.slane %v17470_v2, 1 }
 0x578   :  { %v4674_v50 = vpack.c.b16 %v4673_v8, %v4673_v8  ;;  %v5181_v8 = vrot.slane %v17469_v61, 1 }
 0x579   :  { %17898 = vst [vmem:[#allocation43_spill] sm:$0xff] %v15446_v21  ;;  %v5180_v51 = vsel %vm373_vm1, %v5177_v5, %v5179_v63 }
 0x57a   :  { %11544 = vmatmul.mubr.msk.bf16.vlgmr.msra.gmra.mrb[0].mxu1 %vm4517_vm4, %v4674_v50  ;;  %v15457_v50 = vld [vmem:[%s17264_s1 + $0x3c] sm:$0xff]  }
 0x57b   :  { %11548 = vmatpush3.bf16.msra.mxu1 %v13256_v7  ;;  %11555 = vmatprep.mubr.msk.bf16.mxu1 %vm13403_vm5, %v17447_v3  ;;  %v5182_v7 = vrot.slane %v17468_v1, 1  ;;  %v17466_v40 = vunpack.c.l.bf16 %v15457_v50 }
 0x57c   :  { %11549 = vmatprep.subr.bf16.mxu1 %v17447_v3 }
 0x57d   :  { %v5183_v47 = vsel %vm373_vm1, %v5181_v8, %v5182_v7  ;;  %v5186_v34 = vrot.slane %v17466_v40, 1  ;;  %v17451_v8 = vunpack.c.l.bf16 %v15527_v4 }
 0x57f   :  { %11550 = vmatpush3.bf16.msra.mxu1 %v13257_v19  ;;  %v5904_v19 = vsel %vm729_vm0, %v10011_v9, 0 }
 0x580   :  { %11551 = vmatprep.subr.bf16.mxu1 %v17447_v3 }
 0x583   :  { %11552 = vmatpush3.bf16.msra.mxu1 %v13258_v16  ;;  %v5184_v16 = vrot.slane %v17467_v41, 1 }
 0x584   :  { %11553 = vmatprep.subr.bf16.mxu1 %v17447_v3 }
 0x587   :  { %11554 = vmatpush3.bf16.msra.mxu1 %v13259_v29  ;;  %v15465_v29 = vld [vmem:[%s17264_s1 + $0x44] sm:$0x1] }
 0x588   :  { %13206 = vmatprep.subr.msk.bf16.mxu1 %vm729_vm0, %v10012_v39  ;;  %v15470_v39 = vld [vmem:[%s17264_s1 + $0x48] sm:$0xff]  }
 0x64d   :  { %v4724_v6 = vpop.f32.mrb[0].mxu1 }
 0x64e   :  { %v4725_v22 = vadd.f32 %v9969_v43, %v4724_v6  ;;  %v11545_v46 = vpop.f32.mrb[1].mxu1  ;;  %v17465_v43 = vunpack.c.h.bf16 %v15457_v50  ;;  %v5178_v6 = vsel %vm373_vm1, %v5176_v14, %v5177_v5 }
 0x64f   :  { %v4727_v57 = vpop.f32.mrb[2].mxu1  ;;  %v5185_v46 = vsel %vm373_vm1, %v5182_v7, %v5184_v16  ;;  %v15498_v10 = vpack.c.bf16 %v5180_v51, %v5178_v6  ;;  %v17450_v7 = vunpack.c.h.bf16 %v15527_v4  ;;  %v17449_v6 = vunpack.c.l.bf16 %v15532_v37 }
 0x650   :  { %v4730_v38 = vmax.f32 %v4725_v22, 0.0  ;;  %v11546_v44 = vpop.f32.mrb[3].mxu1  ;;  %v17458_v22 = vunpack.c.l.bf16 %v15465_v29  ;;  %v17457_v57 = vunpack.c.l.bf16 %v15470_v39 }
 0x651   :  { %v17455_v44 = vunpack.c.l.bf16 %v15475_v27  ;;  %17899 = vst [vmem:[#allocation46_spill] sm:$0xff] %v15498_v10 }
 0x652   :  { %v4731_v56 = vpack.c.bf16 %v4730_v38, %v4730_v38  ;;  %v17456_v38 = vunpack.c.h.bf16 %v15470_v39  ;;  %v5189_v55 = vrot.slane %v17458_v22, 1  ;;  %v5191_v23 = vrot.slane %v17457_v57, 1 }
 0x653   :  { %v5194_v31 = vrot.slane %v17455_v44, 1 }
 0x654   :  { %11556 = vmatmul.mubr.msk.bf16.vlgmr.msra.gmra.mrb[4].mxu1 %vm4768_vm7, %v4731_v56  ;;  %v15511_v56 = vld [vmem:[%s17264_s1 + $0x54] sm:$0xff]   ;;  %v5192_v24 = vrot.slane %v17456_v38, 1 }
 0x655   :  { %11560 = vmatpush3.bf16.msra.mxu1 %v5516_v25  ;;  %11561 = vmatprep.mubr.msk.bf16.mxu1 %vm632_vm2, %v5385_v42  ;;  %v5187_v25 = vrot.slane %v17465_v43, 1  ;;  %v15504_v42 = vpack.c.bf16 %v5185_v46, %v5183_v47  ;;  %v17454_v30 = vunpack.c.l.bf16 %v15511_v56  ;;  %v17453_v14 = vunpack.c.h.bf16 %v15511_v56 }
 0x656   :  { %13207 = vmatprep.subr.msk.bf16.mxu1 %vm729_vm0, %v10011_v9  ;;  %v15522_v9 = vld [vmem:[%s17264_s1 + $0x5c] sm:$0x1]  ;;  %v5195_v16 = vsel %vm373_vm1, %v5192_v24, %v5194_v31  ;;  %v5204_v31 = vrot.slane %v17449_v6, 1 }
 0x657   :  { %17900 = vst [vmem:[#allocation5_spill] sm:$0xff] %v15504_v42  ;;  %v5188_v62 = vsel %vm373_vm1, %v5186_v34, %v5187_v25  ;;  %v5190_v5 = vsel %vm373_vm1, %v5187_v25, %v5189_v55  ;;  %v17452_v63 = vunpack.c.l.bf16 %v15522_v9  ;;  %v5196_v47 = vrot.slane %v17454_v30, 1 }
 0x658   :  { %v15548_v51 = vpack.c.bf16 %v5190_v5, %v5188_v62  ;;  %v5197_v46 = vrot.slane %v17453_v14, 1  ;;  %v5201_v55 = vrot.slane %v17451_v8, 1  ;;  %v15572_v62 = vld [vmem:[%s17264_s1 + $0x74] sm:$0x1]  ;;  %v15577_v5 = vld [vmem:[%s17264_s1 + $0x78] sm:$0xff]  }
 0x659   :  { %v5199_v25 = vrot.slane %v17452_v63, 1  ;;  %v17462_v63 = vunpack.c.l.bf16 %v15572_v62  ;;  %v17461_v30 = vunpack.c.l.bf16 %v15577_v5  ;;  %v17460_v44 = vunpack.c.h.bf16 %v15577_v5 }
 0x65a   :  { %17901 = vst [vmem:[#allocation28_spill] sm:$0xff] %v15548_v51  ;;  %v5198_v6 = vsel %vm373_vm1, %v5196_v47, %v5197_v46 }
 0x65c   :  { %11562 = vmatmul.mubr.msk.bf16.vlgmr.msra.gmra.mrb[8].mxu1 %vm632_vm2, %v15440_v45 }
 0x65d   :  { %11626 = vmatpush3.bf16.msra.mxu1 %v5904_v19  ;;  %11565 = vmatprep.mubr.msk.bf16.mxu1 %vm632_vm2, %v15446_v21  ;;  %v5193_v19 = vsel %vm373_vm1, %v5191_v23, %v5192_v24  ;;  %v5202_v23 = vrot.slane %v17450_v7, 1  ;;  %v15565_v24 = vld [vmem:[%s17264_s1 + $0x6c] sm:$0xff]   ;;  %v5200_v7 = vsel %vm373_vm1, %v5197_v46, %v5199_v25  ;;  %v5209_v25 = vrot.slane %v17462_v63, 1 }
 0x65e   :  { %13208 = vmatprep.subr.msk.bf16.mxu1 %vm729_vm0, %v15480_v49  ;;  %v15554_v34 = vpack.c.bf16 %v5195_v16, %v5193_v19  ;;  %v15582_v19 = vld [vmem:[%s17264_s1 + $0x80] sm:$0x1]  ;;  %v17464_v16 = vunpack.c.l.bf16 %v15565_v24  ;;  %v17463_v3 = vunpack.c.h.bf16 %v15565_v24  ;;  %v15598_v57 = vpack.c.bf16 %v5200_v7, %v5198_v6 }
 0x65f   :  { %v5203_v8 = vsel %vm373_vm1, %v5201_v55, %v5202_v23  ;;  %v5205_v14 = vsel %vm373_vm1, %v5202_v23, %v5204_v31  ;;  %v17459_v38 = vunpack.c.l.bf16 %v15582_v19  ;;  %v15611_v55 = vld [vmem:[%s17264_s1 + $0x84] sm:$0xff]   ;;  %v5211_v7 = vrot.slane %v17461_v30, 1  ;;  %v15632_v31 = vld [vmem:[%s17264_s1 + $0x98] sm:$0x1] }
 0x660   :  { %17902 = vst [vmem:[#allocation50_spill] sm:$0xff] %v15554_v34  ;;  %17903 = vst [vmem:[#allocation51_spill] sm:$0xff] %v15598_v57  ;;  %v5206_v22 = vrot.slane %v17464_v16, 1  ;;  %v5207_v47 = vrot.slane %v17463_v3, 1  ;;  %v15604_v46 = vpack.c.bf16 %v5205_v14, %v5203_v8  ;;  %v5212_v6 = vrot.slane %v17460_v44, 1  ;;  %v15627_v8 = vld [vmem:[%s17264_s1 + $0x90] sm:$0xff]  }
 0x661   :  { %v5214_v23 = vrot.slane %v17459_v38, 1  ;;  %v15622_v14 = vld [vmem:[%s17264_s1 + $0x8c] sm:$0x1]  ;;  %v17476_v44 = vunpack.c.l.bf16 %v15611_v55  ;;  %v17475_v30 = vunpack.c.h.bf16 %v15611_v55  ;;  %v17473_v16 = vunpack.c.l.bf16 %v15627_v8 }
 0x662   :  { %17904 = vst [vmem:[#allocation52_spill] sm:$0xff] %v15604_v46  ;;  %v5208_v38 = vsel %vm373_vm1, %v5206_v22, %v5207_v47  ;;  %v5210_v63 = vsel %vm373_vm1, %v5207_v47, %v5209_v25  ;;  %v17474_v3 = vunpack.c.l.bf16 %v15622_v14  ;;  %v17472_v43 = vunpack.c.h.bf16 %v15627_v8 }
 0x663   :  { %v5213_v40 = vsel %vm373_vm1, %v5211_v7, %v5212_v6  ;;  %v5215_v41 = vsel %vm373_vm1, %v5212_v6, %v5214_v23  ;;  %v17471_v22 = vunpack.c.l.bf16 %v15632_v31  ;;  %v15648_v1 = vpack.c.bf16 %v5210_v63, %v5208_v38  ;;  %v15665_v38 = vld [vmem:[%s17264_s1 + $0x9c] sm:$0xff]   ;;  %v15682_v23 = vld [vmem:[%s17264_s1 + $0xb0] sm:$0x1] }
 0x664   :  { %11566 = vmatmul.mubr.msk.bf16.gmra.mrb[12].mxu1 %vm632_vm2, %v15498_v10  ;;  %v5216_v61 = vrot.slane %v17476_v44, 1  ;;  %v5217_v47 = vrot.slane %v17475_v30, 1  ;;  %v15654_v25 = vpack.c.bf16 %v5215_v41, %v5213_v40  ;;  %v5219_v2 = vrot.slane %v17474_v3, 1  ;;  %v15672_v41 = vld [vmem:[%s17264_s1 + $0xa4] sm:$0x1]  ;;  %v15677_v40 = vld [vmem:[%s17264_s1 + $0xa8] sm:$0xff]  }
 0x665   :  { %11569 = vmatprep.mubr.msk.bf16.mxu1 %vm632_vm2, %v15504_v42  ;;  %17905 = vst [vmem:[#allocation15_spill] sm:$0xff] %v15648_v1  ;;  %v5221_v7 = vrot.slane %v17473_v16, 1  ;;  %v5222_v6 = vrot.slane %v17472_v43, 1  ;;  %v5224_v63 = vrot.slane %v17471_v22, 1  ;;  %17907 = vst [vmem:[#allocation19_spill] sm:$0xff] %v15672_v41  ;;  %v17488_v22 = vunpack.c.l.bf16 %v15665_v38 }
 0x666   :  { %17906 = vst [vmem:[#allocation16_spill] sm:$0xff] %v15654_v25  ;;  %17908 = vst [vmem:[#allocation20_spill] sm:$0xff] %v15682_v23  ;;  %v17487_v43 = vunpack.c.h.bf16 %v15665_v38  ;;  %v5218_v16 = vsel %vm373_vm1, %v5216_v61, %v5217_v47  ;;  %v5220_v3 = vsel %vm373_vm1, %v5217_v47, %v5219_v2  ;;  %v17486_v44 = vunpack.c.l.bf16 %v15672_v41 }
 0x667   :  { %v5223_v30 = vsel %vm373_vm1, %v5221_v7, %v5222_v6  ;;  %v5225_v32 = vsel %vm373_vm1, %v5222_v6, %v5224_v63  ;;  %v17485_v35 = vunpack.c.l.bf16 %v15677_v40  ;;  %v17484_v33 = vunpack.c.h.bf16 %v15677_v40  ;;  %v15711_v7 = vld [vmem:[%s17264_s1 + $0xb4] sm:$0xff]   ;;  %v15732_v63 = vld [vmem:[%s17264_s1 + $0xe0] sm:$0x1] }
 0x668   :  { %v17483_v12 = vunpack.c.l.bf16 %v15682_v23  ;;  %v15698_v36 = vpack.c.bf16 %v5220_v3, %v5218_v16  ;;  %v5226_v20 = vrot.slane %v17488_v22, 1  ;;  %v5227_v2 = vrot.slane %v17487_v43, 1  ;;  %17912 = vst [vmem:[#allocation27_spill] sm:$0xff] %v15732_v63 }
 0x669   :  { %v15704_v61 = vpack.c.bf16 %v5225_v32, %v5223_v30  ;;  %v5229_v47 = vrot.slane %v17486_v44, 1  ;;  %v5231_v3 = vrot.slane %v17485_v35, 1  ;;  %v5232_v16 = vrot.slane %v17484_v33, 1  ;;  %v15722_v32 = vld [vmem:[%s17264_s1 + $0xbc] sm:$0x1] }
 0x66a   :  { %17909 = vst [vmem:[#allocation23_spill] sm:$0xff] %v15698_v36  ;;  %v5234_v6 = vrot.slane %v17483_v12, 1  ;;  %17911 = vst [vmem:[#allocation26_spill] sm:$0xff] %v15722_v32  ;;  %v15727_v30 = vld [vmem:[%s17264_s1 + $0xd8] sm:$0xff]   ;;  %v5228_v12 = vsel %vm373_vm1, %v5226_v20, %v5227_v2  ;;  %v17497_v33 = vunpack.c.l.bf16 %v15711_v7  ;;  %v17496_v35 = vunpack.c.h.bf16 %v15711_v7 }
 0x66b   :  { %17910 = vst [vmem:[#allocation24_spill] sm:$0xff] %v15704_v61  ;;  %v5230_v44 = vsel %vm373_vm1, %v5227_v2, %v5229_v47  ;;  %v17495_v43 = vunpack.c.l.bf16 %v15722_v32  ;;  %v5233_v26 = vsel %vm373_vm1, %v5231_v3, %v5232_v16  ;;  %v17494_v20 = vunpack.c.l.bf16 %v15732_v63 }
 0x66c   :  { %11570 = vmatmul.mubr.msk.bf16.gmra.mrb[16].mxu1 %vm632_vm2, %v15548_v51  ;;  %v5235_v54 = vsel %vm373_vm1, %v5232_v16, %v5234_v6  ;;  %v15748_v59 = vpack.c.bf16 %v5230_v44, %v5228_v12  ;;  %v5236_v15 = vrot.slane %v17497_v33, 1  ;;  %v5237_v2 = vrot.slane %v17496_v35, 1  ;;  %v15765_v12 = vld [vmem:[%s17264_s1 + $0xe4] sm:$0xff]  }
 0x66d   :  { %11573 = vmatprep.mubr.msk.bf16.mxu1 %vm632_vm2, %v15554_v34  ;;  %v15754_v47 = vpack.c.bf16 %v5235_v54, %v5233_v26  ;;  %v5239_v22 = vrot.slane %v17495_v43, 1  ;;  %v17915_v60 = vunpack.c.l.bf16 %v15727_v30  ;;  %v17916_v16 = vunpack.c.h.bf16 %v15727_v30  ;;  %v15772_v26 = vld [vmem:[%s17264_s1 + $0xec] sm:$0x1]  ;;  %v15782_v54 = vld [vmem:[%s17264_s1 + $0xf8] sm:$0x1] }
 0x66e   :  { %17913 = vst [vmem:[#allocation30_spill] sm:$0xff] %v15748_v59  ;;  %v5244_v44 = vrot.slane %v17494_v20, 1  ;;  %17917 = vst [vmem:[#allocation34_spill] sm:$0xff] %v15772_v26  ;;  %v5238_v43 = vsel %vm373_vm1, %v5236_v15, %v5237_v2  ;;  %v17921_v15 = vunpack.c.h.bf16 %v15765_v12 }
 0x66f   :  { %17914 = vst [vmem:[#allocation31_spill] sm:$0xff] %v15754_v47  ;;  %v5241_v3 = vrot.slane %v17915_v60, 1  ;;  %v5242_v6 = vrot.slane %v17916_v16, 1  ;;  %v15777_v60 = vld [vmem:[%s17264_s1 + $0xf0] sm:$0xff]   ;;  %17918 = vst [vmem:[#allocation6_spill] sm:$0xff] %v15782_v54  ;;  %v5240_v35 = vsel %vm373_vm1, %v5237_v2, %v5239_v22  ;;  %v17510_v16 = vunpack.c.l.bf16 %v15782_v54 }
 0x670   :  { %v15798_v20 = vpack.c.bf16 %v5240_v35, %v5238_v43  ;;  %v5247_v22 = vrot.slane %v17921_v15, 1 }
 0x671   :  { %v5243_v33 = vsel %vm373_vm1, %v5241_v3, %v5242_v6  ;;  %v5254_v43 = vrot.slane %v17510_v16, 1 }
 0x672   :  { %17919 = vst [vmem:[#allocation7_spill] sm:$0xff] %v15798_v20 }
 0x674   :  { %11574 = vmatmul.mubr.msk.bf16.gmra.mrb[20].mxu1 %vm632_vm2, %v15598_v57 }
 0x675   :  { %11577 = vmatprep.mubr.msk.bf16.mxu1 %vm632_vm2, %v15604_v46 }
 0x67c   :  { %11578 = vmatmul.mubr.msk.bf16.gmra.mrb[24].mxu1 %vm632_vm2, %v15648_v1 }
 0x67d   :  { %11581 = vmatprep.mubr.msk.bf16.mxu1 %vm632_vm2, %v15654_v25  ;;  %v17512_v25 = vunpack.c.l.bf16 %v15777_v60 }
 0x684   :  { %11582 = vmatmul.mubr.msk.bf16.gmra.mrb[28].mxu1 %vm632_vm2, %v15698_v36  ;;  %v5245_v36 = vsel %vm373_vm1, %v5242_v6, %v5244_v44  ;;  %v15809_v6 = vld [vmem:[%s17264_s1 + $0xfc] sm:$0xff]   ;;  %v5251_v44 = vrot.slane %v17512_v25, 1 }
 0x685   :  { %11585 = vmatprep.mubr.msk.bf16.mxu1 %vm632_vm2, %v15704_v61  ;;  %v17513_v61 = vunpack.c.l.bf16 %v15772_v26  ;;  %v5401_v2 = vpack.c.bf16 %v5245_v36, %v5243_v33  ;;  %v15820_v36 = vld [vmem:[%s17264_s1 + $0x104] sm:$0x1]  ;;  %v15825_v33 = vld [vmem:[%s17264_s1 + $0x108] sm:$0xff]   ;;  %v17526_v16 = vunpack.c.l.bf16 %v15809_v6 }
 0x686   :  { %17922 = vst [vmem:[#allocation8_spill] sm:$0xff] %v15820_v36  ;;  %v17927_v57 = vunpack.c.l.bf16 %v15825_v33 }
 0x687   :  { %v5249_v3 = vrot.slane %v17513_v61, 1  ;;  %v17525_v61 = vunpack.c.l.bf16 %v15820_v36 }
 0x689   :  { %v5250_v25 = vsel %vm373_vm1, %v5247_v22, %v5249_v3  ;;  %v5259_v46 = vrot.slane %v17525_v61, 1 }
 0x68c   :  { %11586 = vmatmul.mubr.msk.bf16.gmra.mrb[32].mxu1 %vm632_vm2, %v15748_v59  ;;  %v17511_v59 = vunpack.c.h.bf16 %v15777_v60 }
 0x68d   :  { %11589 = vmatprep.mubr.msk.bf16.mxu1 %vm632_vm2, %v15754_v47  ;;  %v17920_v47 = vunpack.c.l.bf16 %v15765_v12 }
 0x68e   :  { %v5252_v35 = vrot.slane %v17511_v59, 1  ;;  %v5256_v59 = vrot.slane %v17526_v16, 1 }
 0x68f   :  { %v5246_v1 = vrot.slane %v17920_v47, 1  ;;  %v15830_v47 = vld [vmem:[%s17264_s1 + $0x110] sm:$0x1] }
 0x690   :  { %17923 = vst [vmem:[#allocation9_spill] sm:$0xff] %v15830_v47  ;;  %v5253_v34 = vsel %vm373_vm1, %v5251_v44, %v5252_v35  ;;  %v5261_v44 = vrot.slane %v17927_v57, 1  ;;  %v15874_v57 = vld [vmem:[%s17264_s1 + $0x120] sm:$0xff]  }
 0x691   :  { %v5248_v15 = vsel %vm373_vm1, %v5246_v1, %v5247_v22  ;;  %v17524_v1 = vunpack.c.l.bf16 %v15830_v47  ;;  %v17539_v21 = vunpack.c.l.bf16 %v15874_v57 }
 0x692   :  { %v15845_v51 = vpack.c.bf16 %v5250_v25, %v5248_v15  ;;  %v15862_v25 = vld [vmem:[%s17264_s1 + $0x114] sm:$0xff]  }
 0x693   :  { %v5264_v15 = vrot.slane %v17524_v1, 1 }
 0x694   :  { %11590 = vmatmul.mubr.msk.bf16.gmra.mrb[36].mxu1 %vm632_vm2, %v15798_v20  ;;  %v5255_v20 = vsel %vm373_vm1, %v5252_v35, %v5254_v43  ;;  %17924 = vst [vmem:[#allocation10_spill] sm:$0xff] %v15845_v51  ;;  %v17928_v35 = vunpack.c.h.bf16 %v15825_v33 }
 0x695   :  { %11593 = vmatprep.mubr.msk.bf16.mxu1 %vm632_vm2, %v5401_v2  ;;  %v17925_v2 = vunpack.c.h.bf16 %v15809_v6  ;;  %v15851_v3 = vpack.c.bf16 %v5255_v20, %v5253_v34  ;;  %v15869_v34 = vld [vmem:[%s17264_s1 + $0x11c] sm:$0x1]  ;;  %v15879_v20 = vld [vmem:[%s17264_s1 + $0x128] sm:$0x1] }
 0x696   :  { %v5262_v43 = vrot.slane %v17928_v35, 1  ;;  %17929 = vst [vmem:[#allocation12_spill] sm:$0xff] %v15869_v34  ;;  %17930 = vst [vmem:[#allocation13_spill] sm:$0xff] %v15879_v20  ;;  %v17540_v42 = vunpack.c.l.bf16 %v15869_v34 }
 0x697   :  { %v5257_v22 = vrot.slane %v17925_v2, 1  ;;  %17926 = vst [vmem:[#allocation11_spill] sm:$0xff] %v15851_v3  ;;  %v17537_v2 = vunpack.c.l.bf16 %v15879_v20 }
 0x698   :  { %v5263_v16 = vsel %vm373_vm1, %v5261_v44, %v5262_v43  ;;  %v5265_v10 = vsel %vm373_vm1, %v5262_v43, %v5264_v15  ;;  %v5269_v44 = vrot.slane %v17540_v42, 1  ;;  %v15908_v43 = vld [vmem:[%s17264_s1 + $0x12c] sm:$0xff]   ;;  %v15929_v15 = vld [vmem:[%s17264_s1 + $0x140] sm:$0x1] }
 0x699   :  { %v5258_v1 = vsel %vm373_vm1, %v5256_v59, %v5257_v22  ;;  %v5260_v61 = vsel %vm373_vm1, %v5257_v22, %v5259_v46  ;;  %v17933_v59 = vunpack.c.h.bf16 %v15862_v25  ;;  %v15901_v22 = vpack.c.bf16 %v5265_v10, %v5263_v16  ;;  %v15919_v10 = vld [vmem:[%s17264_s1 + $0x134] sm:$0x1]  ;;  %v15924_v16 = vld [vmem:[%s17264_s1 + $0x138] sm:$0xff]   ;;  %17936 = vst [vmem:[#allocation21_spill] sm:$0xff] %v15929_v15 }
 0x69a   :  { %v15895_v35 = vpack.c.bf16 %v5260_v61, %v5258_v1  ;;  %v5271_v61 = vrot.slane %v17539_v21, 1  ;;  %17935 = vst [vmem:[#allocation18_spill] sm:$0xff] %v15919_v10  ;;  %v17550_v42 = vunpack.c.l.bf16 %v15919_v10  ;;  %v17941_v34 = vunpack.c.l.bf16 %v15924_v16 }
 0x69b   :  { %v5267_v46 = vrot.slane %v17933_v59, 1  ;;  %17934 = vst [vmem:[#allocation17_spill] sm:$0xff] %v15901_v22 }
 0x69c   :  { %11594 = vmatmul.mubr.msk.bf16.gmra.mrb[40].mxu1 %vm632_vm2, %v15845_v51  ;;  %v17538_v51 = vunpack.c.h.bf16 %v15874_v57  ;;  %17931 = vst [vmem:[#allocation14_spill] sm:$0xff] %v15895_v35  ;;  %v5279_v20 = vrot.slane %v17550_v42, 1 }
 0x69d   :  { %11597 = vmatprep.mubr.msk.bf16.mxu1 %vm632_vm2, %v15851_v3  ;;  %v17932_v3 = vunpack.c.l.bf16 %v15862_v25  ;;  %v5270_v21 = vsel %vm373_vm1, %v5267_v46, %v5269_v44 }
 0x69e   :  { %v5272_v1 = vrot.slane %v17538_v51, 1  ;;  %v17938_v51 = vunpack.c.l.bf16 %v15908_v43 }
 0x69f   :  { %v5266_v45 = vrot.slane %v17932_v3, 1  ;;  %v5274_v3 = vrot.slane %v17537_v2, 1 }
 0x6a0   :  { %v5273_v47 = vsel %vm373_vm1, %v5271_v61, %v5272_v1  ;;  %v5276_v36 = vrot.slane %v17938_v51, 1  ;;  %v5281_v61 = vrot.slane %v17941_v34, 1  ;;  %v15974_v34 = vld [vmem:[%s17264_s1 + $0x150] sm:$0xff]  }
 0x6a1   :  { %v5268_v59 = vsel %vm373_vm1, %v5266_v45, %v5267_v46  ;;  %v17549_v45 = vunpack.c.l.bf16 %v15929_v15  ;;  %v17561_v54 = vunpack.c.l.bf16 %v15974_v34 }
 0x6a2   :  { %v15945_v2 = vpack.c.bf16 %v5270_v21, %v5268_v59  ;;  %v15962_v21 = vld [vmem:[%s17264_s1 + $0x144] sm:$0xff]  }
 0x6a3   :  { %v5284_v51 = vrot.slane %v17549_v45, 1 }
 0x6a4   :  { %11598 = vmatmul.mubr.msk.bf16.gmra.mrb[44].mxu1 %vm632_vm2, %v15895_v35  ;;  %v5275_v35 = vsel %vm373_vm1, %v5272_v1, %v5274_v3  ;;  %17937 = vst [vmem:[#allocation22_spill] sm:$0xff] %v15945_v2  ;;  %v17942_v1 = vunpack.c.h.bf16 %v15924_v16 }
 0x6a5   :  { %11601 = vmatprep.mubr.msk.bf16.mxu1 %vm632_vm2, %v15901_v22  ;;  %v17939_v22 = vunpack.c.h.bf16 %v15908_v43  ;;  %v15951_v44 = vpack.c.bf16 %v5275_v35, %v5273_v47  ;;  %v15969_v47 = vld [vmem:[%s17264_s1 + $0x14c] sm:$0x1]  ;;  %v15979_v35 = vld [vmem:[%s17264_s1 + $0x158] sm:$0x1] }
 0x6a6   :  { %v5282_v3 = vrot.slane %v17942_v1, 1  ;;  %17943 = vst [vmem:[#allocation39_spill] sm:$0xff] %v15969_v47  ;;  %17944 = vst [vmem:[#allocation29_spill] sm:$0xff] %v15979_v35  ;;  %v17562_v15 = vunpack.c.l.bf16 %v15969_v47 }
 0x6a7   :  { %v5277_v46 = vrot.slane %v17939_v22, 1  ;;  %17940 = vst [vmem:[#allocation25_spill] sm:$0xff] %v15951_v44  ;;  %v17559_v22 = vunpack.c.l.bf16 %v15979_v35 }
 0x6a8   :  { %v5283_v42 = vsel %vm373_vm1, %v5281_v61, %v5282_v3  ;;  %v5285_v10 = vsel %vm373_vm1, %v5282_v3, %v5284_v51  ;;  %v5289_v61 = vrot.slane %v17562_v15, 1  ;;  %v16008_v3 = vld [vmem:[%s17264_s1 + $0x15c] sm:$0xff]  }
 0x6a9   :  { %v5278_v1 = vsel %vm373_vm1, %v5276_v36, %v5277_v46  ;;  %v5280_v45 = vsel %vm373_vm1, %v5277_v46, %v5279_v20  ;;  %v17947_v36 = vunpack.c.h.bf16 %v15962_v21  ;;  %v16001_v46 = vpack.c.bf16 %v5285_v10, %v5283_v42  ;;  %v16019_v42 = vld [vmem:[%s17264_s1 + $0x164] sm:$0x1]  ;;  %v16024_v10 = vld [vmem:[%s17264_s1 + $0x168] sm:$0xff]  }
 0x6aa   :  { %v15995_v59 = vpack.c.bf16 %v5280_v45, %v5278_v1  ;;  %v5291_v45 = vrot.slane %v17561_v54, 1  ;;  %17949 = vst [vmem:[#allocation36_spill] sm:$0xff] %v16019_v42  ;;  %v16029_v1 = vld [vmem:[%s17264_s1 + $0x170] sm:$0x1]  ;;  %v17572_v15 = vunpack.c.l.bf16 %v16019_v42  ;;  %v17955_v47 = vunpack.c.l.bf16 %v16024_v10 }
 0x6ab   :  { %v5287_v20 = vrot.slane %v17947_v36, 1  ;;  %17948 = vst [vmem:[#allocation33_spill] sm:$0xff] %v16001_v46  ;;  %17950 = vst [vmem:[#allocation37_spill] sm:$0xff] %v16029_v1 }
 0x6ac   :  { %11602 = vmatmul.mubr.msk.bf16.gmra.mrb[48].mxu1 %vm632_vm2, %v15945_v2  ;;  %v17560_v2 = vunpack.c.h.bf16 %v15974_v34  ;;  %17945 = vst [vmem:[#allocation32_spill] sm:$0xff] %v15995_v59  ;;  %v5299_v35 = vrot.slane %v17572_v15, 1 }
 0x6ad   :  { %11605 = vmatprep.mubr.msk.bf16.mxu1 %vm632_vm2, %v15951_v44  ;;  %v17946_v44 = vunpack.c.l.bf16 %v15962_v21  ;;  %v5290_v54 = vsel %vm373_vm1, %v5287_v20, %v5289_v61 }
 0x6ae   :  { %v5292_v51 = vrot.slane %v17560_v2, 1  ;;  %v17952_v2 = vunpack.c.l.bf16 %v16008_v3 }
 0x6af   :  { %v5286_v26 = vrot.slane %v17946_v44, 1  ;;  %v5294_v44 = vrot.slane %v17559_v22, 1 }
 0x6b0   :  { %v5293_v63 = vsel %vm373_vm1, %v5291_v45, %v5292_v51  ;;  %v5296_v32 = vrot.slane %v17952_v2, 1  ;;  %v5301_v45 = vrot.slane %v17955_v47, 1  ;;  %v16074_v47 = vld [vmem:[%s17264_s1 + $0x180] sm:$0xff]  }
 0x6b1   :  { %v5288_v36 = vsel %vm373_vm1, %v5286_v26, %v5287_v20  ;;  %v17571_v26 = vunpack.c.l.bf16 %v16029_v1  ;;  %v17583_v23 = vunpack.c.l.bf16 %v16074_v47 }
 0x6b2   :  { %v16045_v22 = vpack.c.bf16 %v5290_v54, %v5288_v36  ;;  %v16062_v54 = vld [vmem:[%s17264_s1 + $0x174] sm:$0xff]  }
 0x6b3   :  { %v5304_v2 = vrot.slane %v17571_v26, 1 }
 0x6b4   :  { %11606 = vmatmul.mubr.msk.bf16.gmra.mrb[52].mxu1 %vm632_vm2, %v15995_v59  ;;  %v5295_v59 = vsel %vm373_vm1, %v5292_v51, %v5294_v44  ;;  %17951 = vst [vmem:[#allocation40_spill] sm:$0xff] %v16045_v22  ;;  %v17956_v51 = vunpack.c.h.bf16 %v16024_v10 }
 0x6b5   :  { %11609 = vmatprep.mubr.msk.bf16.mxu1 %vm632_vm2, %v16001_v46  ;;  %v17953_v46 = vunpack.c.h.bf16 %v16008_v3  ;;  %v16051_v61 = vpack.c.bf16 %v5295_v59, %v5293_v63  ;;  %v16069_v63 = vld [vmem:[%s17264_s1 + $0x17c] sm:$0x1]  ;;  %v16079_v59 = vld [vmem:[%s17264_s1 + $0x188] sm:$0x1] }
 0x6b6   :  { %v5302_v44 = vrot.slane %v17956_v51, 1  ;;  %17957 = vst [vmem:[#allocation44_spill] sm:$0xff] %v16079_v59  ;;  %v17584_v1 = vunpack.c.l.bf16 %v16069_v63 }
 0x6b7   :  { %v5297_v20 = vrot.slane %v17953_v46, 1  ;;  %17954 = vst [vmem:[#allocation41_spill] sm:$0xff] %v16051_v61  ;;  %v17581_v46 = vunpack.c.l.bf16 %v16079_v59 }
 0x6b8   :  { %v5303_v15 = vsel %vm373_vm1, %v5301_v45, %v5302_v44  ;;  %v5305_v42 = vsel %vm373_vm1, %v5302_v44, %v5304_v2  ;;  %v5309_v45 = vrot.slane %v17584_v1, 1  ;;  %v5311_v44 = vrot.slane %v17583_v23, 1 }
 0x6b9   :  { %v5298_v51 = vsel %vm373_vm1, %v5296_v32, %v5297_v20  ;;  %v5300_v26 = vsel %vm373_vm1, %v5297_v20, %v5299_v35  ;;  %v17960_v32 = vunpack.c.h.bf16 %v16062_v54  ;;  %v16101_v20 = vpack.c.bf16 %v5305_v42, %v5303_v15  ;;  %v16119_v15 = vld [vmem:[%s17264_s1 + $0x194] sm:$0x1] }
 0x6ba   :  { %v16095_v36 = vpack.c.bf16 %v5300_v26, %v5298_v51  ;;  %v5314_v26 = vrot.slane %v17581_v46, 1 }
 0x6bb   :  { %v5307_v35 = vrot.slane %v17960_v32, 1  ;;  %17961 = vst [vmem:[#allocation47_spill] sm:$0xff] %v16101_v20 }
 0x6bc   :  { %11610 = vmatmul.mubr.msk.bf16.gmra.mrb[56].mxu1 %vm632_vm2, %v16045_v22  ;;  %v17582_v22 = vunpack.c.h.bf16 %v16074_v47  ;;  %17958 = vst [vmem:[#allocation45_spill] sm:$0xff] %v16095_v36 }
 0x6bd   :  { %11613 = vmatprep.mubr.msk.bf16.mxu1 %vm632_vm2, %v16051_v61  ;;  %v17959_v61 = vunpack.c.l.bf16 %v16062_v54  ;;  %v5310_v51 = vsel %vm373_vm1, %v5307_v35, %v5309_v45 }
 0x6be   :  { %v5312_v2 = vrot.slane %v17582_v22, 1  ;;  %v17588_v22 = vunpack.c.l.bf16 %v16119_v15 }
 0x6bf   :  { %v5306_v41 = vrot.slane %v17959_v61, 1  ;;  %v16114_v61 = vld [vmem:[%s17264_s1 + $0x18c] sm:$0xff]  }
 0x6c0   :  { %v17590_v32 = vunpack.c.l.bf16 %v16114_v61  ;;  %v17589_v46 = vunpack.c.h.bf16 %v16114_v61  ;;  %v5313_v23 = vsel %vm373_vm1, %v5311_v44, %v5312_v2  ;;  %v5315_v1 = vsel %vm373_vm1, %v5312_v2, %v5314_v26 }
 0x6c1   :  { %v5308_v42 = vsel %vm373_vm1, %v5306_v41, %v5307_v35  ;;  %v5319_v45 = vrot.slane %v17588_v22, 1  ;;  %v17964_v2 = vunpack.c.l.bf16 %v15363_v17  ;;  %v17966_v22 = vunpack.c.l.bf16 %v15368_v52  ;;  %v10112_v52 = vld [vmem:[%s17265_s2 + $0x18] sm:$0x3] }
 0x6c2   :  { %v16132_v59 = vpack.c.bf16 %v5310_v51, %v5308_v42  ;;  %v5316_v41 = vrot.slane %v17590_v32, 1  ;;  %v5317_v35 = vrot.slane %v17589_v46, 1  ;;  %v17965_v42 = vunpack.c.h.bf16 %v15363_v17 }
 0x6c3   :  { %v6200_v26 = vrot.slane %v17964_v2, 2  ;;  %v6203_v46 = vrot.slane %v17966_v22, 2 }
 0x6c4   :  { %11614 = vmatmul.mubr.msk.bf16.gmra.mrb[60].mxu1 %vm632_vm2, %v16095_v36  ;;  %17962 = vst [vmem:[#allocation48_spill] sm:$0xff] %v16132_v59  ;;  %v16134_v36 = vpack.c.bf16 %v5315_v1, %v5313_v23  ;;  %v5318_v44 = vsel %vm373_vm1, %v5316_v41, %v5317_v35  ;;  %v5320_v23 = vsel %vm373_vm1, %v5317_v35, %v5319_v45  ;;  %v6201_v51 = vrot.slane %v17965_v42, 2 }
 0x6c5   :  { %11617 = vmatprep.mubr.msk.bf16.mxu1 %vm632_vm2, %v16101_v20  ;;  %v16148_v1 = vpack.c.bf16 %v5320_v23, %v5318_v44  ;;  %v6550_v44 = vsel %vm729_vm0, %v15480_v49, 0  ;;  %v9973_v49 = vld [vmem:[%s17268_s5 + $0x2] ss:$0 sm:$0xff] }
 0x6c6   :  { %v6202_v41 = vsel %vm1410_vm3, %v6200_v26, %v6201_v51  ;;  %v6204_v35 = vsel %vm1410_vm3, %v6201_v51, %v6203_v46 }
 0x6c7   :  { %17963 = vst [vmem:[#allocation49_spill] sm:$0xff] %v16148_v1  ;;  %v16162_v45 = vpack.c.bf16 %v6204_v35, %v6202_v41  ;;  %v17968_v41 = vunpack.c.l.bf16 %v15344_v53 }
 0x6c9   :  { %v6195_v35 = vrot.slane %v17968_v41, 2 }
 0x6cc   :  { %11618 = vmatmul.mubr.msk.bf16.gmra.mrb[64].mxu1 %vm632_vm2, %v16132_v59 }
 0x6cd   :  { %11621 = vmatprep.mubr.msk.bf16.mxu1 %vm632_vm2, %v16134_v36 }
 0x6d4   :  { %11622 = vmatmul.mubr.msk.bf16.gmra.mrb[68].mxu1 %vm632_vm2, %v16148_v1 }
 0x6d5   :  { %11627 = vmatprep.mubr.msk.bf16.mxu1 %vm632_vm2, %v15344_v53 }
 0x6dc   :  { %11628 = vmatmul.mubr.msk.bf16.vlgmr.msra.gmra.mrb[8].mxu1 %vm632_vm2, %v15363_v17 }
 0x6dd   :  { %11692 = vmatpush3.bf16.msra.mxu1 %v6550_v44  ;;  %11631 = vmatprep.mubr.msk.bf16.mxu1 %vm632_vm2, %v15376_v11  ;;  %v17969_v44 = vunpack.c.h.bf16 %v15344_v53  ;;  %v17972_v53 = vunpack.c.h.bf16 %v15376_v11 }
 0x6de   :  { %13209 = vmatprep.subr.msk.bf16.mxu1 %vm729_vm0, %v10112_v52 }
 0x6e4   :  { %11632 = vmatmul.mubr.msk.bf16.gmra.mrb[12].mxu1 %vm632_vm2, %v15401_v48 }
 0x6e5   :  { %11635 = vmatprep.mubr.msk.bf16.mxu1 %vm632_vm2, %v15417_v0 }
 0x6ec   :  { %11636 = vmatmul.mubr.msk.bf16.gmra.mrb[16].mxu1 %vm632_vm2, %v15457_v50 }
 0x6ed   :  { %11639 = vmatprep.mubr.msk.bf16.mxu1 %vm632_vm2, %v15470_v39 }
 0x6f4   :  { %11640 = vmatmul.mubr.msk.bf16.gmra.mrb[20].mxu1 %vm632_vm2, %v15511_v56 }
 0x6f5   :  { %11643 = vmatprep.mubr.msk.bf16.mxu1 %vm632_vm2, %v15527_v4 }
 0x6fc   :  { %11644 = vmatmul.mubr.msk.bf16.gmra.mrb[24].mxu1 %vm632_vm2, %v15565_v24 }
 0x6fd   :  { %11647 = vmatprep.mubr.msk.bf16.mxu1 %vm632_vm2, %v15577_v5 }
 0x704   :  { %11648 = vmatmul.mubr.msk.bf16.gmra.mrb[28].mxu1 %vm632_vm2, %v15611_v55 }
 0x705   :  { %11651 = vmatprep.mubr.msk.bf16.mxu1 %vm632_vm2, %v15627_v8 }
 0x70c   :  { %11652 = vmatmul.mubr.msk.bf16.gmra.mrb[32].mxu1 %vm632_vm2, %v15665_v38 }
 0x70d   :  { %11655 = vmatprep.mubr.msk.bf16.mxu1 %vm632_vm2, %v15677_v40 }
 0x714   :  { %11656 = vmatmul.mubr.msk.bf16.gmra.mrb[36].mxu1 %vm632_vm2, %v15711_v7 }
 0x715   :  { %11659 = vmatprep.mubr.msk.bf16.mxu1 %vm632_vm2, %v15727_v30 }
 0x71c   :  { %11660 = vmatmul.mubr.msk.bf16.gmra.mrb[40].mxu1 %vm632_vm2, %v15765_v12 }
 0x71d   :  { %11663 = vmatprep.mubr.msk.bf16.mxu1 %vm632_vm2, %v15777_v60 }
 0x724   :  { %11664 = vmatmul.mubr.msk.bf16.gmra.mrb[44].mxu1 %vm632_vm2, %v15809_v6 }
 0x725   :  { %11667 = vmatprep.mubr.msk.bf16.mxu1 %vm632_vm2, %v15825_v33 }
 0x727   :  { %v4806_v22 = vpop.f32.mrb[4].mxu1 }
 0x728   :  { %v16213_v46 = vadd.f32 %v9973_v49, %v4806_v22  ;;  %v11557_v23 = vpop.f32.mrb[5].mxu1  ;;  %v6196_v49 = vrot.slane %v17969_v44, 2  ;;  %v17970_v22 = vunpack.c.l.bf16 %v15349_v18  ;;  %v6206_v44 = vrot.slane %v17972_v53, 2 }
 0x729   :  { %v4809_v2 = vpop.f32.mrb[6].mxu1  ;;  %v17973_v18 = vunpack.c.l.bf16 %v15381_v13  ;;  %v17976_v13 = vunpack.c.l.bf16 %v15412_v58 }
 0x72a   :  { %17967 = vst [vmem:[#allocation35_spill] sm:$0xff] %v16213_v46  ;;  %v11558_v26 = vpop.f32.mrb[7].mxu1  ;;  %v9595_v42 = vmul.f32 %v16213_v46, %v16213_v46  ;;  %v6198_v23 = vrot.slane %v17970_v22, 2  ;;  %v6197_v2 = vsel %vm1410_vm3, %v6195_v35, %v6196_v49  ;;  %v17977_v46 = vunpack.c.l.bf16 %v15417_v0 }
 0x72b   :  { %v6208_v22 = vrot.slane %v17973_v18, 2  ;;  %v6213_v53 = vrot.slane %v17976_v13, 2  ;;  %v6916_v18 = vsel %vm729_vm0, %v10112_v52, 0 }
 0x72c   :  { %11668 = vmatmul.mubr.msk.bf16.gmra.mrb[48].mxu1 %vm632_vm2, %v15862_v25  ;;  %v9597_v51 = vsel %vm9596_vm8, %v9595_v42, 0.0  ;;  %v6199_v26 = vsel %vm1410_vm3, %v6196_v49, %v6198_v23  ;;  %v17974_v23 = vunpack.c.l.bf16 %v15401_v48 }
 0x72d   :  { %9598 = vadd.xlane.f32.xlu0 %v9597_v51  ;;  %11671 = vmatprep.mubr.msk.bf16.mxu1 %vm632_vm2, %v15874_v57  ;;  %v6419_v42 = vpack.c.bf16 %v6199_v26, %v6197_v2  ;;  %v17971_v51 = vunpack.c.l.bf16 %v15376_v11  ;;  %v6209_v35 = vsel %vm1410_vm3, %v6206_v44, %v6208_v22  ;;  %v17975_v26 = vunpack.c.h.bf16 %v15401_v48  ;;  %v16275_v22 = vld [vmem:[%s17265_s2 + $0x1a] sm:$0x3] }
 0x72e   :  { %v6210_v2 = vrot.slane %v17974_v23, 2 }
 0x72f   :  { %v6205_v41 = vrot.slane %v17971_v51, 2  ;;  %v6211_v51 = vrot.slane %v17975_v26, 2  ;;  %v17981_v26 = vunpack.c.l.bf16 %v15457_v50 }
 0x731   :  { %v6207_v32 = vsel %vm1410_vm3, %v6205_v41, %v6206_v44  ;;  %v17978_v41 = vunpack.c.h.bf16 %v15417_v0  ;;  %v6212_v58 = vsel %vm1410_vm3, %v6210_v2, %v6211_v51  ;;  %v6214_v52 = vsel %vm1410_vm3, %v6211_v51, %v6213_v53 }
 0x732   :  { %v16257_v49 = vpack.c.bf16 %v6209_v35, %v6207_v32  ;;  %v17979_v32 = vunpack.c.l.bf16 %v15425_v28  ;;  %v16287_v35 = vpack.c.bf16 %v6214_v52, %v6212_v58  ;;  %v6220_v13 = vrot.slane %v17981_v26, 2 }
 0x733   :  { %v6216_v1 = vrot.slane %v17978_v41, 2  ;;  %v17983_v2 = vunpack.c.l.bf16 %v15465_v29  ;;  %v17984_v53 = vunpack.c.l.bf16 %v15470_v39 }
 0x734   :  { %11672 = vmatmul.mubr.msk.bf16.gmra.mrb[52].mxu1 %vm632_vm2, %v15908_v43  ;;  %v6218_v44 = vrot.slane %v17979_v32, 2 }
 0x735   :  { %11675 = vmatprep.mubr.msk.bf16.mxu1 %vm632_vm2, %v15924_v16  ;;  %v6223_v51 = vrot.slane %v17983_v2, 2 }
 0x736   :  { %v6219_v28 = vsel %vm1410_vm3, %v6216_v1, %v6218_v44  ;;  %v17986_v44 = vunpack.c.l.bf16 %v15475_v27  ;;  %v17987_v27 = vunpack.c.l.bf16 %v15511_v56 }
 0x738   :  { %v6228_v58 = vrot.slane %v17986_v44, 2  ;;  %v6230_v2 = vrot.slane %v17987_v27, 2  ;;  %v17989_v44 = vunpack.c.l.bf16 %v15522_v9 }
 0x73c   :  { %11676 = vmatmul.mubr.msk.bf16.gmra.mrb[56].mxu1 %vm632_vm2, %v15962_v21 }
 0x73d   :  { %11679 = vmatprep.mubr.msk.bf16.mxu1 %vm632_vm2, %v15974_v34 }
 0x744   :  { %11680 = vmatmul.mubr.msk.bf16.gmra.mrb[60].mxu1 %vm632_vm2, %v16008_v3 }
 0x745   :  { %11683 = vmatprep.mubr.msk.bf16.mxu1 %vm632_vm2, %v16024_v10 }
 0x74c   :  { %11684 = vmatmul.mubr.msk.bf16.gmra.mrb[64].mxu1 %vm632_vm2, %v16062_v54 }
 0x74d   :  { %11687 = vmatprep.mubr.msk.bf16.mxu1 %vm632_vm2, %v16074_v47 }
 0x754   :  { %11688 = vmatmul.mubr.msk.bf16.gmra.mrb[68].mxu1 %vm632_vm2, %v16114_v61 }
 0x755   :  { %11693 = vmatprep.mubr.msk.bf16.mxu1 %vm632_vm2, %v6419_v42  ;;  %v6215_v42 = vrot.slane %v17977_v46, 2 }
 0x757   :  { %v6217_v46 = vsel %vm1410_vm3, %v6215_v42, %v6216_v1  ;;  %v6225_v42 = vrot.slane %v17984_v53, 2  ;;  %v17985_v1 = vunpack.c.h.bf16 %v15470_v39  ;;  %v17988_v53 = vunpack.c.h.bf16 %v15511_v56 }
 0x758   :  { %v16289_v23 = vpack.c.bf16 %v6219_v28, %v6217_v46 }
 0x759   :  { %v6226_v32 = vrot.slane %v17985_v1, 2  ;;  %v6231_v1 = vrot.slane %v17988_v53, 2 }
 0x75a   :  { %17980 = vst [vmem:[#allocation38_spill] sm:$0xff] %v16289_v23 }
 0x75b   :  { %v6227_v46 = vsel %vm1410_vm3, %v6225_v42, %v6226_v32  ;;  %v6229_v28 = vsel %vm1410_vm3, %v6226_v32, %v6228_v58  ;;  %v17992_v32 = vunpack.c.l.bf16 %v15532_v37  ;;  %v17993_v37 = vunpack.c.l.bf16 %v15565_v24 }
 0x75c   :  { %11694 = vmatmul.mubr.msk.bf16.vlgmr.msra.gmra.mrb[8].mxu1 %vm632_vm2, %v16162_v45 }
 0x75d   :  { %11758 = vmatpush3.bf16.msra.mxu1 %v6916_v18  ;;  %11697 = vmatprep.mubr.msk.bf16.mxu1 %vm632_vm2, %v16257_v49  ;;  %v17982_v18 = vunpack.c.h.bf16 %v15457_v50  ;;  %v6238_v58 = vrot.slane %v17992_v32, 2  ;;  %v6240_v53 = vrot.slane %v17993_v37, 2 }
 0x75e   :  { %13210 = vmatprep.subr.msk.bf16.mxu1 %vm729_vm0, %v16275_v22 }
 0x75f   :  { %v6221_v41 = vrot.slane %v17982_v18, 2  ;;  %v16313_v18 = vpack.c.bf16 %v6229_v28, %v6227_v46 }
 0x761   :  { %v6222_v52 = vsel %vm1410_vm3, %v6220_v13, %v6221_v41  ;;  %v6224_v29 = vsel %vm1410_vm3, %v6221_v41, %v6223_v51  ;;  %v17990_v13 = vunpack.c.l.bf16 %v15527_v4  ;;  %v17991_v51 = vunpack.c.h.bf16 %v15527_v4 }
 0x762   :  { %v16311_v26 = vpack.c.bf16 %v6224_v29, %v6222_v52  ;;  %v6232_v52 = vsel %vm1410_vm3, %v6230_v2, %v6231_v1  ;;  %v17996_v2 = vunpack.c.l.bf16 %v15577_v5 }
 0x763   :  { %v6235_v41 = vrot.slane %v17990_v13, 2  ;;  %v6236_v42 = vrot.slane %v17991_v51, 2  ;;  %v17995_v51 = vunpack.c.l.bf16 %v15572_v62 }
 0x764   :  { %11698 = vmatmul.mubr.msk.bf16.gmra.mrb[12].mxu1 %vm632_vm2, %v16287_v35 }
 0x765   :  { %11701 = vmatprep.mubr.msk.bf16.mxu1 %vm632_vm2, %v16289_v23  ;;  %v6233_v23 = vrot.slane %v17989_v44, 2  ;;  %v6237_v29 = vsel %vm1410_vm3, %v6235_v41, %v6236_v42  ;;  %v6239_v46 = vsel %vm1410_vm3, %v6236_v42, %v6238_v58  ;;  %v17994_v44 = vunpack.c.h.bf16 %v15565_v24 }
 0x766   :  { %v16337_v27 = vpack.c.bf16 %v6239_v46, %v6237_v29  ;;  %v6243_v32 = vrot.slane %v17995_v51, 2  ;;  %v17998_v42 = vunpack.c.l.bf16 %v15582_v19  ;;  %v18000_v19 = vunpack.c.l.bf16 %v15611_v55 }
 0x767   :  { %v6234_v9 = vsel %vm1410_vm3, %v6231_v1, %v6233_v23  ;;  %v6241_v13 = vrot.slane %v17994_v44, 2  ;;  %v6245_v23 = vrot.slane %v17996_v2, 2  ;;  %v17997_v1 = vunpack.c.h.bf16 %v15577_v5 }
 0x768   :  { %v16335_v28 = vpack.c.bf16 %v6234_v9, %v6232_v52  ;;  %v6248_v58 = vrot.slane %v17998_v42, 2  ;;  %v6250_v44 = vrot.slane %v18000_v19, 2  ;;  %v18001_v51 = vunpack.c.h.bf16 %v15611_v55 }
 0x769   :  { %v6246_v41 = vrot.slane %v17997_v1, 2  ;;  %v6242_v52 = vsel %vm1410_vm3, %v6240_v53, %v6241_v13  ;;  %v6244_v62 = vsel %vm1410_vm3, %v6241_v13, %v6243_v32  ;;  %v18002_v1 = vunpack.c.l.bf16 %v15622_v14 }
 0x76a   :  { %v16359_v46 = vpack.c.bf16 %v6244_v62, %v6242_v52  ;;  %v6251_v2 = vrot.slane %v18001_v51, 2  ;;  %v18003_v53 = vunpack.c.l.bf16 %v15627_v8  ;;  %v18004_v32 = vunpack.c.h.bf16 %v15627_v8 }
 0x76b   :  { %v6247_v9 = vsel %vm1410_vm3, %v6245_v23, %v6246_v41  ;;  %v6249_v29 = vsel %vm1410_vm3, %v6246_v41, %v6248_v58  ;;  %v6253_v42 = vrot.slane %v18002_v1, 2  ;;  %v18005_v41 = vunpack.c.l.bf16 %v15632_v31 }
 0x76c   :  { %11702 = vmatmul.mubr.msk.bf16.gmra.mrb[16].mxu1 %vm632_vm2, %v16311_v26  ;;  %v16361_v37 = vpack.c.bf16 %v6249_v29, %v6247_v9  ;;  %v6255_v13 = vrot.slane %v18003_v53, 2  ;;  %v6256_v23 = vrot.slane %v18004_v32, 2  ;;  %v6252_v52 = vsel %vm1410_vm3, %v6250_v44, %v6251_v2  ;;  %v18010_v32 = vld [vmem:[#allocation19_spill] sm:$0xff] }
 0x76d   :  { %11705 = vmatprep.mubr.msk.bf16.mxu1 %vm632_vm2, %v16313_v18  ;;  %v6258_v58 = vrot.slane %v18005_v41, 2  ;;  %v6254_v14 = vsel %vm1410_vm3, %v6251_v2, %v6253_v42  ;;  %v18008_v31 = vunpack.c.l.bf16 %v15665_v38  ;;  %v18009_v1 = vunpack.c.h.bf16 %v15665_v38 }
 0x76e   :  { %17999 = vst [vmem:[#allocation53_spill] sm:$0xff] %v16361_v37  ;;  %v6257_v62 = vsel %vm1410_vm3, %v6255_v13, %v6256_v23  ;;  %v16383_v29 = vpack.c.bf16 %v6254_v14, %v6252_v52  ;;  %v18011_v41 = vunpack.c.l.bf16 %v18010_v32  ;;  %v18012_v44 = vunpack.c.l.bf16 %v15677_v40 }
 0x76f   :  { %v6259_v9 = vsel %vm1410_vm3, %v6256_v23, %v6258_v58  ;;  %v6260_v51 = vrot.slane %v18008_v31, 2  ;;  %v6261_v53 = vrot.slane %v18009_v1, 2  ;;  %v18013_v42 = vunpack.c.h.bf16 %v15677_v40  ;;  %v18014_v23 = vld [vmem:[#allocation20_spill] sm:$0xff] }
 0x770   :  { %18006 = vst [vmem:[#allocation54_spill] sm:$0xff] %v16383_v29  ;;  %v16385_v19 = vpack.c.bf16 %v6259_v9, %v6257_v62  ;;  %v6265_v2 = vrot.slane %v18012_v44, 2  ;;  %v18015_v58 = vunpack.c.l.bf16 %v18014_v23 }
 0x771   :  { %v6266_v13 = vrot.slane %v18013_v42, 2  ;;  %v6262_v14 = vsel %vm1410_vm3, %v6260_v51, %v6261_v53  ;;  %v18019_v42 = vunpack.c.h.bf16 %v15711_v7  ;;  %v18022_v51 = vunpack.c.l.bf16 %v15727_v30 }
 0x772   :  { %18007 = vst [vmem:[#allocation55_spill] sm:$0xff] %v16385_v19  ;;  %v6268_v52 = vrot.slane %v18015_v58, 2  ;;  %v18020_v58 = vld [vmem:[#allocation26_spill] sm:$0xff] }
 0x773   :  { %v6267_v9 = vsel %vm1410_vm3, %v6265_v2, %v6266_v13  ;;  %v6271_v23 = vrot.slane %v18019_v42, 2  ;;  %v18026_v42 = vunpack.c.l.bf16 %v15765_v12 }
 0x774   :  { %11706 = vmatmul.mubr.msk.bf16.gmra.mrb[20].mxu1 %vm632_vm2, %v16335_v28  ;;  %v6269_v31 = vsel %vm1410_vm3, %v6266_v13, %v6268_v52  ;;  %v18024_v13 = vld [vmem:[#allocation27_spill] sm:$0xff] }
 0x775   :  { %11709 = vmatprep.mubr.msk.bf16.mxu1 %vm632_vm2, %v16337_v27  ;;  %v16409_v32 = vpack.c.bf16 %v6269_v31, %v6267_v9  ;;  %v18025_v52 = vunpack.c.l.bf16 %v18024_v13  ;;  %v18028_v13 = vld [vmem:[#allocation34_spill] sm:$0xff] }
 0x777   :  { %18017 = vst [vmem:[#allocation20_spill] sm:$0xff] %v16409_v32 }
 0x77c   :  { %11710 = vmatmul.mubr.msk.bf16.gmra.mrb[24].mxu1 %vm632_vm2, %v16359_v46 }
 0x77d   :  { %11713 = vmatprep.mubr.msk.bf16.mxu1 %vm632_vm2, %v16361_v37  ;;  %v6263_v37 = vrot.slane %v18011_v41, 2  ;;  %v18018_v41 = vunpack.c.l.bf16 %v15711_v7 }
 0x77f   :  { %v6264_v62 = vsel %vm1410_vm3, %v6261_v53, %v6263_v37  ;;  %v6270_v44 = vrot.slane %v18018_v41, 2  ;;  %v6275_v37 = vrot.slane %v18022_v51, 2  ;;  %v18023_v53 = vunpack.c.h.bf16 %v15727_v30 }
 0x780   :  { %v16407_v1 = vpack.c.bf16 %v6264_v62, %v6262_v14  ;;  %v6278_v14 = vrot.slane %v18025_v52, 2  ;;  %v18027_v51 = vunpack.c.h.bf16 %v15765_v12  ;;  %v18029_v52 = vunpack.c.l.bf16 %v18028_v13 }
 0x781   :  { %v6276_v2 = vrot.slane %v18023_v53, 2  ;;  %v6272_v62 = vsel %vm1410_vm3, %v6270_v44, %v6271_v23  ;;  %v18030_v44 = vunpack.c.l.bf16 %v15777_v60  ;;  %v18036_v13 = vunpack.c.l.bf16 %v15809_v6 }
 0x782   :  { %18016 = vst [vmem:[#allocation19_spill] sm:$0xff] %v16407_v1  ;;  %v6281_v53 = vrot.slane %v18027_v51, 2 }
 0x783   :  { %v6279_v31 = vsel %vm1410_vm3, %v6276_v2, %v6278_v14 }
 0x784   :  { %11714 = vmatmul.mubr.msk.bf16.gmra.mrb[28].mxu1 %vm632_vm2, %v16383_v29 }
 0x785   :  { %11717 = vmatprep.mubr.msk.bf16.mxu1 %vm632_vm2, %v16385_v19  ;;  %v18021_v19 = vunpack.c.l.bf16 %v18020_v58  ;;  %v6280_v58 = vrot.slane %v18026_v42, 2 }
 0x787   :  { %v6273_v29 = vrot.slane %v18021_v19, 2  ;;  %v6277_v19 = vsel %vm1410_vm3, %v6275_v37, %v6276_v2  ;;  %v18032_v37 = vld [vmem:[#allocation6_spill] sm:$0xff] }
 0x788   :  { %v6435_v30 = vpack.c.bf16 %v6279_v31, %v6277_v19  ;;  %v18033_v2 = vunpack.c.l.bf16 %v18032_v37  ;;  %v18038_v37 = vld [vmem:[#allocation8_spill] sm:$0xff] }
 0x789   :  { %v6274_v9 = vsel %vm1410_vm3, %v6271_v23, %v6273_v29  ;;  %v18031_v29 = vunpack.c.h.bf16 %v15777_v60 }
 0x78a   :  { %v16431_v41 = vpack.c.bf16 %v6274_v9, %v6272_v62  ;;  %v6288_v14 = vrot.slane %v18033_v2, 2  ;;  %v6282_v62 = vsel %vm1410_vm3, %v6280_v58, %v6281_v53  ;;  %v18040_v58 = vunpack.c.l.bf16 %v15825_v33 }
 0x78b   :  { %v6286_v23 = vrot.slane %v18031_v29, 2 }
 0x78c   :  { %11718 = vmatmul.mubr.msk.bf16.gmra.mrb[32].mxu1 %vm632_vm2, %v16407_v1  ;;  %v6285_v1 = vrot.slane %v18030_v44, 2  ;;  %v18037_v44 = vunpack.c.h.bf16 %v15809_v6 }
 0x78d   :  { %11721 = vmatprep.mubr.msk.bf16.mxu1 %vm632_vm2, %v16409_v32  ;;  %v6283_v32 = vrot.slane %v18029_v52, 2  ;;  %v6289_v31 = vsel %vm1410_vm3, %v6286_v23, %v6288_v14  ;;  %v6290_v52 = vrot.slane %v18036_v13, 2 }
 0x78e   :  { %v6287_v19 = vsel %vm1410_vm3, %v6285_v1, %v6286_v23  ;;  %v6291_v29 = vrot.slane %v18037_v44, 2  ;;  %v18041_v1 = vunpack.c.h.bf16 %v15825_v33  ;;  %v18042_v23 = vld [vmem:[#allocation9_spill] sm:$0xff] }
 0x78f   :  { %v6284_v9 = vsel %vm1410_vm3, %v6281_v53, %v6283_v32  ;;  %v16454_v51 = vpack.c.bf16 %v6289_v31, %v6287_v19  ;;  %v6295_v32 = vrot.slane %v18040_v58, 2  ;;  %v18043_v14 = vunpack.c.l.bf16 %v18042_v23 }
 0x790   :  { %v16452_v42 = vpack.c.bf16 %v6284_v9, %v6282_v62  ;;  %v6296_v53 = vrot.slane %v18041_v1, 2  ;;  %v6292_v9 = vsel %vm1410_vm3, %v6290_v52, %v6291_v29  ;;  %v18047_v1 = vunpack.c.h.bf16 %v15862_v25 }
 0x791   :  { %18035 = vst [vmem:[#allocation27_spill] sm:$0xff] %v16454_v51  ;;  %v6298_v62 = vrot.slane %v18043_v14, 2  ;;  %v18048_v14 = vld [vmem:[#allocation12_spill] sm:$0xff]  ;;  %v18050_v52 = vunpack.c.l.bf16 %v15874_v57 }
 0x792   :  { %18034 = vst [vmem:[#allocation26_spill] sm:$0xff] %v16452_v42  ;;  %v6297_v31 = vsel %vm1410_vm3, %v6295_v32, %v6296_v53  ;;  %v6301_v23 = vrot.slane %v18047_v1, 2 }
 0x793   :  { %v6299_v13 = vsel %vm1410_vm3, %v6296_v53, %v6298_v62  ;;  %v18052_v53 = vld [vmem:[#allocation13_spill] sm:$0xff] }
 0x794   :  { %11722 = vmatmul.mubr.msk.bf16.gmra.mrb[36].mxu1 %vm632_vm2, %v16431_v41  ;;  %v18053_v62 = vunpack.c.l.bf16 %v18052_v53 }
 0x795   :  { %11725 = vmatprep.mubr.msk.bf16.mxu1 %vm632_vm2, %v6435_v30  ;;  %v18039_v30 = vunpack.c.l.bf16 %v18038_v37  ;;  %v16478_v37 = vpack.c.bf16 %v6299_v13, %v6297_v31 }
 0x797   :  { %v6293_v2 = vrot.slane %v18039_v30, 2  ;;  %18045 = vst [vmem:[#allocation6_spill] sm:$0xff] %v16478_v37  ;;  %v18046_v30 = vunpack.c.l.bf16 %v15862_v25 }
 0x799   :  { %v6294_v19 = vsel %vm1410_vm3, %v6291_v29, %v6293_v2  ;;  %v6300_v58 = vrot.slane %v18046_v30, 2  ;;  %v6305_v29 = vrot.slane %v18050_v52, 2  ;;  %v18051_v2 = vunpack.c.h.bf16 %v15874_v57 }
 0x79a   :  { %v16476_v44 = vpack.c.bf16 %v6294_v19, %v6292_v9  ;;  %v6308_v9 = vrot.slane %v18053_v62, 2  ;;  %v18058_v62 = vld [vmem:[#allocation18_spill] sm:$0xff] }
 0x79b   :  { %v6306_v32 = vrot.slane %v18051_v2, 2  ;;  %v6302_v19 = vsel %vm1410_vm3, %v6300_v58, %v6301_v23  ;;  %v18057_v2 = vunpack.c.h.bf16 %v15908_v43  ;;  %v18060_v58 = vunpack.c.l.bf16 %v15924_v16 }
 0x79c   :  { %11726 = vmatmul.mubr.msk.bf16.gmra.mrb[40].mxu1 %vm632_vm2, %v16452_v42  ;;  %18044 = vst [vmem:[#allocation34_spill] sm:$0xff] %v16476_v44 }
 0x79d   :  { %11729 = vmatprep.mubr.msk.bf16.mxu1 %vm632_vm2, %v16454_v51  ;;  %v18049_v51 = vunpack.c.l.bf16 %v18048_v14  ;;  %v6309_v13 = vsel %vm1410_vm3, %v6306_v32, %v6308_v9  ;;  %v18056_v14 = vunpack.c.l.bf16 %v15908_v43  ;;  %v6311_v53 = vrot.slane %v18057_v2, 2 }
 0x79f   :  { %v6303_v42 = vrot.slane %v18049_v51, 2  ;;  %v6307_v51 = vsel %vm1410_vm3, %v6305_v29, %v6306_v32  ;;  %v6310_v52 = vrot.slane %v18056_v14, 2  ;;  %v18062_v32 = vld [vmem:[#allocation21_spill] sm:$0xff] }
 0x7a0   :  { %v16502_v1 = vpack.c.bf16 %v6309_v13, %v6307_v51  ;;  %v18063_v9 = vunpack.c.l.bf16 %v18062_v32 }
 0x7a1   :  { %v6304_v31 = vsel %vm1410_vm3, %v6301_v23, %v6303_v42  ;;  %v6315_v42 = vrot.slane %v18060_v58, 2  ;;  %v18061_v23 = vunpack.c.h.bf16 %v15924_v16 }
 0x7a2   :  { %v16500_v30 = vpack.c.bf16 %v6304_v31, %v6302_v19  ;;  %18055 = vst [vmem:[#allocation9_spill] sm:$0xff] %v16502_v1  ;;  %v6318_v19 = vrot.slane %v18063_v9, 2  ;;  %v6312_v31 = vsel %vm1410_vm3, %v6310_v52, %v6311_v53  ;;  %v18068_v9 = vld [vmem:[#allocation39_spill] sm:$0xff]  ;;  %v18070_v52 = vunpack.c.l.bf16 %v15974_v34 }
 0x7a3   :  { %v6316_v29 = vrot.slane %v18061_v23, 2  ;;  %v18067_v23 = vunpack.c.h.bf16 %v15962_v21 }
 0x7a4   :  { %11730 = vmatmul.mubr.msk.bf16.gmra.mrb[44].mxu1 %vm632_vm2, %v16476_v44  ;;  %18054 = vst [vmem:[#allocation8_spill] sm:$0xff] %v16500_v30 }
 0x7a5   :  { %11733 = vmatprep.mubr.msk.bf16.mxu1 %vm632_vm2, %v16478_v37  ;;  %v18059_v37 = vunpack.c.l.bf16 %v18058_v62  ;;  %v6319_v13 = vsel %vm1410_vm3, %v6316_v29, %v6318_v19  ;;  %v18066_v62 = vunpack.c.l.bf16 %v15962_v21  ;;  %v6321_v32 = vrot.slane %v18067_v23, 2 }
 0x7a7   :  { %v6313_v44 = vrot.slane %v18059_v37, 2  ;;  %v6317_v37 = vsel %vm1410_vm3, %v6315_v42, %v6316_v29  ;;  %v6320_v58 = vrot.slane %v18066_v62, 2  ;;  %v18072_v29 = vld [vmem:[#allocation29_spill] sm:$0xff] }
 0x7a8   :  { %v16526_v2 = vpack.c.bf16 %v6319_v13, %v6317_v37  ;;  %v18073_v19 = vunpack.c.l.bf16 %v18072_v29 }
 0x7a9   :  { %v6314_v51 = vsel %vm1410_vm3, %v6311_v53, %v6313_v44  ;;  %v6325_v44 = vrot.slane %v18070_v52, 2  ;;  %v18071_v53 = vunpack.c.h.bf16 %v15974_v34 }
 0x7aa   :  { %v16524_v14 = vpack.c.bf16 %v6314_v51, %v6312_v31  ;;  %18065 = vst [vmem:[#allocation13_spill] sm:$0xff] %v16526_v2  ;;  %v6328_v31 = vrot.slane %v18073_v19, 2  ;;  %v6322_v51 = vsel %vm1410_vm3, %v6320_v58, %v6321_v32  ;;  %v18077_v19 = vld [vmem:[#allocation36_spill] sm:$0xff]  ;;  %v18079_v58 = vunpack.c.l.bf16 %v16024_v10 }
 0x7ab   :  { %v6326_v42 = vrot.slane %v18071_v53, 2  ;;  %v18076_v53 = vunpack.c.h.bf16 %v16008_v3 }
 0x7ac   :  { %11734 = vmatmul.mubr.msk.bf16.gmra.mrb[48].mxu1 %vm632_vm2, %v16500_v30  ;;  %18064 = vst [vmem:[#allocation12_spill] sm:$0xff] %v16524_v14 }
 0x7ad   :  { %11737 = vmatprep.mubr.msk.bf16.mxu1 %vm632_vm2, %v16502_v1  ;;  %v18069_v1 = vunpack.c.l.bf16 %v18068_v9  ;;  %v6329_v13 = vsel %vm1410_vm3, %v6326_v42, %v6328_v31  ;;  %v18075_v9 = vunpack.c.l.bf16 %v16008_v3  ;;  %v6331_v29 = vrot.slane %v18076_v53, 2 }
 0x7af   :  { %v6323_v30 = vrot.slane %v18069_v1, 2  ;;  %v6327_v1 = vsel %vm1410_vm3, %v6325_v44, %v6326_v42  ;;  %v6330_v52 = vrot.slane %v18075_v9, 2  ;;  %v18081_v42 = vld [vmem:[#allocation37_spill] sm:$0xff] }
 0x7b0   :  { %v16550_v23 = vpack.c.bf16 %v6329_v13, %v6327_v1  ;;  %v18082_v31 = vunpack.c.l.bf16 %v18081_v42 }
 0x7b1   :  { %v6324_v37 = vsel %vm1410_vm3, %v6321_v32, %v6323_v30  ;;  %v6335_v30 = vrot.slane %v18079_v58, 2  ;;  %v18080_v32 = vunpack.c.h.bf16 %v16024_v10 }
 0x7b2   :  { %v16548_v62 = vpack.c.bf16 %v6324_v37, %v6322_v51  ;;  %18074 = vst [vmem:[#allocation18_spill] sm:$0xff] %v16550_v23  ;;  %v6338_v51 = vrot.slane %v18082_v31, 2  ;;  %v6332_v37 = vsel %vm1410_vm3, %v6330_v52, %v6331_v29  ;;  %v18087_v31 = vunpack.c.l.bf16 %v16069_v63 }
 0x7b3   :  { %v6336_v44 = vrot.slane %v18080_v32, 2  ;;  %v18086_v32 = vunpack.c.h.bf16 %v16062_v54  ;;  %v18088_v52 = vunpack.c.l.bf16 %v16074_v47 }
 0x7b4   :  { %11738 = vmatmul.mubr.msk.bf16.gmra.mrb[52].mxu1 %vm632_vm2, %v16524_v14 }
 0x7b5   :  { %11741 = vmatprep.mubr.msk.bf16.mxu1 %vm632_vm2, %v16526_v2  ;;  %v18078_v2 = vunpack.c.l.bf16 %v18077_v19  ;;  %v6339_v13 = vsel %vm1410_vm3, %v6336_v44, %v6338_v51  ;;  %v18085_v19 = vunpack.c.l.bf16 %v16062_v54  ;;  %v6341_v42 = vrot.slane %v18086_v32, 2 }
 0x7b7   :  { %v6333_v14 = vrot.slane %v18078_v2, 2  ;;  %v6337_v2 = vsel %vm1410_vm3, %v6335_v30, %v6336_v44  ;;  %v6340_v58 = vrot.slane %v18085_v19, 2  ;;  %v18090_v44 = vld [vmem:[#allocation44_spill] sm:$0xff] }
 0x7b8   :  { %v16574_v53 = vpack.c.bf16 %v6339_v13, %v6337_v2  ;;  %v18091_v51 = vunpack.c.l.bf16 %v18090_v44 }
 0x7b9   :  { %v6334_v1 = vsel %vm1410_vm3, %v6331_v29, %v6333_v14  ;;  %v6345_v14 = vrot.slane %v18088_v52, 2  ;;  %v18089_v29 = vunpack.c.h.bf16 %v16074_v47 }
 0x7ba   :  { %v16572_v9 = vpack.c.bf16 %v6334_v1, %v6332_v37  ;;  %18084 = vst [vmem:[#allocation39_spill] sm:$0xff] %v16574_v53  ;;  %v6348_v37 = vrot.slane %v18091_v51, 2  ;;  %v6342_v1 = vsel %vm1410_vm3, %v6340_v58, %v6341_v42  ;;  %v18094_v51 = vunpack.c.l.bf16 %v16119_v15 }
 0x7bb   :  { %v6346_v30 = vrot.slane %v18089_v29, 2  ;;  %v18093_v29 = vunpack.c.h.bf16 %v16114_v61  ;;  %v7302_v15 = vsel %vm729_vm0, %v16275_v22, 0  ;;  %v18095_v22 = vld [vmem:[#allocation42_spill] sm:$0xff] }
 0x7bc   :  { %11742 = vmatmul.mubr.msk.bf16.gmra.mrb[56].mxu1 %vm632_vm2, %v16548_v62  ;;  %18083 = vst [vmem:[#allocation21_spill] sm:$0xff] %v16572_v9 }
 0x7bd   :  { %11745 = vmatprep.mubr.msk.bf16.mxu1 %vm632_vm2, %v16550_v23  ;;  %v6343_v23 = vrot.slane %v18087_v31, 2  ;;  %v6347_v2 = vsel %vm1410_vm3, %v6345_v14, %v6346_v30  ;;  %v6349_v13 = vsel %vm1410_vm3, %v6346_v30, %v6348_v37  ;;  %v18092_v31 = vunpack.c.l.bf16 %v16114_v61  ;;  %v10178_v14 = vld [vmem:[%s17265_s2 + $0x1c] sm:$0x3]  ;;  %v16702_v30 = vld [vmem:[%s17265_s2 + $0x1e] sm:$0x3] }
 0x7be   :  { %v16598_v32 = vpack.c.bf16 %v6349_v13, %v6347_v2  ;;  %v6351_v44 = vrot.slane %v18093_v29, 2  ;;  %v18096_v37 = vld [vmem:[#allocation43_spill] sm:$0xff]  ;;  %v18099_v2 = vld [vmem:[#allocation28_spill] sm:$0xff]  ;;  %v18100_v13 = vld [vmem:[#allocation50_spill] sm:$0xff] }
 0x7bf   :  { %v6344_v63 = vsel %vm1410_vm3, %v6341_v42, %v6343_v23  ;;  %v6350_v52 = vrot.slane %v18092_v31, 2  ;;  %v18101_v31 = vld [vmem:[#allocation51_spill] sm:$0xff] }
 0x7c0   :  { %v16596_v19 = vpack.c.bf16 %v6344_v63, %v6342_v1  ;;  %v18097_v1 = vld [vmem:[#allocation46_spill] sm:$0xff]  ;;  %v18098_v63 = vld [vmem:[#allocation5_spill] sm:$0xff]  ;;  %v18103_v29 = vld [vmem:[#allocation15_spill] sm:$0xff] }
 0x7c1   :  { %v6352_v23 = vsel %vm1410_vm3, %v6350_v52, %v6351_v44  ;;  %v18102_v52 = vld [vmem:[#allocation52_spill] sm:$0xff] }
 0x7c4   :  { %11746 = vmatmul.mubr.msk.bf16.gmra.mrb[60].mxu1 %vm632_vm2, %v16572_v9 }
 0x7c5   :  { %11749 = vmatprep.mubr.msk.bf16.mxu1 %vm632_vm2, %v16574_v53  ;;  %v6353_v53 = vrot.slane %v18094_v51, 2  ;;  %v18105_v51 = vld [vmem:[#allocation23_spill] sm:$0xff] }
 0x7c7   :  { %v6354_v58 = vsel %vm1410_vm3, %v6351_v44, %v6353_v53  ;;  %v7682_v53 = vsel %vm729_vm0, %v10178_v14, 0  ;;  %v18104_v44 = vld [vmem:[#allocation16_spill] sm:$0xff] }
 0x7c8   :  { %v16612_v42 = vpack.c.bf16 %v6354_v58, %v6352_v23  ;;  %v4862_v23 = vld [vmem:[%s17264_s1 + $0xc8] sm:$0x1] }
 0x7cc   :  { %11750 = vmatmul.mubr.msk.bf16.gmra.mrb[64].mxu1 %vm632_vm2, %v16596_v19 }
 0x7cd   :  { %11753 = vmatprep.mubr.msk.bf16.mxu1 %vm632_vm2, %v16598_v32 }
 0x7d4   :  { %11754 = vmatmul.mubr.msk.bf16.gmra.mrb[68].mxu1 %vm632_vm2, %v16612_v42 }
 0x7d5   :  { %11759 = vmatprep.mubr.msk.bf16.mxu1 %vm632_vm2, %v15363_v17  ;;  %v16655_v17 = vld [vmem:[%s17264_s1 + $0xc0] sm:$0xff]  }
 0x7d6   :  { %v4968_v58 = vunpack.c.l.bf16 %v16655_v17 }
 0x7dc   :  { %11760 = vmatmul.mubr.msk.bf16.vlgmr.msra.gmra.mrb[8].mxu1 %vm632_vm2, %v15376_v11 }
 0x7dd   :  { %11824 = vmatpush3.bf16.msra.mxu1 %v7302_v15  ;;  %11763 = vmatprep.mubr.msk.bf16.mxu1 %vm632_vm2, %v15401_v48  ;;  %v18106_v15 = vld [vmem:[#allocation24_spill] sm:$0xff] }
 0x7de   :  { %13211 = vmatprep.subr.msk.bf16.mxu1 %vm729_vm0, %v10178_v14  ;;  %v4969_v14 = vunpack.c.h.bf16 %v16655_v17 }
 0x7e4   :  { %11764 = vmatmul.mubr.msk.bf16.gmra.mrb[12].mxu1 %vm632_vm2, %v15417_v0 }
 0x7e5   :  { %11767 = vmatprep.mubr.msk.bf16.mxu1 %vm632_vm2, %v15457_v50 }
 0x7ec   :  { %11768 = vmatmul.mubr.msk.bf16.gmra.mrb[16].mxu1 %vm632_vm2, %v15470_v39 }
 0x7ed   :  { %11771 = vmatprep.mubr.msk.bf16.mxu1 %vm632_vm2, %v15511_v56 }
 0x7f4   :  { %11772 = vmatmul.mubr.msk.bf16.gmra.mrb[20].mxu1 %vm632_vm2, %v15527_v4 }
 0x7f5   :  { %11775 = vmatprep.mubr.msk.bf16.mxu1 %vm632_vm2, %v15565_v24 }
 0x7fc   :  { %11776 = vmatmul.mubr.msk.bf16.gmra.mrb[24].mxu1 %vm632_vm2, %v15577_v5 }
 0x7fd   :  { %11779 = vmatprep.mubr.msk.bf16.mxu1 %vm632_vm2, %v15611_v55 }
 0x804   :  { %11780 = vmatmul.mubr.msk.bf16.gmra.mrb[28].mxu1 %vm632_vm2, %v15627_v8 }
 0x805   :  { %11783 = vmatprep.mubr.msk.bf16.mxu1 %vm632_vm2, %v15665_v38 }
 0x80c   :  { %11784 = vmatmul.mubr.msk.bf16.gmra.mrb[32].mxu1 %vm632_vm2, %v15677_v40 }
 0x80d   :  { %11787 = vmatprep.mubr.msk.bf16.mxu1 %vm632_vm2, %v15711_v7 }
 0x814   :  { %11788 = vmatmul.mubr.msk.bf16.gmra.mrb[36].mxu1 %vm632_vm2, %v16655_v17 }
 0x815   :  { %11791 = vmatprep.mubr.msk.bf16.mxu1 %vm632_vm2, %v15765_v12  ;;  %v16692_v12 = vld [vmem:[%s17264_s1 + $0x198] sm:$0xff]  }
 0x81c   :  { %11792 = vmatmul.mubr.msk.bf16.gmra.mrb[40].mxu1 %vm632_vm2, %v15777_v60 }
 0x81d   :  { %11795 = vmatprep.mubr.msk.bf16.mxu1 %vm632_vm2, %v15809_v6 }
 0x824   :  { %11796 = vmatmul.mubr.msk.bf16.gmra.mrb[44].mxu1 %vm632_vm2, %v15825_v33 }
 0x825   :  { %11799 = vmatprep.mubr.msk.bf16.mxu1 %vm632_vm2, %v15862_v25 }
 0x82c   :  { %11800 = vmatmul.mubr.msk.bf16.gmra.mrb[48].mxu1 %vm632_vm2, %v15874_v57 }
 0x82d   :  { %11803 = vmatprep.mubr.msk.bf16.mxu1 %vm632_vm2, %v15908_v43 }
 0x834   :  { %11804 = vmatmul.mubr.msk.bf16.gmra.mrb[52].mxu1 %vm632_vm2, %v15924_v16 }
 0x835   :  { %11807 = vmatprep.mubr.msk.bf16.mxu1 %vm632_vm2, %v15962_v21 }
 0x83c   :  { %11808 = vmatmul.mubr.msk.bf16.gmra.mrb[56].mxu1 %vm632_vm2, %v15974_v34 }
 0x83d   :  { %11811 = vmatprep.mubr.msk.bf16.mxu1 %vm632_vm2, %v16008_v3 }
 0x844   :  { %11812 = vmatmul.mubr.msk.bf16.gmra.mrb[60].mxu1 %vm632_vm2, %v16024_v10 }
 0x845   :  { %11815 = vmatprep.mubr.msk.bf16.mxu1 %vm632_vm2, %v16062_v54 }
 0x84c   :  { %11816 = vmatmul.mubr.msk.bf16.gmra.mrb[64].mxu1 %vm632_vm2, %v16074_v47 }
 0x84d   :  { %11819 = vmatprep.mubr.msk.bf16.mxu1 %vm632_vm2, %v16114_v61 }
 0x854   :  { %11820 = vmatmul.mubr.msk.bf16.gmra.mrb[68].mxu1 %vm632_vm2, %v16692_v12 }
 0x855   :  { %11825 = vmatprep.mubr.msk.bf16.mxu1 %vm632_vm2, %v18095_v22  ;;  %v18107_v22 = vld [vmem:[#allocation30_spill] sm:$0xff] }
 0x85c   :  { %11826 = vmatmul.mubr.msk.bf16.vlgmr.msra.gmra.mrb[8].mxu1 %vm632_vm2, %v18096_v37 }
 0x85d   :  { %11890 = vmatpush3.bf16.msra.mxu1 %v7682_v53  ;;  %11829 = vmatprep.mubr.msk.bf16.mxu1 %vm632_vm2, %v18097_v1  ;;  %v4970_v53 = vunpack.c.l.bf16 %v4862_v23 }
 0x85e   :  { %13212 = vmatprep.subr.msk.bf16.mxu1 %vm729_vm0, %v16702_v30 }
 0x85f   :  { %v7660_v37 = vrot.slane %v4970_v53, 2 }
 0x864   :  { %11830 = vmatmul.mubr.msk.bf16.gmra.mrb[12].mxu1 %vm632_vm2, %v18098_v63 }
 0x865   :  { %11833 = vmatprep.mubr.msk.bf16.mxu1 %vm632_vm2, %v18099_v2  ;;  %v18109_v2 = vld [vmem:[#allocation7_spill] sm:$0xff] }
 0x86c   :  { %11834 = vmatmul.mubr.msk.bf16.gmra.mrb[16].mxu1 %vm632_vm2, %v18100_v13  ;;  %v18108_v13 = vld [vmem:[#allocation31_spill] sm:$0xff] }
 0x86d   :  { %11837 = vmatprep.mubr.msk.bf16.mxu1 %vm632_vm2, %v18101_v31  ;;  %v7658_v31 = vrot.slane %v4969_v14, 2 }
 0x86f   :  { %v7661_v23 = vsel %vm1410_vm3, %v7658_v31, %v7660_v37  ;;  %v18115_v37 = vld [vmem:[#allocation22_spill] sm:$0xff] }
 0x874   :  { %11838 = vmatmul.mubr.msk.bf16.gmra.mrb[20].mxu1 %vm632_vm2, %v18102_v52  ;;  %v7657_v52 = vrot.slane %v4968_v58, 2 }
 0x875   :  { %11841 = vmatprep.mubr.msk.bf16.mxu1 %vm632_vm2, %v18103_v29  ;;  %v7277_v29 = vrot.slane %v4968_v58, 1 }
 0x876   :  { %v7659_v1 = vsel %vm1410_vm3, %v7657_v52, %v7658_v31  ;;  %v18114_v52 = vld [vmem:[#allocation17_spill] sm:$0xff] }
 0x877   :  { %v16745_v58 = vpack.c.bf16 %v7661_v23, %v7659_v1  ;;  %v18116_v1 = vld [vmem:[#allocation25_spill] sm:$0xff]  ;;  %v5022_v23 = vunpack.c.l.bf16 %v16692_v12 }
 0x878   :  { %v18118_v31 = vld [vmem:[#allocation33_spill] sm:$0xff] }
 0x879   :  { %18110 = vst [vmem:[#allocation29_spill] sm:$0xff] %v16745_v58 }
 0x87c   :  { %11842 = vmatmul.mubr.msk.bf16.gmra.mrb[24].mxu1 %vm632_vm2, %v18104_v44  ;;  %v7278_v44 = vrot.slane %v4969_v14, 1  ;;  %v18111_v14 = vld [vmem:[#allocation10_spill] sm:$0xff] }
 0x87d   :  { %11845 = vmatprep.mubr.msk.bf16.mxu1 %vm632_vm2, %v18105_v51  ;;  %v7280_v51 = vrot.slane %v4970_v53, 1  ;;  %v4916_v53 = vld [vmem:[%s17264_s1 + $0x1a0] sm:$0x1] }
 0x87e   :  { %v7279_v63 = vsel %vm373_vm1, %v7277_v29, %v7278_v44  ;;  %v18113_v29 = vld [vmem:[#allocation14_spill] sm:$0xff] }
 0x884   :  { %11846 = vmatmul.mubr.msk.bf16.gmra.mrb[28].mxu1 %vm632_vm2, %v18106_v15  ;;  %v7281_v15 = vsel %vm373_vm1, %v7278_v44, %v7280_v51  ;;  %v18119_v44 = vld [vmem:[#allocation40_spill] sm:$0xff]  ;;  %v18120_v51 = vld [vmem:[#allocation41_spill] sm:$0xff] }
 0x885   :  { %11849 = vmatprep.mubr.msk.bf16.mxu1 %vm632_vm2, %v18107_v22  ;;  %v16743_v22 = vpack.c.bf16 %v7281_v15, %v7279_v63  ;;  %v18117_v63 = vld [vmem:[#allocation32_spill] sm:$0xff]  ;;  %v18121_v15 = vld [vmem:[#allocation45_spill] sm:$0xff] }
 0x88c   :  { %11850 = vmatmul.mubr.msk.bf16.gmra.mrb[32].mxu1 %vm632_vm2, %v18108_v13 }
 0x88d   :  { %11853 = vmatprep.mubr.msk.bf16.mxu1 %vm632_vm2, %v18109_v2  ;;  %v18112_v2 = vld [vmem:[#allocation11_spill] sm:$0xff] }
 0x894   :  { %11854 = vmatmul.mubr.msk.bf16.gmra.mrb[36].mxu1 %vm632_vm2, %v16743_v22 }
 0x895   :  { %11857 = vmatprep.mubr.msk.bf16.mxu1 %vm632_vm2, %v18111_v14  ;;  %v5023_v14 = vunpack.c.h.bf16 %v16692_v12 }
 0x89c   :  { %11858 = vmatmul.mubr.msk.bf16.gmra.mrb[40].mxu1 %vm632_vm2, %v18112_v2 }
 0x89d   :  { %11861 = vmatprep.mubr.msk.bf16.mxu1 %vm632_vm2, %v18113_v29 }
 0x8a4   :  { %11862 = vmatmul.mubr.msk.bf16.gmra.mrb[44].mxu1 %vm632_vm2, %v18114_v52 }
 0x8a5   :  { %11865 = vmatprep.mubr.msk.bf16.mxu1 %vm632_vm2, %v18115_v37  ;;  %v18122_v37 = vld [vmem:[#allocation49_spill] sm:$0xff] }
 0x8ac   :  { %11866 = vmatmul.mubr.msk.bf16.gmra.mrb[48].mxu1 %vm632_vm2, %v18116_v1  ;;  %v7663_v1 = vrot.slane %v5023_v14, 2 }
 0x8ad   :  { %11869 = vmatprep.mubr.msk.bf16.mxu1 %vm632_vm2, %v18117_v63  ;;  %v7662_v63 = vrot.slane %v5022_v23, 2 }
 0x8af   :  { %v7664_v29 = vsel %vm1410_vm3, %v7662_v63, %v7663_v1  ;;  %v10246_v63 = vld [vmem:[%s17265_s2 + $0x20] sm:$0x3] }
 0x8b4   :  { %11870 = vmatmul.mubr.msk.bf16.gmra.mrb[52].mxu1 %vm632_vm2, %v18118_v31  ;;  %v7282_v31 = vrot.slane %v5022_v23, 1 }
 0x8b5   :  { %11873 = vmatprep.mubr.msk.bf16.mxu1 %vm632_vm2, %v18119_v44  ;;  %v5024_v44 = vunpack.c.l.bf16 %v4916_v53 }
 0x8b7   :  { %v7665_v2 = vrot.slane %v5024_v44, 2 }
 0x8b9   :  { %v7666_v53 = vsel %vm1410_vm3, %v7663_v1, %v7665_v2  ;;  %v18126_v2 = vld [vmem:[#allocation55_spill] sm:$0xff]  ;;  %v18129_v1 = vld [vmem:[#allocation26_spill] sm:$0xff] }
 0x8ba   :  { %v16790_v23 = vpack.c.bf16 %v7666_v53, %v7664_v29  ;;  %v18127_v29 = vld [vmem:[#allocation19_spill] sm:$0xff]  ;;  %v18134_v53 = vld [vmem:[#allocation9_spill] sm:$0xff] }
 0x8bc   :  { %11874 = vmatmul.mubr.msk.bf16.gmra.mrb[56].mxu1 %vm632_vm2, %v18120_v51  ;;  %v7283_v51 = vrot.slane %v5023_v14, 1  ;;  %v18133_v14 = vld [vmem:[#allocation8_spill] sm:$0xff] }
 0x8bd   :  { %11877 = vmatprep.mubr.msk.bf16.mxu1 %vm632_vm2, %v18121_v15  ;;  %v7285_v15 = vrot.slane %v5024_v44, 1  ;;  %v18130_v44 = vld [vmem:[#allocation27_spill] sm:$0xff] }
 0x8be   :  { %v7284_v52 = vsel %vm373_vm1, %v7282_v31, %v7283_v51  ;;  %v8048_v31 = vsel %vm729_vm0, %v16702_v30, 0  ;;  %v18125_v30 = vld [vmem:[#allocation54_spill] sm:$0xff] }
 0x8c4   :  { %11878 = vmatmul.mubr.msk.bf16.gmra.mrb[60].mxu1 %vm632_vm2, %v16101_v20  ;;  %v7286_v20 = vsel %vm373_vm1, %v7283_v51, %v7285_v15  ;;  %v18131_v51 = vld [vmem:[#allocation34_spill] sm:$0xff] }
 0x8c5   :  { %11881 = vmatprep.mubr.msk.bf16.mxu1 %vm632_vm2, %v16132_v59  ;;  %v16788_v59 = vpack.c.bf16 %v7286_v20, %v7284_v52  ;;  %v18123_v20 = vld [vmem:[#allocation38_spill] sm:$0xff]  ;;  %v18128_v52 = vld [vmem:[#allocation20_spill] sm:$0xff] }
 0x8c6   :  { %v18132_v15 = vld [vmem:[#allocation6_spill] sm:$0xff] }
 0x8cc   :  { %11882 = vmatmul.mubr.msk.bf16.gmra.mrb[64].mxu1 %vm632_vm2, %v16134_v36 }
 0x8cd   :  { %11885 = vmatprep.mubr.msk.bf16.mxu1 %vm632_vm2, %v18122_v37 }
 0x8d4   :  { %11886 = vmatmul.mubr.msk.bf16.gmra.mrb[68].mxu1 %vm632_vm2, %v16788_v59 }
 0x8d5   :  { %11891 = vmatprep.mubr.msk.bf16.mxu1 %vm632_vm2, %v16162_v45  ;;  %v18124_v45 = vld [vmem:[#allocation53_spill] sm:$0xff] }
 0x8dc   :  { %11892 = vmatmul.mubr.msk.bf16.vlgmr.msra.gmra.mrb[8].mxu1 %vm632_vm2, %v16257_v49 }
 0x8dd   :  { %11956 = vmatpush3.bf16.msra.mxu1 %v8048_v31  ;;  %11895 = vmatprep.mubr.msk.bf16.mxu1 %vm632_vm2, %v16287_v35  ;;  %v18135_v31 = vld [vmem:[#allocation12_spill] sm:$0xff] }
 0x8de   :  { %13213 = vmatprep.subr.msk.bf16.mxu1 %vm729_vm0, %v10246_v63 }
 0x8e4   :  { %11896 = vmatmul.mubr.msk.bf16.gmra.mrb[12].mxu1 %vm632_vm2, %v18123_v20 }
 0x8e5   :  { %11899 = vmatprep.mubr.msk.bf16.mxu1 %vm632_vm2, %v16311_v26 }
 0x8ec   :  { %11900 = vmatmul.mubr.msk.bf16.gmra.mrb[16].mxu1 %vm632_vm2, %v16313_v18 }
 0x8ed   :  { %11903 = vmatprep.mubr.msk.bf16.mxu1 %vm632_vm2, %v16335_v28 }
 0x8f4   :  { %11904 = vmatmul.mubr.msk.bf16.gmra.mrb[20].mxu1 %vm632_vm2, %v16337_v27 }
 0x8f5   :  { %11907 = vmatprep.mubr.msk.bf16.mxu1 %vm632_vm2, %v16359_v46 }
 0x8fc   :  { %11908 = vmatmul.mubr.msk.bf16.gmra.mrb[24].mxu1 %vm632_vm2, %v18124_v45 }
 0x8fd   :  { %11911 = vmatprep.mubr.msk.bf16.mxu1 %vm632_vm2, %v18125_v30 }
 0x904   :  { %11912 = vmatmul.mubr.msk.bf16.gmra.mrb[28].mxu1 %vm632_vm2, %v18126_v2 }
 0x905   :  { %11915 = vmatprep.mubr.msk.bf16.mxu1 %vm632_vm2, %v18127_v29 }
 0x90c   :  { %11916 = vmatmul.mubr.msk.bf16.gmra.mrb[32].mxu1 %vm632_vm2, %v18128_v52 }
 0x90d   :  { %11919 = vmatprep.mubr.msk.bf16.mxu1 %vm632_vm2, %v16431_v41 }
 0x914   :  { %11920 = vmatmul.mubr.msk.bf16.gmra.mrb[36].mxu1 %vm632_vm2, %v16745_v58  ;;  %v18136_v58 = vld [vmem:[#allocation13_spill] sm:$0xff] }
 0x915   :  { %11923 = vmatprep.mubr.msk.bf16.mxu1 %vm632_vm2, %v18129_v1  ;;  %v18137_v1 = vld [vmem:[#allocation18_spill] sm:$0xff] }
 0x91c   :  { %11924 = vmatmul.mubr.msk.bf16.gmra.mrb[40].mxu1 %vm632_vm2, %v18130_v44 }
 0x91d   :  { %11927 = vmatprep.mubr.msk.bf16.mxu1 %vm632_vm2, %v18131_v51 }
 0x924   :  { %11928 = vmatmul.mubr.msk.bf16.gmra.mrb[44].mxu1 %vm632_vm2, %v18132_v15  ;;  %v18138_v15 = vld [vmem:[#allocation39_spill] sm:$0xff] }
 0x925   :  { %11931 = vmatprep.mubr.msk.bf16.mxu1 %vm632_vm2, %v18133_v14 }
 0x92c   :  { %11932 = vmatmul.mubr.msk.bf16.gmra.mrb[48].mxu1 %vm632_vm2, %v18134_v53 }
 0x92d   :  { %11935 = vmatprep.mubr.msk.bf16.mxu1 %vm632_vm2, %v18135_v31 }
 0x934   :  { %11936 = vmatmul.mubr.msk.bf16.gmra.mrb[52].mxu1 %vm632_vm2, %v18136_v58 }
 0x935   :  { %11939 = vmatprep.mubr.msk.bf16.mxu1 %vm632_vm2, %v16548_v62 }
 0x93c   :  { %11940 = vmatmul.mubr.msk.bf16.gmra.mrb[56].mxu1 %vm632_vm2, %v18137_v1 }
 0x93d   :  { %11943 = vmatprep.mubr.msk.bf16.mxu1 %vm632_vm2, %v16572_v9  ;;  %v8434_v9 = vsel %vm729_vm0, %v10246_v63, 0  ;;  %v18152_v63 = vld [vmem:[#allocation11_spill] sm:$0xff] }
 0x944   :  { %11944 = vmatmul.mubr.msk.bf16.gmra.mrb[60].mxu1 %vm632_vm2, %v18138_v15  ;;  %v10279_v15 = vld [vmem:[%s17265_s2 + $0x22] sm:$0x3] }
 0x945   :  { %11947 = vmatprep.mubr.msk.bf16.mxu1 %vm632_vm2, %v16596_v19 }
 0x94c   :  { %11948 = vmatmul.mubr.msk.bf16.gmra.mrb[64].mxu1 %vm632_vm2, %v16598_v32 }
 0x94d   :  { %11951 = vmatprep.mubr.msk.bf16.mxu1 %vm632_vm2, %v16612_v42 }
 0x954   :  { %11952 = vmatmul.mubr.msk.bf16.gmra.mrb[68].mxu1 %vm632_vm2, %v16790_v23 }
 0x955   :  { %11957 = vmatprep.mubr.msk.bf16.mxu1 %vm632_vm2, %v15376_v11  ;;  %v4863_v11 = vld [vmem:[%s17264_s1 + $0xcc] sm:$0xff]  }
 0x95c   :  { %11958 = vmatmul.mubr.msk.bf16.vlgmr.msra.gmra.mrb[8].mxu1 %vm632_vm2, %v15401_v48  ;;  %v4917_v48 = vld [vmem:[%s17264_s1 + $0x1a4] sm:$0xff]  }
 0x95d   :  { %12022 = vmatpush3.bf16.msra.mxu1 %v8434_v9  ;;  %11961 = vmatprep.mubr.msk.bf16.mxu1 %vm632_vm2, %v15417_v0  ;;  %v18139_v0 = vld [vmem:[#allocation43_spill] sm:$0xff] }
 0x95e   :  { %13214 = vmatprep.subr.msk.bf16.mxu1 %vm729_vm0, %v10279_v15 }
 0x964   :  { %11962 = vmatmul.mubr.msk.bf16.gmra.mrb[12].mxu1 %vm632_vm2, %v15457_v50  ;;  %v8814_v50 = vsel %vm729_vm0, %v10279_v15, 0  ;;  %v18153_v15 = vld [vmem:[#allocation14_spill] sm:$0xff] }
 0x965   :  { %11965 = vmatprep.mubr.msk.bf16.mxu1 %vm632_vm2, %v15470_v39  ;;  %v18140_v39 = vld [vmem:[#allocation46_spill] sm:$0xff] }
 0x96c   :  { %11966 = vmatmul.mubr.msk.bf16.gmra.mrb[16].mxu1 %vm632_vm2, %v15511_v56  ;;  %v18141_v56 = vld [vmem:[#allocation5_spill] sm:$0xff] }
 0x96d   :  { %11969 = vmatprep.mubr.msk.bf16.mxu1 %vm632_vm2, %v15527_v4  ;;  %v18142_v4 = vld [vmem:[#allocation28_spill] sm:$0xff] }
 0x974   :  { %11970 = vmatmul.mubr.msk.bf16.gmra.mrb[20].mxu1 %vm632_vm2, %v15565_v24  ;;  %v18143_v24 = vld [vmem:[#allocation50_spill] sm:$0xff] }
 0x975   :  { %11973 = vmatprep.mubr.msk.bf16.mxu1 %vm632_vm2, %v15577_v5  ;;  %v18144_v5 = vld [vmem:[#allocation51_spill] sm:$0xff] }
 0x97c   :  { %11974 = vmatmul.mubr.msk.bf16.gmra.mrb[24].mxu1 %vm632_vm2, %v15611_v55  ;;  %v18145_v55 = vld [vmem:[#allocation52_spill] sm:$0xff] }
 0x97d   :  { %11977 = vmatprep.mubr.msk.bf16.mxu1 %vm632_vm2, %v15627_v8  ;;  %v18146_v8 = vld [vmem:[#allocation15_spill] sm:$0xff] }
 0x984   :  { %11978 = vmatmul.mubr.msk.bf16.gmra.mrb[28].mxu1 %vm632_vm2, %v15665_v38  ;;  %v18147_v38 = vld [vmem:[#allocation16_spill] sm:$0xff] }
 0x985   :  { %11981 = vmatprep.mubr.msk.bf16.mxu1 %vm632_vm2, %v15677_v40  ;;  %v18148_v40 = vld [vmem:[#allocation23_spill] sm:$0xff] }
 0x98c   :  { %11982 = vmatmul.mubr.msk.bf16.gmra.mrb[32].mxu1 %vm632_vm2, %v15711_v7  ;;  %v18149_v7 = vld [vmem:[#allocation24_spill] sm:$0xff] }
 0x98d   :  { %11985 = vmatprep.mubr.msk.bf16.mxu1 %vm632_vm2, %v16655_v17 }
 0x994   :  { %11986 = vmatmul.mubr.msk.bf16.gmra.mrb[36].mxu1 %vm632_vm2, %v4863_v11 }
 0x995   :  { %11989 = vmatprep.mubr.msk.bf16.mxu1 %vm632_vm2, %v15777_v60  ;;  %v4865_v60 = vld [vmem:[%s17264_s1 + $0xd4] sm:$0x1] }
 0x99c   :  { %11990 = vmatmul.mubr.msk.bf16.gmra.mrb[40].mxu1 %vm632_vm2, %v15809_v6  ;;  %v4971_v6 = vunpack.c.l.bf16 %v4863_v11 }
 0x99d   :  { %11993 = vmatprep.mubr.msk.bf16.mxu1 %vm632_vm2, %v15825_v33  ;;  %v18150_v33 = vld [vmem:[#allocation30_spill] sm:$0xff] }
 0x9a4   :  { %11994 = vmatmul.mubr.msk.bf16.gmra.mrb[44].mxu1 %vm632_vm2, %v15862_v25  ;;  %v4972_v25 = vunpack.c.h.bf16 %v4863_v11  ;;  %v18155_v11 = vld [vmem:[#allocation22_spill] sm:$0xff] }
 0x9a5   :  { %11997 = vmatprep.mubr.msk.bf16.mxu1 %vm632_vm2, %v15874_v57  ;;  %v4973_v57 = vunpack.c.l.bf16 %v4865_v60 }
 0x9a7   :  { %v8792_v9 = vrot.slane %v4973_v57, 2 }
 0x9ac   :  { %11998 = vmatmul.mubr.msk.bf16.gmra.mrb[48].mxu1 %vm632_vm2, %v15908_v43  ;;  %v8409_v43 = vrot.slane %v4971_v6, 1 }
 0x9ad   :  { %12001 = vmatprep.mubr.msk.bf16.mxu1 %vm632_vm2, %v15924_v16  ;;  %v8410_v16 = vrot.slane %v4972_v25, 1 }
 0x9b4   :  { %12002 = vmatmul.mubr.msk.bf16.gmra.mrb[52].mxu1 %vm632_vm2, %v15962_v21  ;;  %v8789_v21 = vrot.slane %v4971_v6, 2 }
 0x9b5   :  { %12005 = vmatprep.mubr.msk.bf16.mxu1 %vm632_vm2, %v15974_v34  ;;  %v8790_v34 = vrot.slane %v4972_v25, 2 }
 0x9b7   :  { %v8793_v17 = vsel %vm1410_vm3, %v8790_v34, %v8792_v9 }
 0x9bc   :  { %12006 = vmatmul.mubr.msk.bf16.gmra.mrb[56].mxu1 %vm632_vm2, %v16008_v3  ;;  %v8412_v3 = vrot.slane %v4973_v57, 1 }
 0x9bd   :  { %12009 = vmatprep.mubr.msk.bf16.mxu1 %vm632_vm2, %v16024_v10  ;;  %v18151_v10 = vld [vmem:[#allocation7_spill] sm:$0xff] }
 0x9c4   :  { %12010 = vmatmul.mubr.msk.bf16.gmra.mrb[60].mxu1 %vm632_vm2, %v16062_v54  ;;  %v8411_v54 = vsel %vm373_vm1, %v8409_v43, %v8410_v16 }
 0x9c5   :  { %12013 = vmatprep.mubr.msk.bf16.mxu1 %vm632_vm2, %v16074_v47  ;;  %v8413_v47 = vsel %vm373_vm1, %v8410_v16, %v8412_v3 }
 0x9cc   :  { %12014 = vmatmul.mubr.msk.bf16.gmra.mrb[64].mxu1 %vm632_vm2, %v16114_v61  ;;  %v8791_v61 = vsel %vm1410_vm3, %v8789_v21, %v8790_v34 }
 0x9cd   :  { %12017 = vmatprep.mubr.msk.bf16.mxu1 %vm632_vm2, %v16692_v12  ;;  %v8423_v12 = vpack.c.bf16 %v8413_v47, %v8411_v54 }
 0x9d4   :  { %12018 = vmatmul.mubr.msk.bf16.gmra.mrb[68].mxu1 %vm632_vm2, %v4917_v48 }
 0x9d5   :  { %12023 = vmatprep.mubr.msk.bf16.mxu1 %vm632_vm2, %v18139_v0  ;;  %v18156_v0 = vld [vmem:[#allocation25_spill] sm:$0xff] }
 0x9dc   :  { %12024 = vmatmul.mubr.msk.bf16.vlgmr.msra.gmra.mrb[8].mxu1 %vm632_vm2, %v18140_v39  ;;  %v18158_v39 = vld [vmem:[#allocation33_spill] sm:$0xff] }
 0x9dd   :  { %12088 = vmatpush3.bf16.msra.mxu1 %v8814_v50  ;;  %12027 = vmatprep.mubr.msk.bf16.mxu1 %vm632_vm2, %v18141_v56  ;;  %v18157_v50 = vld [vmem:[#allocation32_spill] sm:$0xff] }
 0x9de   :  { %v18159_v56 = vld [vmem:[#allocation40_spill] sm:$0xff] }
 0x9e4   :  { %12028 = vmatmul.mubr.msk.bf16.gmra.mrb[12].mxu1 %vm632_vm2, %v18142_v4  ;;  %v18160_v4 = vld [vmem:[#allocation41_spill] sm:$0xff] }
 0x9e5   :  { %12031 = vmatprep.mubr.msk.bf16.mxu1 %vm632_vm2, %v18143_v24  ;;  %v18161_v24 = vld [vmem:[#allocation45_spill] sm:$0xff] }
 0x9ec   :  { %12032 = vmatmul.mubr.msk.bf16.gmra.mrb[16].mxu1 %vm632_vm2, %v18144_v5  ;;  %v18162_v5 = vld [vmem:[#allocation47_spill] sm:$0xff] }
 0x9ed   :  { %12035 = vmatprep.mubr.msk.bf16.mxu1 %vm632_vm2, %v18145_v55  ;;  %v4919_v55 = vld [vmem:[%s17264_s1 + $0x1ac] sm:$0x1] }
 0x9f4   :  { %12036 = vmatmul.mubr.msk.bf16.gmra.mrb[20].mxu1 %vm632_vm2, %v18146_v8  ;;  %v5025_v8 = vunpack.c.l.bf16 %v4917_v48 }
 0x9f5   :  { %12039 = vmatprep.mubr.msk.bf16.mxu1 %vm632_vm2, %v18147_v38  ;;  %v18163_v38 = vld [vmem:[#allocation48_spill] sm:$0xff] }
 0x9f6   :  { %v8414_v60 = vrot.slane %v5025_v8, 1 }
 0x9fc   :  { %12040 = vmatmul.mubr.msk.bf16.gmra.mrb[24].mxu1 %vm632_vm2, %v18148_v40  ;;  %v5026_v40 = vunpack.c.h.bf16 %v4917_v48 }
 0x9fd   :  { %12043 = vmatprep.mubr.msk.bf16.mxu1 %vm632_vm2, %v18149_v7  ;;  %v5027_v7 = vunpack.c.l.bf16 %v4919_v55 }
 0x9fe   :  { %v8415_v6 = vrot.slane %v5026_v40, 1  ;;  %v8795_v25 = vrot.slane %v5026_v40, 2 }
 0x9ff   :  { %v8417_v57 = vrot.slane %v5027_v7, 1  ;;  %v8797_v21 = vrot.slane %v5027_v7, 2 }
 0xa00   :  { %v8416_v43 = vsel %vm373_vm1, %v8414_v60, %v8415_v6 }
 0xa01   :  { %v8418_v16 = vsel %vm373_vm1, %v8415_v6, %v8417_v57 }
 0xa02   :  { %v8424_v34 = vpack.c.bf16 %v8418_v16, %v8416_v43 }
 0xa04   :  { %12044 = vmatmul.mubr.msk.bf16.gmra.mrb[28].mxu1 %vm632_vm2, %v18150_v33  ;;  %v8794_v33 = vrot.slane %v5025_v8, 2 }
 0xa05   :  { %12047 = vmatprep.mubr.msk.bf16.mxu1 %vm632_vm2, %v18108_v13  ;;  %v8803_v13 = vpack.c.bf16 %v8793_v17, %v8791_v61 }
 0xa06   :  { %v8796_v48 = vsel %vm1410_vm3, %v8794_v33, %v8795_v25 }
 0xa0c   :  { %12048 = vmatmul.mubr.msk.bf16.gmra.mrb[32].mxu1 %vm632_vm2, %v18151_v10 }
 0xa0d   :  { %12051 = vmatprep.mubr.msk.bf16.mxu1 %vm632_vm2, %v16743_v22  ;;  %v18154_v22 = vld [vmem:[#allocation17_spill] sm:$0xff] }
 0xa14   :  { %12052 = vmatmul.mubr.msk.bf16.gmra.mrb[36].mxu1 %vm632_vm2, %v8423_v12 }
 0xa15   :  { %12055 = vmatprep.mubr.msk.bf16.mxu1 %vm632_vm2, %v18152_v63 }
 0xa1c   :  { %12056 = vmatmul.mubr.msk.bf16.gmra.mrb[40].mxu1 %vm632_vm2, %v18153_v15 }
 0xa1d   :  { %12059 = vmatprep.mubr.msk.bf16.mxu1 %vm632_vm2, %v18154_v22 }
 0xa24   :  { %12060 = vmatmul.mubr.msk.bf16.gmra.mrb[44].mxu1 %vm632_vm2, %v18155_v11 }
 0xa25   :  { %12063 = vmatprep.mubr.msk.bf16.mxu1 %vm632_vm2, %v18156_v0 }
 0xa2c   :  { %12064 = vmatmul.mubr.msk.bf16.gmra.mrb[48].mxu1 %vm632_vm2, %v18157_v50 }
 0xa2d   :  { %12067 = vmatprep.mubr.msk.bf16.mxu1 %vm632_vm2, %v18158_v39 }
 0xa34   :  { %12068 = vmatmul.mubr.msk.bf16.gmra.mrb[52].mxu1 %vm632_vm2, %v18159_v56 }
 0xa35   :  { %12071 = vmatprep.mubr.msk.bf16.mxu1 %vm632_vm2, %v18160_v4 }
 0xa3c   :  { %12072 = vmatmul.mubr.msk.bf16.gmra.mrb[56].mxu1 %vm632_vm2, %v18161_v24 }
 0xa3d   :  { %12075 = vmatprep.mubr.msk.bf16.mxu1 %vm632_vm2, %v18162_v5 }
 0xa44   :  { %12076 = vmatmul.mubr.msk.bf16.gmra.mrb[60].mxu1 %vm632_vm2, %v18163_v38 }
 0xa45   :  { %12079 = vmatprep.mubr.msk.bf16.mxu1 %vm632_vm2, %v16134_v36  ;;  %v8798_v36 = vsel %vm1410_vm3, %v8795_v25, %v8797_v21 }
 0xa46   :  { %v8804_v3 = vpack.c.bf16 %v8798_v36, %v8796_v48 }
 0xa4c   :  { %12080 = vmatmul.mubr.msk.bf16.gmra.mrb[64].mxu1 %vm632_vm2, %v18122_v37 }
 0xa4d   :  { %12083 = vmatprep.mubr.msk.bf16.mxu1 %vm632_vm2, %v16788_v59  ;;  %v18164_v59 = vld [vmem:[#allocation29_spill] sm:$0xff] }
 0xa54   :  { %12084 = vmatmul.mubr.msk.bf16.gmra.mrb[68].mxu1 %vm632_vm2, %v8424_v34 }
 0xa55   :  { %12089 = vmatprep.mubr.msk.bf16.mxu1 %vm632_vm2, %v16257_v49  ;;  %v18165_v49 = vld [vmem:[#allocation6_spill] sm:$0xff] }
 0xa5c   :  { %12090 = vmatmul.mubr.msk.bf16.vlgmr.msra.gmra.mrb[8].mxu1 %vm632_vm2, %v16287_v35  ;;  %v18166_v35 = vld [vmem:[#allocation21_spill] sm:$0xff] }
 0xa5d   :  { %12093 = vmatprep.mubr.msk.bf16.mxu1 %vm632_vm2, %v18123_v20 }
 0xa64   :  { %12094 = vmatmul.mubr.msk.bf16.gmra.mrb[12].mxu1 %vm632_vm2, %v16311_v26  ;;  %v18167_v26 = vld [vmem:[#allocation39_spill] sm:$0xff] }
 0xa65   :  { %12097 = vmatprep.mubr.msk.bf16.mxu1 %vm632_vm2, %v16313_v18  ;;  %v13296_v18 = vld [vmem:[%s17266_s3 + $0x10] sm:$0xff]  }
 0xa66   :  { %12154 = vmatpush3.bf16.msra.mxu0 %v13296_v18 }
 0xa6c   :  { %12098 = vmatmul.mubr.msk.bf16.gmra.mrb[16].mxu1 %vm632_vm2, %v16335_v28  ;;  %v18168_v28 = vmov 0.0  }
 0xa6d   :  { %12101 = vmatprep.mubr.msk.bf16.mxu1 %vm632_vm2, %v16337_v27  ;;  %12155 = vmatprep.subr.bf16.mxu0 %v18168_v28  ;;  %v13297_v27 = vld [vmem:[%s17266_s3 + $0x18] sm:$0xff]  }
 0xa6e   :  { %12156 = vmatpush3.bf16.msra.mxu0 %v13297_v27 }
 0xa6f   :  { %12161 = vmatprep.subr.bf16.mxu0 %v18168_v28 }
 0xa74   :  { %12102 = vmatmul.mubr.msk.bf16.gmra.mrb[20].mxu1 %vm632_vm2, %v16359_v46  ;;  %v17087_v46 = vld [vmem:[%s17268_s5 + $0x3] ss:$0 sm:$0xff] }
 0xa75   :  { %12105 = vmatprep.mubr.msk.bf16.mxu1 %vm632_vm2, %v18124_v45 }
 0xa7c   :  { %12106 = vmatmul.mubr.msk.bf16.gmra.mrb[24].mxu1 %vm632_vm2, %v18125_v30 }
 0xa7d   :  { %12109 = vmatprep.mubr.msk.bf16.mxu1 %vm632_vm2, %v18126_v2 }
 0xa84   :  { %12110 = vmatmul.mubr.msk.bf16.gmra.mrb[28].mxu1 %vm632_vm2, %v18127_v29 }
 0xa85   :  { %12113 = vmatprep.mubr.msk.bf16.mxu1 %vm632_vm2, %v18128_v52 }
 0xa8c   :  { %12114 = vmatmul.mubr.msk.bf16.gmra.mrb[32].mxu1 %vm632_vm2, %v16431_v41 }
 0xa8d   :  { %12117 = vmatprep.mubr.msk.bf16.mxu1 %vm632_vm2, %v18164_v59 }
 0xa94   :  { %12118 = vmatmul.mubr.msk.bf16.gmra.mrb[36].mxu1 %vm632_vm2, %v8803_v13 }
 0xa95   :  { %12121 = vmatprep.mubr.msk.bf16.mxu1 %vm632_vm2, %v18130_v44 }
 0xa9c   :  { %12122 = vmatmul.mubr.msk.bf16.gmra.mrb[40].mxu1 %vm632_vm2, %v18131_v51 }
 0xa9d   :  { %12125 = vmatprep.mubr.msk.bf16.mxu1 %vm632_vm2, %v18165_v49 }
 0xaa4   :  { %12126 = vmatmul.mubr.msk.bf16.gmra.mrb[44].mxu1 %vm632_vm2, %v18133_v14 }
 0xaa5   :  { %12129 = vmatprep.mubr.msk.bf16.mxu1 %vm632_vm2, %v18134_v53 }
 0xaac   :  { %12130 = vmatmul.mubr.msk.bf16.gmra.mrb[48].mxu1 %vm632_vm2, %v18135_v31 }
 0xaad   :  { %12133 = vmatprep.mubr.msk.bf16.mxu1 %vm632_vm2, %v18136_v58 }
 0xab4   :  { %12134 = vmatmul.mubr.msk.bf16.gmra.mrb[52].mxu1 %vm632_vm2, %v16548_v62 }
 0xab5   :  { %12137 = vmatprep.mubr.msk.bf16.mxu1 %vm632_vm2, %v18137_v1 }
 0xabc   :  { %12138 = vmatmul.mubr.msk.bf16.gmra.mrb[56].mxu1 %vm632_vm2, %v18166_v35 }
 0xabd   :  { %12141 = vmatprep.mubr.msk.bf16.mxu1 %vm632_vm2, %v18167_v26 }
 0xac4   :  { %12142 = vmatmul.mubr.msk.bf16.gmra.mrb[60].mxu1 %vm632_vm2, %v16596_v19 }
 0xac5   :  { %12145 = vmatprep.mubr.msk.bf16.mxu1 %vm632_vm2, %v16598_v32 }
 0xacc   :  { %12146 = vmatmul.mubr.msk.bf16.gmra.mrb[64].mxu1 %vm632_vm2, %v16612_v42 }
 0xacd   :  { %12149 = vmatprep.mubr.msk.bf16.mxu1 %vm632_vm2, %v16790_v23 }
 0xad4   :  { %12150 = vmatmul.mubr.msk.bf16.gmra.mrb[68].mxu1 %vm632_vm2, %v8804_v3 }
 0xb2f   :  { %v12091_v41 = vpop.f32.mrb[8].mxu1 }
 0xb30   :  { %v8850_v62 = vpop.f32.mrb[9].mxu1  ;;  %v9175_v19 = vadd.f32 %v12091_v41, %v17087_v46 }
 0xb31   :  { %v9173_v32 = vadd.f32 %v17087_v46, %v8850_v62  ;;  %v12092_v42 = vpop.f32.mrb[10].mxu1 }
 0xb32   :  { %v8853_v58 = vpop.f32.mrb[11].mxu1  ;;  %v9176_v23 = vadd.f32 %v12092_v42, %v17087_v46  ;;  %v9239_v45 = vmax.f32 %v9175_v19, 0.0 }
 0xb33   :  { %v9237_v37 = vmax.f32 %v9173_v32, 0.0  ;;  %v9174_v20 = vadd.f32 %v17087_v46, %v8853_v58 }
 0xb34   :  { %v9240_v29 = vmax.f32 %v9176_v23, 0.0  ;;  %v9304_v53 = vsel %vm4517_vm4, %v9239_v45, 0.0 }
 0xb35   :  { %v9238_v30 = vmax.f32 %v9174_v20, 0.0  ;;  %v9301_v2 = vsel %vm4517_vm4, %v9237_v37, 0.0 }
 0xb36   :  { %v9306_v61 = vsel %vm4517_vm4, %v9240_v29, 0.0 }
 0xb37   :  { %v9302_v52 = vsel %vm4517_vm4, %v9238_v30, 0.0  ;;  %v12095_v44 = vpop.f32.mrb[12].mxu1 }
 0xb38   :  { %v9303_v51 = vadd.f32 %v9302_v52, %v9301_v2  ;;  %v8866_v14 = vpop.f32.mrb[13].mxu1  ;;  %v9179_v31 = vadd.f32 %v12095_v44, %v17087_v46 }
 0xb39   :  { %v9177_v1 = vadd.f32 %v17087_v46, %v8866_v14  ;;  %v12096_v10 = vpop.f32.mrb[14].mxu1 }
 0xb3a   :  { %v9305_v54 = vadd.f32 %v9304_v53, %v9303_v51  ;;  %v8869_v47 = vpop.f32.mrb[15].mxu1  ;;  %v9180_v17 = vadd.f32 %v12096_v10, %v17087_v46  ;;  %v9243_v63 = vmax.f32 %v9179_v31, 0.0 }
 0xb3b   :  { %v9241_v9 = vmax.f32 %v9177_v1, 0.0  ;;  %v9178_v12 = vadd.f32 %v17087_v46, %v8869_v47 }
 0xb3c   :  { %v9307_v13 = vadd.f32 %v9306_v61, %v9305_v54  ;;  %v9244_v0 = vmax.f32 %v9180_v17, 0.0  ;;  %v9312_v24 = vsel %vm4517_vm4, %v9243_v63, 0.0 }
 0xb3d   :  { %v9308_v15 = vsel %vm4517_vm4, %v9241_v9, 0.0  ;;  %v9242_v22 = vmax.f32 %v9178_v12, 0.0 }
 0xb3e   :  { %v9309_v11 = vadd.f32 %v9308_v15, %v9307_v13  ;;  %v9314_v7 = vsel %vm4517_vm4, %v9244_v0, 0.0 }
 0xb3f   :  { %v9310_v50 = vsel %vm4517_vm4, %v9242_v22, 0.0  ;;  %v12099_v39 = vpop.f32.mrb[16].mxu1 }
 0xb40   :  { %v9311_v56 = vadd.f32 %v9310_v50, %v9309_v11  ;;  %v8882_v4 = vpop.f32.mrb[17].mxu1  ;;  %v9183_v5 = vadd.f32 %v12099_v39, %v17087_v46 }
 0xb41   :  { %v9181_v55 = vadd.f32 %v17087_v46, %v8882_v4  ;;  %v12100_v8 = vpop.f32.mrb[18].mxu1 }
 0xb42   :  { %v9313_v38 = vadd.f32 %v9312_v24, %v9311_v56  ;;  %v8885_v40 = vpop.f32.mrb[19].mxu1  ;;  %v9184_v6 = vadd.f32 %v12100_v8, %v17087_v46  ;;  %v9247_v57 = vmax.f32 %v9183_v5, 0.0 }
 0xb43   :  { %v9245_v60 = vmax.f32 %v9181_v55, 0.0  ;;  %v9182_v33 = vadd.f32 %v17087_v46, %v8885_v40 }
 0xb44   :  { %v9315_v25 = vadd.f32 %v9314_v7, %v9313_v38  ;;  %v9248_v21 = vmax.f32 %v9184_v6, 0.0  ;;  %v9320_v49 = vsel %vm4517_vm4, %v9247_v57, 0.0 }
 0xb45   :  { %v9316_v43 = vsel %vm4517_vm4, %v9245_v60, 0.0  ;;  %v9246_v16 = vmax.f32 %v9182_v33, 0.0 }
 0xb46   :  { %v9317_v48 = vadd.f32 %v9316_v43, %v9315_v25  ;;  %v9322_v62 = vsel %vm4517_vm4, %v9248_v21, 0.0 }
 0xb47   :  { %v9318_v36 = vsel %vm4517_vm4, %v9246_v16, 0.0  ;;  %v12103_v34 = vpop.f32.mrb[20].mxu1 }
 0xb48   :  { %v9319_v3 = vadd.f32 %v9318_v36, %v9317_v48  ;;  %v8898_v59 = vpop.f32.mrb[21].mxu1  ;;  %v9187_v35 = vadd.f32 %v12103_v34, %v17087_v46 }
 0xb49   :  { %v9185_v26 = vadd.f32 %v17087_v46, %v8898_v59  ;;  %v12104_v18 = vpop.f32.mrb[22].mxu1 }
 0xb4a   :  { %v9321_v27 = vadd.f32 %v9320_v49, %v9319_v3  ;;  %v8901_v41 = vpop.f32.mrb[23].mxu1  ;;  %v9188_v32 = vadd.f32 %v12104_v18, %v17087_v46  ;;  %v9251_v37 = vmax.f32 %v9187_v35, 0.0 }
 0xb4b   :  { %v9249_v19 = vmax.f32 %v9185_v26, 0.0  ;;  %v9186_v42 = vadd.f32 %v17087_v46, %v8901_v41 }
 0xb4c   :  { %v9323_v58 = vadd.f32 %v9322_v62, %v9321_v27  ;;  %v9252_v30 = vmax.f32 %v9188_v32, 0.0  ;;  %v9328_v51 = vsel %vm4517_vm4, %v9251_v37, 0.0 }
 0xb4d   :  { %v9324_v23 = vsel %vm4517_vm4, %v9249_v19, 0.0  ;;  %v9250_v20 = vmax.f32 %v9186_v42, 0.0 }
 0xb4e   :  { %v9325_v45 = vadd.f32 %v9324_v23, %v9323_v58  ;;  %v9330_v54 = vsel %vm4517_vm4, %v9252_v30, 0.0 }
 0xb4f   :  { %v9326_v2 = vsel %vm4517_vm4, %v9250_v20, 0.0  ;;  %v12107_v29 = vpop.f32.mrb[24].mxu1 }
 0xb50   :  { %v9327_v52 = vadd.f32 %v9326_v2, %v9325_v45  ;;  %v8914_v44 = vpop.f32.mrb[25].mxu1  ;;  %v9191_v14 = vadd.f32 %v12107_v29, %v17087_v46 }
 0xb51   :  { %v9189_v53 = vadd.f32 %v17087_v46, %v8914_v44  ;;  %v12108_v31 = vpop.f32.mrb[26].mxu1 }
 0xb52   :  { %v9329_v1 = vadd.f32 %v9328_v51, %v9327_v52  ;;  %v8917_v10 = vpop.f32.mrb[27].mxu1  ;;  %v9192_v61 = vadd.f32 %v12108_v31, %v17087_v46  ;;  %v9255_v12 = vmax.f32 %v9191_v14, 0.0 }
 0xb53   :  { %v9253_v47 = vmax.f32 %v9189_v53, 0.0  ;;  %v9190_v9 = vadd.f32 %v17087_v46, %v8917_v10 }
 0xb54   :  { %v9331_v17 = vadd.f32 %v9330_v54, %v9329_v1  ;;  %v9256_v22 = vmax.f32 %v9192_v61, 0.0  ;;  %v9336_v56 = vsel %vm4517_vm4, %v9255_v12, 0.0 }
 0xb55   :  { %v9332_v13 = vsel %vm4517_vm4, %v9253_v47, 0.0  ;;  %v9254_v63 = vmax.f32 %v9190_v9, 0.0 }
 0xb56   :  { %v9333_v15 = vadd.f32 %v9332_v13, %v9331_v17  ;;  %v9338_v38 = vsel %vm4517_vm4, %v9256_v22, 0.0 }
 0xb57   :  { %v9334_v11 = vsel %vm4517_vm4, %v9254_v63, 0.0  ;;  %v12111_v0 = vpop.f32.mrb[28].mxu1 }
 0xb58   :  { %v9335_v50 = vadd.f32 %v9334_v11, %v9333_v15  ;;  %v8930_v39 = vpop.f32.mrb[29].mxu1  ;;  %v9195_v4 = vadd.f32 %v12111_v0, %v17087_v46 }
 0xb59   :  { %v9193_v24 = vadd.f32 %v17087_v46, %v8930_v39  ;;  %v12112_v5 = vpop.f32.mrb[30].mxu1 }
 0xb5a   :  { %v9337_v55 = vadd.f32 %v9336_v56, %v9335_v50  ;;  %v8933_v8 = vpop.f32.mrb[31].mxu1  ;;  %v9196_v7 = vadd.f32 %v12112_v5, %v17087_v46  ;;  %v9259_v33 = vmax.f32 %v9195_v4, 0.0 }
 0xb5b   :  { %v9257_v40 = vmax.f32 %v9193_v24, 0.0  ;;  %v9194_v60 = vadd.f32 %v17087_v46, %v8933_v8 }
 0xb5c   :  { %v9339_v6 = vadd.f32 %v9338_v38, %v9337_v55  ;;  %v9260_v16 = vmax.f32 %v9196_v7, 0.0  ;;  %v9344_v3 = vsel %vm4517_vm4, %v9259_v33, 0.0 }
 0xb5d   :  { %v9340_v25 = vsel %vm4517_vm4, %v9257_v40, 0.0  ;;  %v9258_v57 = vmax.f32 %v9194_v60, 0.0 }
 0xb5e   :  { %v9341_v43 = vadd.f32 %v9340_v25, %v9339_v6  ;;  %v9346_v27 = vsel %vm4517_vm4, %v9260_v16, 0.0 }
 0xb5f   :  { %v9342_v48 = vsel %vm4517_vm4, %v9258_v57, 0.0  ;;  %v12115_v21 = vpop.f32.mrb[32].mxu1 }
 0xb60   :  { %v9343_v36 = vadd.f32 %v9342_v48, %v9341_v43  ;;  %v8946_v34 = vpop.f32.mrb[33].mxu1  ;;  %v9199_v59 = vadd.f32 %v12115_v21, %v17087_v46 }
 0xb61   :  { %v9197_v49 = vadd.f32 %v17087_v46, %v8946_v34  ;;  %v12116_v35 = vpop.f32.mrb[34].mxu1 }
 0xb62   :  { %v9345_v26 = vadd.f32 %v9344_v3, %v9343_v36  ;;  %v8949_v18 = vpop.f32.mrb[35].mxu1  ;;  %v9200_v62 = vadd.f32 %v12116_v35, %v17087_v46  ;;  %v9263_v42 = vmax.f32 %v9199_v59, 0.0 }
 0xb63   :  { %v9261_v41 = vmax.f32 %v9197_v49, 0.0  ;;  %v9198_v19 = vadd.f32 %v17087_v46, %v8949_v18 }
 0xb64   :  { %v9347_v32 = vadd.f32 %v9346_v27, %v9345_v26  ;;  %v9264_v20 = vmax.f32 %v9200_v62, 0.0  ;;  %v9352_v52 = vsel %vm4517_vm4, %v9263_v42, 0.0 }
 0xb65   :  { %v9348_v58 = vsel %vm4517_vm4, %v9261_v41, 0.0  ;;  %v9262_v37 = vmax.f32 %v9198_v19, 0.0 }
 0xb66   :  { %v9349_v23 = vadd.f32 %v9348_v58, %v9347_v32  ;;  %v9354_v1 = vsel %vm4517_vm4, %v9264_v20, 0.0 }
 0xb67   :  { %v9350_v45 = vsel %vm4517_vm4, %v9262_v37, 0.0  ;;  %v12119_v30 = vpop.f32.mrb[36].mxu1 }
 0xb68   :  { %v9351_v2 = vadd.f32 %v9350_v45, %v9349_v23  ;;  %v8962_v29 = vpop.f32.mrb[37].mxu1  ;;  %v9203_v44 = vadd.f32 %v12119_v30, %v17087_v46 }
 0xb69   :  { %v9201_v51 = vadd.f32 %v17087_v46, %v8962_v29  ;;  %v12120_v14 = vpop.f32.mrb[38].mxu1 }
 0xb6a   :  { %v9353_v53 = vadd.f32 %v9352_v52, %v9351_v2  ;;  %v8965_v31 = vpop.f32.mrb[39].mxu1  ;;  %v9204_v54 = vadd.f32 %v12120_v14, %v17087_v46  ;;  %v9267_v9 = vmax.f32 %v9203_v44, 0.0 }
 0xb6b   :  { %v9265_v10 = vmax.f32 %v9201_v51, 0.0  ;;  %v9202_v47 = vadd.f32 %v17087_v46, %v8965_v31 }
 0xb6c   :  { %v9355_v61 = vadd.f32 %v9354_v1, %v9353_v53  ;;  %v9268_v63 = vmax.f32 %v9204_v54, 0.0  ;;  %v9360_v50 = vsel %vm4517_vm4, %v9267_v9, 0.0 }
 0xb6d   :  { %v9356_v17 = vsel %vm4517_vm4, %v9265_v10, 0.0  ;;  %v9266_v12 = vmax.f32 %v9202_v47, 0.0 }
 0xb6e   :  { %v9357_v13 = vadd.f32 %v9356_v17, %v9355_v61  ;;  %v9362_v55 = vsel %vm4517_vm4, %v9268_v63, 0.0 }
 0xb6f   :  { %v9358_v15 = vsel %vm4517_vm4, %v9266_v12, 0.0  ;;  %v12123_v22 = vpop.f32.mrb[40].mxu1 }
 0xb70   :  { %v9359_v11 = vadd.f32 %v9358_v15, %v9357_v13  ;;  %v8978_v0 = vpop.f32.mrb[41].mxu1  ;;  %v9207_v39 = vadd.f32 %v12123_v22, %v17087_v46 }
 0xb71   :  { %v9205_v56 = vadd.f32 %v17087_v46, %v8978_v0  ;;  %v12124_v4 = vpop.f32.mrb[42].mxu1 }
 0xb72   :  { %v9361_v24 = vadd.f32 %v9360_v50, %v9359_v11  ;;  %v8981_v5 = vpop.f32.mrb[43].mxu1  ;;  %v9208_v38 = vadd.f32 %v12124_v4, %v17087_v46  ;;  %v9271_v60 = vmax.f32 %v9207_v39, 0.0 }
 0xb73   :  { %v9269_v8 = vmax.f32 %v9205_v56, 0.0  ;;  %v9206_v40 = vadd.f32 %v17087_v46, %v8981_v5 }
 0xb74   :  { %v17157_v7 = vadd.f32 %v9362_v55, %v9361_v24  ;;  %v9272_v25 = vmax.f32 %v9208_v38, 0.0  ;;  %v9373_v21 = vsel %vm4517_vm4, %v9271_v60, 0.0 }
 0xb75   :  { %v9270_v6 = vmax.f32 %v9206_v40, 0.0  ;;  %v9370_v33 = vsel %vm4517_vm4, %v9269_v8, 0.0 }
 0xb76   :  { %v9375_v35 = vsel %vm4517_vm4, %v9272_v25, 0.0 }
 0xb77   :  { %v9371_v57 = vsel %vm4517_vm4, %v9270_v6, 0.0  ;;  %v12127_v43 = vpop.f32.mrb[44].mxu1 }
 0xb78   :  { %v9372_v16 = vadd.f32 %v9371_v57, %v9370_v33  ;;  %v8994_v48 = vpop.f32.mrb[45].mxu1  ;;  %v9211_v36 = vadd.f32 %v12127_v43, %v17087_v46 }
 0xb79   :  { %v9209_v34 = vadd.f32 %v17087_v46, %v8994_v48  ;;  %v12128_v3 = vpop.f32.mrb[46].mxu1 }
 0xb7a   :  { %v9374_v59 = vadd.f32 %v9373_v21, %v9372_v16  ;;  %v8997_v49 = vpop.f32.mrb[47].mxu1  ;;  %v9212_v18 = vadd.f32 %v12128_v3, %v17087_v46  ;;  %v9275_v62 = vmax.f32 %v9211_v36, 0.0 }
 0xb7b   :  { %v9273_v26 = vmax.f32 %v9209_v34, 0.0  ;;  %v9210_v27 = vadd.f32 %v17087_v46, %v8997_v49 }
 0xb7c   :  { %v9376_v41 = vadd.f32 %v9375_v35, %v9374_v59  ;;  %v9276_v58 = vmax.f32 %v9212_v18, 0.0  ;;  %v9381_v30 = vsel %vm4517_vm4, %v9275_v62, 0.0 }
 0xb7d   :  { %v9377_v19 = vsel %vm4517_vm4, %v9273_v26, 0.0  ;;  %v9274_v32 = vmax.f32 %v9210_v27, 0.0 }
 0xb7e   :  { %v9378_v42 = vadd.f32 %v9377_v19, %v9376_v41  ;;  %v9383_v14 = vsel %vm4517_vm4, %v9276_v58, 0.0 }
 0xb7f   :  { %v9379_v37 = vsel %vm4517_vm4, %v9274_v32, 0.0  ;;  %v12131_v23 = vpop.f32.mrb[48].mxu1 }
 0xb80   :  { %v9380_v20 = vadd.f32 %v9379_v37, %v9378_v42  ;;  %v9010_v45 = vpop.f32.mrb[49].mxu1  ;;  %v9215_v2 = vadd.f32 %v12131_v23, %v17087_v46 }
 0xb81   :  { %v9213_v29 = vadd.f32 %v17087_v46, %v9010_v45  ;;  %v12132_v52 = vpop.f32.mrb[50].mxu1 }
 0xb82   :  { %v9382_v44 = vadd.f32 %v9381_v30, %v9380_v20  ;;  %v9013_v51 = vpop.f32.mrb[51].mxu1  ;;  %v9216_v31 = vadd.f32 %v12132_v52, %v17087_v46  ;;  %v9279_v54 = vmax.f32 %v9215_v2, 0.0 }
 0xb83   :  { %v9277_v53 = vmax.f32 %v9213_v29, 0.0  ;;  %v9214_v1 = vadd.f32 %v17087_v46, %v9013_v51 }
 0xb84   :  { %v9384_v10 = vadd.f32 %v9383_v14, %v9382_v44  ;;  %v9280_v17 = vmax.f32 %v9216_v31, 0.0  ;;  %v9389_v22 = vsel %vm4517_vm4, %v9279_v54, 0.0 }
 0xb85   :  { %v9385_v47 = vsel %vm4517_vm4, %v9277_v53, 0.0  ;;  %v9278_v61 = vmax.f32 %v9214_v1, 0.0 }
 0xb86   :  { %v9386_v9 = vadd.f32 %v9385_v47, %v9384_v10  ;;  %v9391_v4 = vsel %vm4517_vm4, %v9280_v17, 0.0 }
 0xb87   :  { %v9387_v12 = vsel %vm4517_vm4, %v9278_v61, 0.0  ;;  %v12135_v13 = vpop.f32.mrb[52].mxu1 }
 0xb88   :  { %v9388_v63 = vadd.f32 %v9387_v12, %v9386_v9  ;;  %v9026_v15 = vpop.f32.mrb[53].mxu1  ;;  %v9219_v11 = vadd.f32 %v12135_v13, %v17087_v46 }
 0xb89   :  { %v9217_v0 = vadd.f32 %v17087_v46, %v9026_v15  ;;  %v12136_v50 = vpop.f32.mrb[54].mxu1 }
 0xb8a   :  { %v9390_v39 = vadd.f32 %v9389_v22, %v9388_v63  ;;  %v9029_v56 = vpop.f32.mrb[55].mxu1  ;;  %v9220_v5 = vadd.f32 %v12136_v50, %v17087_v46  ;;  %v9283_v38 = vmax.f32 %v9219_v11, 0.0 }
 0xb8b   :  { %v9281_v24 = vmax.f32 %v9217_v0, 0.0  ;;  %v9218_v55 = vadd.f32 %v17087_v46, %v9029_v56 }
 0xb8c   :  { %v9392_v8 = vadd.f32 %v9391_v4, %v9390_v39  ;;  %v9284_v33 = vmax.f32 %v9220_v5, 0.0  ;;  %v9397_v48 = vsel %vm4517_vm4, %v9283_v38, 0.0 }
 0xb8d   :  { %v9393_v40 = vsel %vm4517_vm4, %v9281_v24, 0.0  ;;  %v9282_v60 = vmax.f32 %v9218_v55, 0.0 }
 0xb8e   :  { %v9394_v6 = vadd.f32 %v9393_v40, %v9392_v8  ;;  %v9399_v49 = vsel %vm4517_vm4, %v9284_v33, 0.0 }
 0xb8f   :  { %v9395_v25 = vsel %vm4517_vm4, %v9282_v60, 0.0  ;;  %v12139_v57 = vpop.f32.mrb[56].mxu1  ;;  %v9364_v60 = vrot.slane %v17157_v7, 4 }
 0xb90   :  { %v9396_v43 = vadd.f32 %v9395_v25, %v9394_v6  ;;  %v9042_v16 = vpop.f32.mrb[57].mxu1  ;;  %v9223_v21 = vadd.f32 %v12139_v57, %v17087_v46 }
 0xb91   :  { %v9221_v36 = vadd.f32 %v17087_v46, %v9042_v16  ;;  %v12140_v34 = vpop.f32.mrb[58].mxu1 }
 0xb92   :  { %v9398_v3 = vadd.f32 %v9397_v48, %v9396_v43  ;;  %v9045_v59 = vpop.f32.mrb[59].mxu1  ;;  %v9224_v26 = vadd.f32 %v12140_v34, %v17087_v46  ;;  %v9287_v41 = vmax.f32 %v9223_v21, 0.0 }
 0xb93   :  { %v9285_v35 = vmax.f32 %v9221_v36, 0.0  ;;  %v9222_v18 = vadd.f32 %v17087_v46, %v9045_v59 }
 0xb94   :  { %v9400_v27 = vadd.f32 %v9399_v49, %v9398_v3  ;;  %v9288_v42 = vmax.f32 %v9224_v26, 0.0  ;;  %v9405_v45 = vsel %vm4517_vm4, %v9287_v41, 0.0  ;;  %v9365_v3 = vadd.f32 %v9364_v60, %v17157_v7 }
 0xb95   :  { %v9401_v62 = vsel %vm4517_vm4, %v9285_v35, 0.0  ;;  %v9286_v19 = vmax.f32 %v9222_v18, 0.0 }
 0xb96   :  { %v9402_v32 = vadd.f32 %v9401_v62, %v9400_v27  ;;  %v9407_v51 = vsel %vm4517_vm4, %v9288_v42, 0.0  ;;  %v9366_v42 = vrot.slane %v9365_v3, 2 }
 0xb97   :  { %v9403_v58 = vsel %vm4517_vm4, %v9286_v19, 0.0  ;;  %v12143_v37 = vpop.f32.mrb[60].mxu1 }
 0xb98   :  { %v9404_v23 = vadd.f32 %v9403_v58, %v9402_v32  ;;  %v9058_v20 = vpop.f32.mrb[61].mxu1  ;;  %v9227_v30 = vadd.f32 %v12143_v37, %v17087_v46 }
 0xb99   :  { %v9225_v2 = vadd.f32 %v17087_v46, %v9058_v20  ;;  %v12144_v29 = vpop.f32.mrb[62].mxu1 }
 0xb9a   :  { %v9406_v52 = vadd.f32 %v9405_v45, %v9404_v23  ;;  %v9061_v44 = vpop.f32.mrb[63].mxu1  ;;  %v9228_v53 = vadd.f32 %v12144_v29, %v17087_v46  ;;  %v9291_v10 = vmax.f32 %v9227_v30, 0.0  ;;  %v9367_v45 = vadd.f32 %v9366_v42, %v9365_v3 }
 0xb9b   :  { %v9289_v14 = vmax.f32 %v9225_v2, 0.0  ;;  %v9226_v31 = vadd.f32 %v17087_v46, %v9061_v44 }
 0xb9c   :  { %v9408_v1 = vadd.f32 %v9407_v51, %v9406_v52  ;;  %v9292_v9 = vmax.f32 %v9228_v53, 0.0  ;;  %v9413_v15 = vsel %vm4517_vm4, %v9291_v10, 0.0  ;;  %v9368_v52 = vrot.slane %v9367_v45, 1 }
 0xb9d   :  { %v9409_v54 = vsel %vm4517_vm4, %v9289_v14, 0.0  ;;  %v9290_v47 = vmax.f32 %v9226_v31, 0.0 }
 0xb9e   :  { %v9410_v61 = vadd.f32 %v9409_v54, %v9408_v1  ;;  %v9415_v56 = vsel %vm4517_vm4, %v9292_v9, 0.0  ;;  %v9369_v51 = vadd.f32 %v9368_v52, %v9367_v45 }
 0xb9f   :  { %v9411_v17 = vsel %vm4517_vm4, %v9290_v47, 0.0  ;;  %v12147_v12 = vpop.f32.mrb[64].mxu1 }
 0xba0   :  { %v9412_v13 = vadd.f32 %v9411_v17, %v9410_v61  ;;  %v9074_v63 = vpop.f32.mrb[65].mxu1  ;;  %v9231_v22 = vadd.f32 %v12147_v12, %v17087_v46  ;;  %v9439_v31 = vmul.f32 0.00390625, %v9369_v51 }
 0xba1   :  { %v9229_v11 = vadd.f32 %v17087_v46, %v9074_v63  ;;  %v12148_v0 = vpop.f32.mrb[66].mxu1 }
 0xba2   :  { %v9414_v50 = vadd.f32 %v9413_v15, %v9412_v13  ;;  %v9077_v39 = vpop.f32.mrb[67].mxu1  ;;  %v9232_v24 = vadd.f32 %v12148_v0, %v17087_v46  ;;  %v9295_v8 = vmax.f32 %v9231_v22, 0.0  ;;  %v9441_v54 = vpack.c.bf16 %v9439_v31, %v9439_v31  ;;  %v13298_v13 = vld [vmem:[%s17267_s4 + $0x20] sm:$0xff]   ;;  %v13299_v15 = vld [vmem:[%s17267_s4 + $0x28] sm:$0xff]   ;;  %v13300_v22 = vld [vmem:[%s17267_s4 + $0x30] sm:$0xff]  }
 0xba3   :  { %v9293_v4 = vmax.f32 %v9229_v11, 0.0  ;;  %v9230_v5 = vadd.f32 %v17087_v46, %v9077_v39  ;;  %v13301_v11 = vld [vmem:[%s17267_s4 + $0x38] sm:$0xff]   ;;  %v10317_v0 = vld [vmem:[%s17268_s5 + $0x4] ss:$0 sm:$0xff]  ;;  %s13404_s4 = smov [#allocation2]  }
 0xba4   :  { %v9416_v55 = vadd.f32 %v9415_v56, %v9414_v50  ;;  %v9296_v33 = vmax.f32 %v9232_v24, 0.0  ;;  %v9421_v48 = vsel %vm4517_vm4, %v9295_v8, 0.0  ;;  %v9454_v9 = vunpack.c.l.b16 %v9441_v54 }
 0xba5   :  { %v9417_v38 = vsel %vm4517_vm4, %v9293_v4, 0.0  ;;  %v9294_v40 = vmax.f32 %v9230_v5, 0.0 }
 0xba6   :  { %v9418_v6 = vadd.f32 %v9417_v38, %v9416_v55  ;;  %v9423_v35 = vsel %vm4517_vm4, %v9296_v33, 0.0 }
 0xba7   :  { %v9419_v25 = vsel %vm4517_vm4, %v9294_v40, 0.0  ;;  %v12151_v57 = vpop.f32.mrb[68].mxu1 }
 0xba8   :  { %v9420_v43 = vadd.f32 %v9419_v25, %v9418_v6  ;;  %v9090_v16 = vpop.f32.mrb[69].mxu1  ;;  %v9235_v21 = vadd.f32 %v12151_v57, %v17087_v46  ;;  %v9599_v57 = vpop.xlane.xlu0 %9598 }
 0xba9   :  { %v9233_v36 = vadd.f32 %v17087_v46, %v9090_v16  ;;  %v12152_v34 = vpop.f32.mrb[70].mxu1 }
 0xbaa   :  { %v9422_v59 = vadd.f32 %v9421_v48, %v9420_v43  ;;  %v9093_v49 = vpop.f32.mrb[71].mxu1  ;;  %v9236_v18 = vadd.f32 %v12152_v34, %v17087_v46  ;;  %v9299_v62 = vmax.f32 %v9235_v21, 0.0  ;;  %v9600_v43 = vadd.f32 1e-12, %v9599_v57  ;;  %v18169_v34 = vld [vmem:[#allocation35_spill] sm:$0xff] }
 0xbab   :  { %v9297_v26 = vmax.f32 %v9233_v36, 0.0  ;;  %v9234_v27 = vadd.f32 %v17087_v46, %v9093_v49 }
 0xbac   :  { %v9424_v41 = vadd.f32 %v9423_v35, %v9422_v59  ;;  %v9300_v37 = vmax.f32 %v9236_v18, 0.0  ;;  %v9429_v20 = vsel %vm4517_vm4, %v9299_v62, 0.0  ;;  %13374 = vrsqrt.f32 %v9600_v43 }
 0xbad   :  { %v9425_v19 = vsel %vm4517_vm4, %v9297_v26, 0.0  ;;  %v9298_v32 = vmax.f32 %v9234_v27, 0.0 }
 0xbae   :  { %v9426_v58 = vadd.f32 %v9425_v19, %v9424_v41  ;;  %v9431_v2 = vsel %vm4517_vm4, %v9300_v37, 0.0 }
 0xbaf   :  { %v9427_v23 = vsel %vm4517_vm4, %v9298_v32, 0.0 }
 0xbb0   :  { %v9428_v7 = vadd.f32 %v9427_v23, %v9426_v58 }
 0xbb2   :  { %v9430_v30 = vadd.f32 %v9429_v20, %v9428_v7 }
 0xbb4   :  { %v9432_v29 = vadd.f32 %v9431_v2, %v9430_v30 }
 0xbb6   :  { %v9433_v46 = vrot.slane %v9432_v29, 4  ;;  %v13375_v21 = vpop.eup %13374 }
 0xbb7   :  { %v9602_v3 = vmul.f32 %v13375_v21, %v18169_v34 }
 0xbb8   :  { %v9434_v44 = vadd.f32 %v9433_v46, %v9432_v29 }
 0xbba   :  { %v9435_v14 = vrot.slane %v9434_v44, 2 }
 0xbbc   :  { %v9436_v53 = vadd.f32 %v9435_v14, %v9434_v44 }
 0xbbe   :  { %v9437_v1 = vrot.slane %v9436_v53, 1 }
 0xbc0   :  { %v9438_v10 = vadd.f32 %v9437_v1, %v9436_v53 }
 0xbc2   :  { %v9440_v47 = vmul.f32 0.00390625, %v9438_v10 }
 0xbc4   :  { %v9442_v61 = vpack.c.bf16 %v9440_v47, %v9440_v47 }
 0xbc6   :  { %v9455_v17 = vunpack.c.l.b16 %v9442_v61 }
 0xbc8   :  { %v9456_v12 = vsel %vm4672_vm6, %v9455_v17, %v9454_v9 }
 0xbc9   :  { %v9457_v63 = vpack.c.b16 %v9456_v12, %v9456_v12 }
 0xbcb   :  { %12158 = vmatmul.mubr.msk.bf16.vlgmr.msra.gmra.mrb[64].mxu0 %vm4517_vm4, %v9457_v63 }
 0xbcc   :  { %12162 = vmatpush3.bf16.msra.mxu0 %v13298_v13  ;;  %12169 = vmatprep.mubr.msk.bf16.mxu0 %vm13403_vm5, %v18168_v28 }
 0xbcd   :  { %12163 = vmatprep.subr.bf16.mxu0 %v18168_v28 }
 0xbd0   :  { %12164 = vmatpush3.bf16.msra.mxu0 %v13299_v15 }
 0xbd1   :  { %12165 = vmatprep.subr.bf16.mxu0 %v18168_v28 }
 0xbd4   :  { %12166 = vmatpush3.bf16.msra.mxu0 %v13300_v22 }
 0xbd5   :  { %12167 = vmatprep.subr.bf16.mxu0 %v18168_v28  ;;  %v10329_v28 = vld [vmem:[%s17268_s5 + $0x5] ss:$0 sm:$0xff]  ;;  %s9628_s5 = sshll.u32 %s13404_s4, 4  ;;  %s9629_s5 = int_to_ptr.vmem [resolvable:$true] %s9628_s5 }
 0xbd6   :  { %s13378_s10 = scalar_lea.vmem %s9629_s5, 128  ;;  %p13383_p1 = scmp.lt.s32.totalorder %s9629_s5, %s9629_s5 }
 0xbd7   :  { %p13379_p0 = scmp.ne.s32.totalorder %s9629_s5, %s13378_s10  ;;  %p13384_p2 = scmp.lt.s32.totalorder %s13378_s10, %s13378_s10 }
 0xbd8   :  { %12168 = vmatpush3.bf16.msra.mxu0 %v13301_v11 }
 0xbd9   :  { %p13385_p3 = por %p13384_p2, %p13383_p1 }
 0xbdb   :  { %p13386_p4 = pnand %p13385_p3, %p13379_p0 }
 0xc9e   :  { %v9507_v50 = vpop.f32.mrb[64].mxu0 }
 0xc9f   :  { %v9508_v39 = vadd.f32 %v10317_v0, %v9507_v50  ;;  %v12159_v56 = vpop.f32.mrb[65].mxu0 }
 0xca0   :  { %v9510_v4 = vpop.f32.mrb[66].mxu0 }
 0xca1   :  { %v9513_v24 = vmax.f32 %v9508_v39, 0.0  ;;  %v12160_v5 = vpop.f32.mrb[67].mxu0 }
 0xca3   :  { %v9514_v55 = vpack.c.bf16 %v9513_v24, %v9513_v24 }
 0xca5   :  { %12170 = vmatmul.mubr.msk.bf16.vlgmr.msra.gmra.mrb[68].mxu0 %vm4768_vm7, %v9514_v55 }
 0xd78   :  { %v9589_v8 = vpop.f32.mrb[68].mxu0 }
 0xd79   :  { %v9590_v38 = vadd.f32 %v10329_v28, %v9589_v8  ;;  %v12171_v40 = vpop.f32.mrb[69].mxu0 }
 0xd7a   :  { %v9592_v60 = vpop.f32.mrb[70].mxu0 }
 0xd7b   :  { %v12172_v6 = vpop.f32.mrb[71].mxu0  ;;  %v9603_v33 = vmul.f32 %v9590_v38, %v9590_v38 }
 0xd7d   :  { %v9604_v25 = vsel %vm9596_vm8, %v9603_v33, 0.0 }
 0xd7e   :  { %9605 = vadd.xlane.f32.xlu0 %v9604_v25 }
 0xe0b   :  { %v9606_v16 = vpop.xlane.xlu0 %9605 }
 0xe0c   :  { %v9607_v48 = vadd.f32 1e-12, %v9606_v16 }
 0xe0e   :  { %13376 = vrsqrt.f32 %v9607_v48 }
 0xe18   :  { %v13377_v36 = vpop.eup %13376 }
 0xe19   :  { %v9609_v59 = vmul.f32 %v13377_v36, %v9590_v38 }
 0xe1b   :  { %v9610_v49 = vmul.f32 %v9609_v59, %v9602_v3 }
 0xe1d   :  { %v9611_v35 = vsel %vm9596_vm8, %v9610_v49, 0.0 }
 0xe1e   :  { %9612 = vadd.xlane.f32.xlu1 %v9611_v35 }
 0xeab   :  { %v9613_v26 = vpop.xlane.xlu1 %9612 }
 0xeac   :  { %v9614_v18 = vsel %vm729_vm0, %v9613_v26, 0.0 }
 0xead   :  { %v9615_v27 = vrot.slane %v9614_v18, 4 }
 0xeaf   :  { %v9616_v41 = vadd.f32 %v9615_v27, %v9614_v18 }
 0xeb1   :  { %v9617_v62 = vrot.slane %v9616_v41, 2 }
 0xeb3   :  { %v9618_v19 = vadd.f32 %v9617_v62, %v9616_v41 }
 0xeb5   :  { %v9619_v32 = vrot.slane %v9618_v19, 1 }
 0xeb7   :  { %v9620_v42 = vadd.f32 %v9619_v32, %v9618_v19 }
 0xeb9   :  { %9621 = vst [vmem:[#allocation2] sm:$0xff] %v9620_v42 }
 0xeba   :  { %13389 = shalt.err (!%p13386_p4)
}
 0xebb   :  { %s13390_s12 = scalar_lea.hbm %s17269_s6, 128 }
 0xebc   :  { %p13391_p5 = scmp.ne.s32.totalorder %s17269_s6, %s13390_s12  ;;  %p13394_p6 = scmp.lt.u32.totalorder %s13390_s12, %s17269_s6 }
 0xebe   :  { %p13396_p7 = pnand %p13394_p6, %p13391_p5 }
 0xec0   :  { %13399 = shalt.err (!%p13396_p7)
}
 0xec1   :  { %9631 = dma.vmem_to_hbm [thread:$0]  %s9629_s5, 128, %s17269_s6, [#allocation3]  }
 0xec2   :  { %13400 = dma.done.wait [#allocation3], 128  }
 0xec3   :  { %13401 = vsyncadd [#allocation3], 4294967168 }
 0xec4   :  { %9635 = vsyncpa [#allocation3], 1 }

</bundles_post_ra>
